<compile_context>
chip_gen: v5e
topology: v5e:2x2
jax: 0.10.0
libtpu: 0.0.40
codegen_flags: <defaults>
</compile_context>

<pallas_src>
import math

import jax
import jax.numpy as jnp
import numpy as np
from jax.experimental import pallas as pl
from jax.experimental.pallas import tpu as pltpu

# ----------------------------------------------------------------------------
# Architecture (mirrors Denoising_AE.__init__ / encoder / decoder, eval mode)
# activation codes: 0 = none, 1 = relu, 2 = sigmoid, 3 = sigmoid(relu(x))
# ----------------------------------------------------------------------------
ENC_DIMS = (
    [(58, 30), (30, 30), (30, 25), (25, 25), (25, 25), (25, 20)]
    + [(20, 20)] * 15          # enc6 .. enc20
    + [(20, 15), (15, 20)]     # enc21, enc22
)
DEC_DIMS = (
    [(20, 15), (15, 20)]
    + [(20, 20)] * 14          # dec2 .. dec15
    + [(20, 25), (25, 25), (25, 25), (25, 25), (25, 30), (30, 30), (30, 58)]
)
LAYER_DIMS = ENC_DIMS + DEC_DIMS          # 46 layers total

ENC_ACTS = [1, 1, 1, 1, 1, 1, 1, 1, 1,    # enc0..enc8  relu
            2,                            # enc9 sigmoid
            1, 0, 1, 1, 0,                # enc10..enc14
            1, 1, 1, 1, 1, 1, 1, 1]       # enc15..enc22 relu
DEC_ACTS = [1, 1, 1, 1, 0, 1, 1, 1, 0,    # dec0..dec8
            1, 1, 1, 1, 0, 1, 1, 1, 1,    # dec9..dec17
            3,                            # dec18: sigmoid(relu(.))
            1, 1, 0,                      # dec19..dec21
            3]                            # dec22: sigmoid(relu(.))
LAYER_ACTS = ENC_ACTS + DEC_ACTS
N_LAYERS = len(LAYER_DIMS)                # 46
assert N_LAYERS == 46 and len(LAYER_ACTS) == 46

PAD = 128                                 # lane-dense padded feature width
IN_FEATURES = 58
OUT_FEATURES = 58
TB_MAX = 1024                             # max rows per batch tile
MIN_ROWS_FOR_SPLIT = 16                   # force >=2 grid tiles above this (v7x megacore)


# ----------------------------------------------------------------------------
# Static fold structure: merge every act==0 Linear into the following Linear.
# ----------------------------------------------------------------------------
def _fold_groups(acts):
    groups, i, n = [], 0, len(acts)
    while i < n:
        j = i
        while acts[j] == 0 and j + 1 < n:   # no-activation Linear feeds next Linear
            j += 1
        groups.append(tuple(range(i, j + 1)))
        i = j + 1
    return groups


FOLD_GROUPS = _fold_groups(LAYER_ACTS)
FOLDED_DIMS = [(LAYER_DIMS[g[0]][0], LAYER_DIMS[g[-1]][1]) for g in FOLD_GROUPS]
FOLDED_ACTS = [LAYER_ACTS[g[-1]] for g in FOLD_GROUPS]
N_FOLDED = len(FOLD_GROUPS)
assert N_FOLDED == 40                      # 6 activation-free layers folded away


def _cdiv(a, b):
    return -(-a // b)


def _round_up(n, m):
    return _cdiv(n, m) * m


# ----------------------------------------------------------------------------
# Pallas kernel: one batch tile through the entire folded 40-layer chain
# ----------------------------------------------------------------------------
def _ae_kernel(x_ref, w_ref, b_ref, o_ref):
    # x_ref: (TB, PAD)            f32  zero-padded input tile (streamed)
    # w_ref: (N_FOLDED, PAD, PAD) bf16 zero-padded [in, out] weights (resident)
    # b_ref: (N_FOLDED, PAD)      f32  zero-padded biases            (resident)
    # o_ref: (TB, PAD)            f32  lane-dense output tile
    h = x_ref[...].astype(jnp.bfloat16)               # bf16 carry between layers
    z = None
    for l, act in enumerate(FOLDED_ACTS):             # static 40-layer unroll
        # bf16 operands -> native MXU; f32 accumulation; bias/acts in f32 (VPU/EUP).
        z = jnp.dot(h, w_ref[l],
                    preferred_element_type=jnp.float32) + b_ref[l:l + 1, :]
        if act == 1:
            z = jnp.maximum(z, 0.0)
        elif act == 2:
            z = jax.nn.sigmoid(z)
        elif act == 3:
            z = jax.nn.sigmoid(jnp.maximum(z, 0.0))
        # act == 0 never appears after folding.
        # Padded lanes: relu/none keep 0; sigmoid writes 0.5, annihilated by
        # the next layer's zero-padded weight rows.
        h = z.astype(jnp.bfloat16)
    o_ref[...] = z                                     # unmasked 128-lane store


@jax.jit
def denoising_ae_forward(x, w_stack, b_stack):
    """x: [B, 58] float32 -> [B, 58] float32 (eval-mode forward)."""
    B = x.shape[0]

    # Adaptive batch tiling: >=2 tiles when the batch allows (v7x megacore),
    # <=TB_MAX rows per tile, rows rounded to the 8-sublane granularity.
    n_tiles = _cdiv(B, TB_MAX)
    if B >= MIN_ROWS_FOR_SPLIT:
        n_tiles = max(n_tiles, 2)
    TB = _round_up(_cdiv(B, n_tiles), 8)
    B_pad = _round_up(B, TB)

    # Single fused pad (batch rows + feature lanes); padded rows are zeros.
    x_pad = jnp.pad(x.astype(jnp.float32),
                    ((0, B_pad - B), (0, PAD - IN_FEATURES)))

    n_sigmoid = sum(1 for a in FOLDED_ACTS if a in (2, 3))
    cost = pl.CostEstimate(
        flops=2 * B_pad * N_FOLDED * PAD * PAD,
        transcendentals=B_pad * PAD * n_sigmoid,
        bytes_accessed=(x_pad.size * 4
                        + B_pad * PAD * 4
                        + w_stack.size * w_stack.dtype.itemsize
                        + b_stack.size * b_stack.dtype.itemsize),
    )

    out = pl.pallas_call(
        _ae_kernel,
        grid=(B_pad // TB,),
        in_specs=[
            # activation tile: streamed / double-buffered over the batch grid
            pl.BlockSpec((TB, PAD), lambda i: (i, 0)),
            # weights + biases: constant block index -> DMA'd once, VMEM-resident
            pl.BlockSpec((N_FOLDED, PAD, PAD), lambda i: (0, 0, 0)),
            pl.BlockSpec((N_FOLDED, PAD), lambda i: (0, 0)),
        ],
        out_specs=pl.BlockSpec((TB, PAD), lambda i: (i, 0)),
        out_shape=jax.ShapeDtypeStruct((B_pad, PAD), jnp.float32),
        compiler_params=pltpu.CompilerParams(
            dimension_semantics=("parallel",)),        # megacore split on v7x
        cost_estimate=cost,
    )(x_pad, w_stack, b_stack)

    # Lane-dense kernel store; feature + batch-row slicing fuse here.
    return out[:B, :OUT_FEATURES]


# ----------------------------------------------------------------------------
# Deterministic parameter init (PyTorch nn.Linear-style U(-1/sqrt(fan_in), +)),
# stored transposed vs. PyTorch ([in, out]) so each layer is x @ W + b.
# ----------------------------------------------------------------------------
def init_raw_params(key):
    Ws, bs = [], []
    for fin, fout in LAYER_DIMS:
        key, kw, kb = jax.random.split(key, 3)
        bound = 1.0 / math.sqrt(fin)
        Ws.append(np.asarray(jax.random.uniform(kw, (fin, fout), jnp.float32,
                                                -bound, bound)))
        bs.append(np.asarray(jax.random.uniform(kb, (fout,), jnp.float32,
                                                -bound, bound)))
    return Ws, bs


def fold_and_pack_params(Ws, bs):
    """Fold activation-free Linear pairs and pack zero-padded stacks."""
    w_stack = np.zeros((N_FOLDED, PAD, PAD), np.float32)
    b_stack = np.zeros((N_FOLDED, PAD), np.float32)
    for l, group in enumerate(FOLD_GROUPS):
        W = Ws[group[0]].astype(np.float64)
        b = bs[group[0]].astype(np.float64)
        for nxt in group[1:]:
            b = b @ Ws[nxt] + bs[nxt]
            W = W @ Ws[nxt]
        fin, fout = FOLDED_DIMS[l]
        assert W.shape == (fin, fout)
        w_stack[l, :fin, :fout] = W
        b_stack[l, :fout] = b
    # The 0.5-after-sigmoid padded lanes rely on these staying exactly zero.
    for l, (fin, fout) in enumerate(FOLDED_DIMS):
        assert not w_stack[l, fin:, :].any()
        assert not w_stack[l, :, fout:].any()
        assert not b_stack[l, fout:].any()
    # bf16 weights (MXU-native on v6e/v7x); biases stay f32.
    return jnp.asarray(w_stack).astype(jnp.bfloat16), jnp.asarray(b_stack)


# ----------------------------------------------------------------------------
# References
# ----------------------------------------------------------------------------
def reference_forward_f32(x, Ws, bs):
    """Ground truth: the original unfolded 46-layer chain in float32."""
    h = jnp.asarray(x, jnp.float32)
    for W, b, act in zip(Ws, bs, LAYER_ACTS):
        h = h @ jnp.asarray(W) + jnp.asarray(b)
        if act == 1:
            h = jnp.maximum(h, 0.0)
        elif act == 2:
            h = jax.nn.sigmoid(h)
        elif act == 3:
            h = jax.nn.sigmoid(jnp.maximum(h, 0.0))
    return h


def reference_forward_folded(x, w_stack_bf16, b_stack):
    """Pure-JAX mirror of the kernel math (folded, bf16 operands, f32 accum)."""
    h = jnp.pad(jnp.asarray(x, jnp.float32), ((0, 0), (0, PAD - IN_FEATURES)))
    z = None
    for l, act in enumerate(FOLDED_ACTS):
        z = jnp.dot(h.astype(jnp.bfloat16), w_stack_bf16[l],
                    preferred_element_type=jnp.float32) + b_stack[l]
        if act == 1:
            z = jnp.maximum(z, 0.0)
        elif act == 2:
            z = jax.nn.sigmoid(z)
        elif act == 3:
            z = jax.nn.sigmoid(jnp.maximum(z, 0.0))
        h = z
    return z[:, :OUT_FEATURES]


# ----------------------------------------------------------------------------
if __name__ == "__main__":
    key = jax.random.PRNGKey(0)
    key, kx1, kx2 = jax.random.split(key, 3)
    Ws, bs = init_raw_params(key)
    w_stack, b_stack = fold_and_pack_params(Ws, bs)

    # batch=64: exercises the 2-tile adaptive grid at a small size.
    # batch=300: non-multiple batch -> TB=152, B_pad=304, 2 tiles, slice-back.
    for kx, batch in ((kx1, 64), (kx2, 300)):
        x = jax.random.normal(kx, (batch, IN_FEATURES), jnp.float32)
        out = jax.block_until_ready(denoising_ae_forward(x, w_stack, b_stack))

        # Structural check: same folded / bf16-operand / f32-accum math.
        ref_folded = reference_forward_folded(x, w_stack, b_stack)
        np.testing.assert_allclose(np.asarray(out), np.asarray(ref_folded),
                                   rtol=1e-3, atol=1e-3)

        # Fidelity check vs. the true unfolded float32 model (bf16 + folding
        # error across the 40-layer chain must stay small).
        ref_f32 = reference_forward_f32(x, Ws, bs)
        np.testing.assert_allclose(np.asarray(out), np.asarray(ref_f32),
                                   rtol=5e-2, atol=2e-2)

    # TODO(synk): training-mode Gaussian noise injection, dropout masks and the
    # global-counter latent-variable print are intentionally omitted (eval mode).
    # TODO(synk): optional block-diagonal 2x64 lane packing (2 samples per 128
    # lanes) left out pending a benchmark; would ~halve MXU work per sample.
    print("KERNEL_OK")
</pallas_src>

<mosaic_0001>
module attributes {stable_mosaic.version = 11 : i64} {
  func.func @_ae_kernel(%arg0: i32, %arg1: memref<32x128xf32, #tpu.memory_space<vmem>>, %arg2: memref<40x128x128xbf16, #tpu.memory_space<vmem>>, %arg3: memref<40x128xf32, #tpu.memory_space<vmem>>, %arg4: memref<32x128xf32, #tpu.memory_space<vmem>>) attributes {dimension_semantics = [#tpu.dimension_semantics<parallel>], iteration_bounds = array<i64: 2>, scalar_prefetch = 0 : i64, scratch_operands = 0 : i64, tpu.core_type = #tpu.core_type<tc>, window_params = [{transform_indices = @transform_0, window_bounds = array<i64: 32, 128>}, {pipeline_mode = #tpu.pipeline_mode<synchronous>, transform_indices = @transform_1, window_bounds = array<i64: 40, 128, 128>}, {pipeline_mode = #tpu.pipeline_mode<synchronous>, transform_indices = @transform_2, window_bounds = array<i64: 40, 128>}, {transform_indices = @transform_3, window_bounds = array<i64: 32, 128>}]} {
    %c0 = arith.constant 0 : index
    %c0_0 = arith.constant 0 : index
    %0 = vector.load %arg1[%c0, %c0_0] : memref<32x128xf32, #tpu.memory_space<vmem>>, vector<32x128xf32>
    %1 = arith.truncf %0 : vector<32x128xf32> to vector<32x128xbf16>
    %c0_1 = arith.constant 0 : index
    %c0_2 = arith.constant 0 : index
    %c0_3 = arith.constant 0 : index
    %2 = vector.load %arg2[%c0_1, %c0_2, %c0_3] : memref<40x128x128xbf16, #tpu.memory_space<vmem>>, vector<1x128x128xbf16>
    %3 = vector.shape_cast %2 : vector<1x128x128xbf16> to vector<128x128xbf16>
    %cst = arith.constant dense<0.000000e+00> : vector<32x128xf32>
    %4 = tpu.matmul %1, %3, %cst {dimension_numbers = #tpu.dot_dimension_numbers<[1], [0], [0], [1], [0, 0, 1, 1], [], []>} : vector<32x128xbf16>, vector<128x128xbf16>, vector<32x128xf32> -> vector<32x128xf32>
    %c0_4 = arith.constant 0 : index
    %c0_5 = arith.constant 0 : index
    %5 = vector.load %arg3[%c0_4, %c0_5] : memref<40x128xf32, #tpu.memory_space<vmem>>, vector<1x128xf32>
    %6 = vector.broadcast %5 : vector<1x128xf32> to vector<32x128xf32>
    %7 = arith.addf %4, %6 : vector<32x128xf32>
    %cst_6 = arith.constant 0.000000e+00 : f32
    %8 = vector.broadcast %cst_6 : f32 to vector<32x128xf32>
    %9 = arith.maximumf %7, %8 : vector<32x128xf32>
    %10 = arith.truncf %9 : vector<32x128xf32> to vector<32x128xbf16>
    %c1 = arith.constant 1 : index
    %c0_7 = arith.constant 0 : index
    %c0_8 = arith.constant 0 : index
    %11 = vector.load %arg2[%c1, %c0_7, %c0_8] : memref<40x128x128xbf16, #tpu.memory_space<vmem>>, vector<1x128x128xbf16>
    %12 = vector.shape_cast %11 : vector<1x128x128xbf16> to vector<128x128xbf16>
    %cst_9 = arith.constant dense<0.000000e+00> : vector<32x128xf32>
    %13 = tpu.matmul %10, %12, %cst_9 {dimension_numbers = #tpu.dot_dimension_numbers<[1], [0], [0], [1], [0, 0, 1, 1], [], []>} : vector<32x128xbf16>, vector<128x128xbf16>, vector<32x128xf32> -> vector<32x128xf32>
    %c1_10 = arith.constant 1 : index
    %c0_11 = arith.constant 0 : index
    %14 = vector.load %arg3[%c1_10, %c0_11] : memref<40x128xf32, #tpu.memory_space<vmem>>, vector<1x128xf32>
    %15 = vector.broadcast %14 : vector<1x128xf32> to vector<32x128xf32>
    %16 = arith.addf %13, %15 : vector<32x128xf32>
    %cst_12 = arith.constant 0.000000e+00 : f32
    %17 = vector.broadcast %cst_12 : f32 to vector<32x128xf32>
    %18 = arith.maximumf %16, %17 : vector<32x128xf32>
    %19 = arith.truncf %18 : vector<32x128xf32> to vector<32x128xbf16>
    %c2 = arith.constant 2 : index
    %c0_13 = arith.constant 0 : index
    %c0_14 = arith.constant 0 : index
    %20 = vector.load %arg2[%c2, %c0_13, %c0_14] : memref<40x128x128xbf16, #tpu.memory_space<vmem>>, vector<1x128x128xbf16>
    %21 = vector.shape_cast %20 : vector<1x128x128xbf16> to vector<128x128xbf16>
    %cst_15 = arith.constant dense<0.000000e+00> : vector<32x128xf32>
    %22 = tpu.matmul %19, %21, %cst_15 {dimension_numbers = #tpu.dot_dimension_numbers<[1], [0], [0], [1], [0, 0, 1, 1], [], []>} : vector<32x128xbf16>, vector<128x128xbf16>, vector<32x128xf32> -> vector<32x128xf32>
    %c2_16 = arith.constant 2 : index
    %c0_17 = arith.constant 0 : index
    %23 = vector.load %arg3[%c2_16, %c0_17] : memref<40x128xf32, #tpu.memory_space<vmem>>, vector<1x128xf32>
    %24 = vector.broadcast %23 : vector<1x128xf32> to vector<32x128xf32>
    %25 = arith.addf %22, %24 : vector<32x128xf32>
    %cst_18 = arith.constant 0.000000e+00 : f32
    %26 = vector.broadcast %cst_18 : f32 to vector<32x128xf32>
    %27 = arith.maximumf %25, %26 : vector<32x128xf32>
    %28 = arith.truncf %27 : vector<32x128xf32> to vector<32x128xbf16>
    %c3 = arith.constant 3 : index
    %c0_19 = arith.constant 0 : index
    %c0_20 = arith.constant 0 : index
    %29 = vector.load %arg2[%c3, %c0_19, %c0_20] : memref<40x128x128xbf16, #tpu.memory_space<vmem>>, vector<1x128x128xbf16>
    %30 = vector.shape_cast %29 : vector<1x128x128xbf16> to vector<128x128xbf16>
    %cst_21 = arith.constant dense<0.000000e+00> : vector<32x128xf32>
    %31 = tpu.matmul %28, %30, %cst_21 {dimension_numbers = #tpu.dot_dimension_numbers<[1], [0], [0], [1], [0, 0, 1, 1], [], []>} : vector<32x128xbf16>, vector<128x128xbf16>, vector<32x128xf32> -> vector<32x128xf32>
    %c3_22 = arith.constant 3 : index
    %c0_23 = arith.constant 0 : index
    %32 = vector.load %arg3[%c3_22, %c0_23] : memref<40x128xf32, #tpu.memory_space<vmem>>, vector<1x128xf32>
    %33 = vector.broadcast %32 : vector<1x128xf32> to vector<32x128xf32>
    %34 = arith.addf %31, %33 : vector<32x128xf32>
    %cst_24 = arith.constant 0.000000e+00 : f32
    %35 = vector.broadcast %cst_24 : f32 to vector<32x128xf32>
    %36 = arith.maximumf %34, %35 : vector<32x128xf32>
    %37 = arith.truncf %36 : vector<32x128xf32> to vector<32x128xbf16>
    %c4 = arith.constant 4 : index
    %c0_25 = arith.constant 0 : index
    %c0_26 = arith.constant 0 : index
    %38 = vector.load %arg2[%c4, %c0_25, %c0_26] : memref<40x128x128xbf16, #tpu.memory_space<vmem>>, vector<1x128x128xbf16>
    %39 = vector.shape_cast %38 : vector<1x128x128xbf16> to vector<128x128xbf16>
    %cst_27 = arith.constant dense<0.000000e+00> : vector<32x128xf32>
    %40 = tpu.matmul %37, %39, %cst_27 {dimension_numbers = #tpu.dot_dimension_numbers<[1], [0], [0], [1], [0, 0, 1, 1], [], []>} : vector<32x128xbf16>, vector<128x128xbf16>, vector<32x128xf32> -> vector<32x128xf32>
    %c4_28 = arith.constant 4 : index
    %c0_29 = arith.constant 0 : index
    %41 = vector.load %arg3[%c4_28, %c0_29] : memref<40x128xf32, #tpu.memory_space<vmem>>, vector<1x128xf32>
    %42 = vector.broadcast %41 : vector<1x128xf32> to vector<32x128xf32>
    %43 = arith.addf %40, %42 : vector<32x128xf32>
    %cst_30 = arith.constant 0.000000e+00 : f32
    %44 = vector.broadcast %cst_30 : f32 to vector<32x128xf32>
    %45 = arith.maximumf %43, %44 : vector<32x128xf32>
    %46 = arith.truncf %45 : vector<32x128xf32> to vector<32x128xbf16>
    %c5 = arith.constant 5 : index
    %c0_31 = arith.constant 0 : index
    %c0_32 = arith.constant 0 : index
    %47 = vector.load %arg2[%c5, %c0_31, %c0_32] : memref<40x128x128xbf16, #tpu.memory_space<vmem>>, vector<1x128x128xbf16>
    %48 = vector.shape_cast %47 : vector<1x128x128xbf16> to vector<128x128xbf16>
    %cst_33 = arith.constant dense<0.000000e+00> : vector<32x128xf32>
    %49 = tpu.matmul %46, %48, %cst_33 {dimension_numbers = #tpu.dot_dimension_numbers<[1], [0], [0], [1], [0, 0, 1, 1], [], []>} : vector<32x128xbf16>, vector<128x128xbf16>, vector<32x128xf32> -> vector<32x128xf32>
    %c5_34 = arith.constant 5 : index
    %c0_35 = arith.constant 0 : index
    %50 = vector.load %arg3[%c5_34, %c0_35] : memref<40x128xf32, #tpu.memory_space<vmem>>, vector<1x128xf32>
    %51 = vector.broadcast %50 : vector<1x128xf32> to vector<32x128xf32>
    %52 = arith.addf %49, %51 : vector<32x128xf32>
    %cst_36 = arith.constant 0.000000e+00 : f32
    %53 = vector.broadcast %cst_36 : f32 to vector<32x128xf32>
    %54 = arith.maximumf %52, %53 : vector<32x128xf32>
    %55 = arith.truncf %54 : vector<32x128xf32> to vector<32x128xbf16>
    %c6 = arith.constant 6 : index
    %c0_37 = arith.constant 0 : index
    %c0_38 = arith.constant 0 : index
    %56 = vector.load %arg2[%c6, %c0_37, %c0_38] : memref<40x128x128xbf16, #tpu.memory_space<vmem>>, vector<1x128x128xbf16>
    %57 = vector.shape_cast %56 : vector<1x128x128xbf16> to vector<128x128xbf16>
    %cst_39 = arith.constant dense<0.000000e+00> : vector<32x128xf32>
    %58 = tpu.matmul %55, %57, %cst_39 {dimension_numbers = #tpu.dot_dimension_numbers<[1], [0], [0], [1], [0, 0, 1, 1], [], []>} : vector<32x128xbf16>, vector<128x128xbf16>, vector<32x128xf32> -> vector<32x128xf32>
    %c6_40 = arith.constant 6 : index
    %c0_41 = arith.constant 0 : index
    %59 = vector.load %arg3[%c6_40, %c0_41] : memref<40x128xf32, #tpu.memory_space<vmem>>, vector<1x128xf32>
    %60 = vector.broadcast %59 : vector<1x128xf32> to vector<32x128xf32>
    %61 = arith.addf %58, %60 : vector<32x128xf32>
    %cst_42 = arith.constant 0.000000e+00 : f32
    %62 = vector.broadcast %cst_42 : f32 to vector<32x128xf32>
    %63 = arith.maximumf %61, %62 : vector<32x128xf32>
    %64 = arith.truncf %63 : vector<32x128xf32> to vector<32x128xbf16>
    %c7 = arith.constant 7 : index
    %c0_43 = arith.constant 0 : index
    %c0_44 = arith.constant 0 : index
    %65 = vector.load %arg2[%c7, %c0_43, %c0_44] : memref<40x128x128xbf16, #tpu.memory_space<vmem>>, vector<1x128x128xbf16>
    %66 = vector.shape_cast %65 : vector<1x128x128xbf16> to vector<128x128xbf16>
    %cst_45 = arith.constant dense<0.000000e+00> : vector<32x128xf32>
    %67 = tpu.matmul %64, %66, %cst_45 {dimension_numbers = #tpu.dot_dimension_numbers<[1], [0], [0], [1], [0, 0, 1, 1], [], []>} : vector<32x128xbf16>, vector<128x128xbf16>, vector<32x128xf32> -> vector<32x128xf32>
    %c7_46 = arith.constant 7 : index
    %c0_47 = arith.constant 0 : index
    %68 = vector.load %arg3[%c7_46, %c0_47] : memref<40x128xf32, #tpu.memory_space<vmem>>, vector<1x128xf32>
    %69 = vector.broadcast %68 : vector<1x128xf32> to vector<32x128xf32>
    %70 = arith.addf %67, %69 : vector<32x128xf32>
    %cst_48 = arith.constant 0.000000e+00 : f32
    %71 = vector.broadcast %cst_48 : f32 to vector<32x128xf32>
    %72 = arith.maximumf %70, %71 : vector<32x128xf32>
    %73 = arith.truncf %72 : vector<32x128xf32> to vector<32x128xbf16>
    %c8 = arith.constant 8 : index
    %c0_49 = arith.constant 0 : index
    %c0_50 = arith.constant 0 : index
    %74 = vector.load %arg2[%c8, %c0_49, %c0_50] : memref<40x128x128xbf16, #tpu.memory_space<vmem>>, vector<1x128x128xbf16>
    %75 = vector.shape_cast %74 : vector<1x128x128xbf16> to vector<128x128xbf16>
    %cst_51 = arith.constant dense<0.000000e+00> : vector<32x128xf32>
    %76 = tpu.matmul %73, %75, %cst_51 {dimension_numbers = #tpu.dot_dimension_numbers<[1], [0], [0], [1], [0, 0, 1, 1], [], []>} : vector<32x128xbf16>, vector<128x128xbf16>, vector<32x128xf32> -> vector<32x128xf32>
    %c8_52 = arith.constant 8 : index
    %c0_53 = arith.constant 0 : index
    %77 = vector.load %arg3[%c8_52, %c0_53] : memref<40x128xf32, #tpu.memory_space<vmem>>, vector<1x128xf32>
    %78 = vector.broadcast %77 : vector<1x128xf32> to vector<32x128xf32>
    %79 = arith.addf %76, %78 : vector<32x128xf32>
    %cst_54 = arith.constant 0.000000e+00 : f32
    %80 = vector.broadcast %cst_54 : f32 to vector<32x128xf32>
    %81 = arith.maximumf %79, %80 : vector<32x128xf32>
    %82 = arith.truncf %81 : vector<32x128xf32> to vector<32x128xbf16>
    %c9 = arith.constant 9 : index
    %c0_55 = arith.constant 0 : index
    %c0_56 = arith.constant 0 : index
    %83 = vector.load %arg2[%c9, %c0_55, %c0_56] : memref<40x128x128xbf16, #tpu.memory_space<vmem>>, vector<1x128x128xbf16>
    %84 = vector.shape_cast %83 : vector<1x128x128xbf16> to vector<128x128xbf16>
    %cst_57 = arith.constant dense<0.000000e+00> : vector<32x128xf32>
    %85 = tpu.matmul %82, %84, %cst_57 {dimension_numbers = #tpu.dot_dimension_numbers<[1], [0], [0], [1], [0, 0, 1, 1], [], []>} : vector<32x128xbf16>, vector<128x128xbf16>, vector<32x128xf32> -> vector<32x128xf32>
    %c9_58 = arith.constant 9 : index
    %c0_59 = arith.constant 0 : index
    %86 = vector.load %arg3[%c9_58, %c0_59] : memref<40x128xf32, #tpu.memory_space<vmem>>, vector<1x128xf32>
    %87 = vector.broadcast %86 : vector<1x128xf32> to vector<32x128xf32>
    %88 = arith.addf %85, %87 : vector<32x128xf32>
    %89 = arith.negf %88 : vector<32x128xf32>
    %90 = math.exp %89 : vector<32x128xf32>
    %cst_60 = arith.constant 1.000000e+00 : f32
    %91 = vector.broadcast %cst_60 : f32 to vector<32x128xf32>
    %92 = arith.addf %91, %90 : vector<32x128xf32>
    %93 = arith.divf %91, %92 : vector<32x128xf32>
    %94 = arith.truncf %93 : vector<32x128xf32> to vector<32x128xbf16>
    %c10 = arith.constant 10 : index
    %c0_61 = arith.constant 0 : index
    %c0_62 = arith.constant 0 : index
    %95 = vector.load %arg2[%c10, %c0_61, %c0_62] : memref<40x128x128xbf16, #tpu.memory_space<vmem>>, vector<1x128x128xbf16>
    %96 = vector.shape_cast %95 : vector<1x128x128xbf16> to vector<128x128xbf16>
    %cst_63 = arith.constant dense<0.000000e+00> : vector<32x128xf32>
    %97 = tpu.matmul %94, %96, %cst_63 {dimension_numbers = #tpu.dot_dimension_numbers<[1], [0], [0], [1], [0, 0, 1, 1], [], []>} : vector<32x128xbf16>, vector<128x128xbf16>, vector<32x128xf32> -> vector<32x128xf32>
    %c10_64 = arith.constant 10 : index
    %c0_65 = arith.constant 0 : index
    %98 = vector.load %arg3[%c10_64, %c0_65] : memref<40x128xf32, #tpu.memory_space<vmem>>, vector<1x128xf32>
    %99 = vector.broadcast %98 : vector<1x128xf32> to vector<32x128xf32>
    %100 = arith.addf %97, %99 : vector<32x128xf32>
    %cst_66 = arith.constant 0.000000e+00 : f32
    %101 = vector.broadcast %cst_66 : f32 to vector<32x128xf32>
    %102 = arith.maximumf %100, %101 : vector<32x128xf32>
    %103 = arith.truncf %102 : vector<32x128xf32> to vector<32x128xbf16>
    %c11 = arith.constant 11 : index
    %c0_67 = arith.constant 0 : index
    %c0_68 = arith.constant 0 : index
    %104 = vector.load %arg2[%c11, %c0_67, %c0_68] : memref<40x128x128xbf16, #tpu.memory_space<vmem>>, vector<1x128x128xbf16>
    %105 = vector.shape_cast %104 : vector<1x128x128xbf16> to vector<128x128xbf16>
    %cst_69 = arith.constant dense<0.000000e+00> : vector<32x128xf32>
    %106 = tpu.matmul %103, %105, %cst_69 {dimension_numbers = #tpu.dot_dimension_numbers<[1], [0], [0], [1], [0, 0, 1, 1], [], []>} : vector<32x128xbf16>, vector<128x128xbf16>, vector<32x128xf32> -> vector<32x128xf32>
    %c11_70 = arith.constant 11 : index
    %c0_71 = arith.constant 0 : index
    %107 = vector.load %arg3[%c11_70, %c0_71] : memref<40x128xf32, #tpu.memory_space<vmem>>, vector<1x128xf32>
    %108 = vector.broadcast %107 : vector<1x128xf32> to vector<32x128xf32>
    %109 = arith.addf %106, %108 : vector<32x128xf32>
    %cst_72 = arith.constant 0.000000e+00 : f32
    %110 = vector.broadcast %cst_72 : f32 to vector<32x128xf32>
    %111 = arith.maximumf %109, %110 : vector<32x128xf32>
    %112 = arith.truncf %111 : vector<32x128xf32> to vector<32x128xbf16>
    %c12 = arith.constant 12 : index
    %c0_73 = arith.constant 0 : index
    %c0_74 = arith.constant 0 : index
    %113 = vector.load %arg2[%c12, %c0_73, %c0_74] : memref<40x128x128xbf16, #tpu.memory_space<vmem>>, vector<1x128x128xbf16>
    %114 = vector.shape_cast %113 : vector<1x128x128xbf16> to vector<128x128xbf16>
    %cst_75 = arith.constant dense<0.000000e+00> : vector<32x128xf32>
    %115 = tpu.matmul %112, %114, %cst_75 {dimension_numbers = #tpu.dot_dimension_numbers<[1], [0], [0], [1], [0, 0, 1, 1], [], []>} : vector<32x128xbf16>, vector<128x128xbf16>, vector<32x128xf32> -> vector<32x128xf32>
    %c12_76 = arith.constant 12 : index
    %c0_77 = arith.constant 0 : index
    %116 = vector.load %arg3[%c12_76, %c0_77] : memref<40x128xf32, #tpu.memory_space<vmem>>, vector<1x128xf32>
    %117 = vector.broadcast %116 : vector<1x128xf32> to vector<32x128xf32>
    %118 = arith.addf %115, %117 : vector<32x128xf32>
    %cst_78 = arith.constant 0.000000e+00 : f32
    %119 = vector.broadcast %cst_78 : f32 to vector<32x128xf32>
    %120 = arith.maximumf %118, %119 : vector<32x128xf32>
    %121 = arith.truncf %120 : vector<32x128xf32> to vector<32x128xbf16>
    %c13 = arith.constant 13 : index
    %c0_79 = arith.constant 0 : index
    %c0_80 = arith.constant 0 : index
    %122 = vector.load %arg2[%c13, %c0_79, %c0_80] : memref<40x128x128xbf16, #tpu.memory_space<vmem>>, vector<1x128x128xbf16>
    %123 = vector.shape_cast %122 : vector<1x128x128xbf16> to vector<128x128xbf16>
    %cst_81 = arith.constant dense<0.000000e+00> : vector<32x128xf32>
    %124 = tpu.matmul %121, %123, %cst_81 {dimension_numbers = #tpu.dot_dimension_numbers<[1], [0], [0], [1], [0, 0, 1, 1], [], []>} : vector<32x128xbf16>, vector<128x128xbf16>, vector<32x128xf32> -> vector<32x128xf32>
    %c13_82 = arith.constant 13 : index
    %c0_83 = arith.constant 0 : index
    %125 = vector.load %arg3[%c13_82, %c0_83] : memref<40x128xf32, #tpu.memory_space<vmem>>, vector<1x128xf32>
    %126 = vector.broadcast %125 : vector<1x128xf32> to vector<32x128xf32>
    %127 = arith.addf %124, %126 : vector<32x128xf32>
    %cst_84 = arith.constant 0.000000e+00 : f32
    %128 = vector.broadcast %cst_84 : f32 to vector<32x128xf32>
    %129 = arith.maximumf %127, %128 : vector<32x128xf32>
    %130 = arith.truncf %129 : vector<32x128xf32> to vector<32x128xbf16>
    %c14 = arith.constant 14 : index
    %c0_85 = arith.constant 0 : index
    %c0_86 = arith.constant 0 : index
    %131 = vector.load %arg2[%c14, %c0_85, %c0_86] : memref<40x128x128xbf16, #tpu.memory_space<vmem>>, vector<1x128x128xbf16>
    %132 = vector.shape_cast %131 : vector<1x128x128xbf16> to vector<128x128xbf16>
    %cst_87 = arith.constant dense<0.000000e+00> : vector<32x128xf32>
    %133 = tpu.matmul %130, %132, %cst_87 {dimension_numbers = #tpu.dot_dimension_numbers<[1], [0], [0], [1], [0, 0, 1, 1], [], []>} : vector<32x128xbf16>, vector<128x128xbf16>, vector<32x128xf32> -> vector<32x128xf32>
    %c14_88 = arith.constant 14 : index
    %c0_89 = arith.constant 0 : index
    %134 = vector.load %arg3[%c14_88, %c0_89] : memref<40x128xf32, #tpu.memory_space<vmem>>, vector<1x128xf32>
    %135 = vector.broadcast %134 : vector<1x128xf32> to vector<32x128xf32>
    %136 = arith.addf %133, %135 : vector<32x128xf32>
    %cst_90 = arith.constant 0.000000e+00 : f32
    %137 = vector.broadcast %cst_90 : f32 to vector<32x128xf32>
    %138 = arith.maximumf %136, %137 : vector<32x128xf32>
    %139 = arith.truncf %138 : vector<32x128xf32> to vector<32x128xbf16>
    %c15 = arith.constant 15 : index
    %c0_91 = arith.constant 0 : index
    %c0_92 = arith.constant 0 : index
    %140 = vector.load %arg2[%c15, %c0_91, %c0_92] : memref<40x128x128xbf16, #tpu.memory_space<vmem>>, vector<1x128x128xbf16>
    %141 = vector.shape_cast %140 : vector<1x128x128xbf16> to vector<128x128xbf16>
    %cst_93 = arith.constant dense<0.000000e+00> : vector<32x128xf32>
    %142 = tpu.matmul %139, %141, %cst_93 {dimension_numbers = #tpu.dot_dimension_numbers<[1], [0], [0], [1], [0, 0, 1, 1], [], []>} : vector<32x128xbf16>, vector<128x128xbf16>, vector<32x128xf32> -> vector<32x128xf32>
    %c15_94 = arith.constant 15 : index
    %c0_95 = arith.constant 0 : index
    %143 = vector.load %arg3[%c15_94, %c0_95] : memref<40x128xf32, #tpu.memory_space<vmem>>, vector<1x128xf32>
    %144 = vector.broadcast %143 : vector<1x128xf32> to vector<32x128xf32>
    %145 = arith.addf %142, %144 : vector<32x128xf32>
    %cst_96 = arith.constant 0.000000e+00 : f32
    %146 = vector.broadcast %cst_96 : f32 to vector<32x128xf32>
    %147 = arith.maximumf %145, %146 : vector<32x128xf32>
    %148 = arith.truncf %147 : vector<32x128xf32> to vector<32x128xbf16>
    %c16 = arith.constant 16 : index
    %c0_97 = arith.constant 0 : index
    %c0_98 = arith.constant 0 : index
    %149 = vector.load %arg2[%c16, %c0_97, %c0_98] : memref<40x128x128xbf16, #tpu.memory_space<vmem>>, vector<1x128x128xbf16>
    %150 = vector.shape_cast %149 : vector<1x128x128xbf16> to vector<128x128xbf16>
    %cst_99 = arith.constant dense<0.000000e+00> : vector<32x128xf32>
    %151 = tpu.matmul %148, %150, %cst_99 {dimension_numbers = #tpu.dot_dimension_numbers<[1], [0], [0], [1], [0, 0, 1, 1], [], []>} : vector<32x128xbf16>, vector<128x128xbf16>, vector<32x128xf32> -> vector<32x128xf32>
    %c16_100 = arith.constant 16 : index
    %c0_101 = arith.constant 0 : index
    %152 = vector.load %arg3[%c16_100, %c0_101] : memref<40x128xf32, #tpu.memory_space<vmem>>, vector<1x128xf32>
    %153 = vector.broadcast %152 : vector<1x128xf32> to vector<32x128xf32>
    %154 = arith.addf %151, %153 : vector<32x128xf32>
    %cst_102 = arith.constant 0.000000e+00 : f32
    %155 = vector.broadcast %cst_102 : f32 to vector<32x128xf32>
    %156 = arith.maximumf %154, %155 : vector<32x128xf32>
    %157 = arith.truncf %156 : vector<32x128xf32> to vector<32x128xbf16>
    %c17 = arith.constant 17 : index
    %c0_103 = arith.constant 0 : index
    %c0_104 = arith.constant 0 : index
    %158 = vector.load %arg2[%c17, %c0_103, %c0_104] : memref<40x128x128xbf16, #tpu.memory_space<vmem>>, vector<1x128x128xbf16>
    %159 = vector.shape_cast %158 : vector<1x128x128xbf16> to vector<128x128xbf16>
    %cst_105 = arith.constant dense<0.000000e+00> : vector<32x128xf32>
    %160 = tpu.matmul %157, %159, %cst_105 {dimension_numbers = #tpu.dot_dimension_numbers<[1], [0], [0], [1], [0, 0, 1, 1], [], []>} : vector<32x128xbf16>, vector<128x128xbf16>, vector<32x128xf32> -> vector<32x128xf32>
    %c17_106 = arith.constant 17 : index
    %c0_107 = arith.constant 0 : index
    %161 = vector.load %arg3[%c17_106, %c0_107] : memref<40x128xf32, #tpu.memory_space<vmem>>, vector<1x128xf32>
    %162 = vector.broadcast %161 : vector<1x128xf32> to vector<32x128xf32>
    %163 = arith.addf %160, %162 : vector<32x128xf32>
    %cst_108 = arith.constant 0.000000e+00 : f32
    %164 = vector.broadcast %cst_108 : f32 to vector<32x128xf32>
    %165 = arith.maximumf %163, %164 : vector<32x128xf32>
    %166 = arith.truncf %165 : vector<32x128xf32> to vector<32x128xbf16>
    %c18 = arith.constant 18 : index
    %c0_109 = arith.constant 0 : index
    %c0_110 = arith.constant 0 : index
    %167 = vector.load %arg2[%c18, %c0_109, %c0_110] : memref<40x128x128xbf16, #tpu.memory_space<vmem>>, vector<1x128x128xbf16>
    %168 = vector.shape_cast %167 : vector<1x128x128xbf16> to vector<128x128xbf16>
    %cst_111 = arith.constant dense<0.000000e+00> : vector<32x128xf32>
    %169 = tpu.matmul %166, %168, %cst_111 {dimension_numbers = #tpu.dot_dimension_numbers<[1], [0], [0], [1], [0, 0, 1, 1], [], []>} : vector<32x128xbf16>, vector<128x128xbf16>, vector<32x128xf32> -> vector<32x128xf32>
    %c18_112 = arith.constant 18 : index
    %c0_113 = arith.constant 0 : index
    %170 = vector.load %arg3[%c18_112, %c0_113] : memref<40x128xf32, #tpu.memory_space<vmem>>, vector<1x128xf32>
    %171 = vector.broadcast %170 : vector<1x128xf32> to vector<32x128xf32>
    %172 = arith.addf %169, %171 : vector<32x128xf32>
    %cst_114 = arith.constant 0.000000e+00 : f32
    %173 = vector.broadcast %cst_114 : f32 to vector<32x128xf32>
    %174 = arith.maximumf %172, %173 : vector<32x128xf32>
    %175 = arith.truncf %174 : vector<32x128xf32> to vector<32x128xbf16>
    %c19 = arith.constant 19 : index
    %c0_115 = arith.constant 0 : index
    %c0_116 = arith.constant 0 : index
    %176 = vector.load %arg2[%c19, %c0_115, %c0_116] : memref<40x128x128xbf16, #tpu.memory_space<vmem>>, vector<1x128x128xbf16>
    %177 = vector.shape_cast %176 : vector<1x128x128xbf16> to vector<128x128xbf16>
    %cst_117 = arith.constant dense<0.000000e+00> : vector<32x128xf32>
    %178 = tpu.matmul %175, %177, %cst_117 {dimension_numbers = #tpu.dot_dimension_numbers<[1], [0], [0], [1], [0, 0, 1, 1], [], []>} : vector<32x128xbf16>, vector<128x128xbf16>, vector<32x128xf32> -> vector<32x128xf32>
    %c19_118 = arith.constant 19 : index
    %c0_119 = arith.constant 0 : index
    %179 = vector.load %arg3[%c19_118, %c0_119] : memref<40x128xf32, #tpu.memory_space<vmem>>, vector<1x128xf32>
    %180 = vector.broadcast %179 : vector<1x128xf32> to vector<32x128xf32>
    %181 = arith.addf %178, %180 : vector<32x128xf32>
    %cst_120 = arith.constant 0.000000e+00 : f32
    %182 = vector.broadcast %cst_120 : f32 to vector<32x128xf32>
    %183 = arith.maximumf %181, %182 : vector<32x128xf32>
    %184 = arith.truncf %183 : vector<32x128xf32> to vector<32x128xbf16>
    %c20 = arith.constant 20 : index
    %c0_121 = arith.constant 0 : index
    %c0_122 = arith.constant 0 : index
    %185 = vector.load %arg2[%c20, %c0_121, %c0_122] : memref<40x128x128xbf16, #tpu.memory_space<vmem>>, vector<1x128x128xbf16>
    %186 = vector.shape_cast %185 : vector<1x128x128xbf16> to vector<128x128xbf16>
    %cst_123 = arith.constant dense<0.000000e+00> : vector<32x128xf32>
    %187 = tpu.matmul %184, %186, %cst_123 {dimension_numbers = #tpu.dot_dimension_numbers<[1], [0], [0], [1], [0, 0, 1, 1], [], []>} : vector<32x128xbf16>, vector<128x128xbf16>, vector<32x128xf32> -> vector<32x128xf32>
    %c20_124 = arith.constant 20 : index
    %c0_125 = arith.constant 0 : index
    %188 = vector.load %arg3[%c20_124, %c0_125] : memref<40x128xf32, #tpu.memory_space<vmem>>, vector<1x128xf32>
    %189 = vector.broadcast %188 : vector<1x128xf32> to vector<32x128xf32>
    %190 = arith.addf %187, %189 : vector<32x128xf32>
    %cst_126 = arith.constant 0.000000e+00 : f32
    %191 = vector.broadcast %cst_126 : f32 to vector<32x128xf32>
    %192 = arith.maximumf %190, %191 : vector<32x128xf32>
    %193 = arith.truncf %192 : vector<32x128xf32> to vector<32x128xbf16>
    %c21 = arith.constant 21 : index
    %c0_127 = arith.constant 0 : index
    %c0_128 = arith.constant 0 : index
    %194 = vector.load %arg2[%c21, %c0_127, %c0_128] : memref<40x128x128xbf16, #tpu.memory_space<vmem>>, vector<1x128x128xbf16>
    %195 = vector.shape_cast %194 : vector<1x128x128xbf16> to vector<128x128xbf16>
    %cst_129 = arith.constant dense<0.000000e+00> : vector<32x128xf32>
    %196 = tpu.matmul %193, %195, %cst_129 {dimension_numbers = #tpu.dot_dimension_numbers<[1], [0], [0], [1], [0, 0, 1, 1], [], []>} : vector<32x128xbf16>, vector<128x128xbf16>, vector<32x128xf32> -> vector<32x128xf32>
    %c21_130 = arith.constant 21 : index
    %c0_131 = arith.constant 0 : index
    %197 = vector.load %arg3[%c21_130, %c0_131] : memref<40x128xf32, #tpu.memory_space<vmem>>, vector<1x128xf32>
    %198 = vector.broadcast %197 : vector<1x128xf32> to vector<32x128xf32>
    %199 = arith.addf %196, %198 : vector<32x128xf32>
    %cst_132 = arith.constant 0.000000e+00 : f32
    %200 = vector.broadcast %cst_132 : f32 to vector<32x128xf32>
    %201 = arith.maximumf %199, %200 : vector<32x128xf32>
    %202 = arith.truncf %201 : vector<32x128xf32> to vector<32x128xbf16>
    %c22 = arith.constant 22 : index
    %c0_133 = arith.constant 0 : index
    %c0_134 = arith.constant 0 : index
    %203 = vector.load %arg2[%c22, %c0_133, %c0_134] : memref<40x128x128xbf16, #tpu.memory_space<vmem>>, vector<1x128x128xbf16>
    %204 = vector.shape_cast %203 : vector<1x128x128xbf16> to vector<128x128xbf16>
    %cst_135 = arith.constant dense<0.000000e+00> : vector<32x128xf32>
    %205 = tpu.matmul %202, %204, %cst_135 {dimension_numbers = #tpu.dot_dimension_numbers<[1], [0], [0], [1], [0, 0, 1, 1], [], []>} : vector<32x128xbf16>, vector<128x128xbf16>, vector<32x128xf32> -> vector<32x128xf32>
    %c22_136 = arith.constant 22 : index
    %c0_137 = arith.constant 0 : index
    %206 = vector.load %arg3[%c22_136, %c0_137] : memref<40x128xf32, #tpu.memory_space<vmem>>, vector<1x128xf32>
    %207 = vector.broadcast %206 : vector<1x128xf32> to vector<32x128xf32>
    %208 = arith.addf %205, %207 : vector<32x128xf32>
    %cst_138 = arith.constant 0.000000e+00 : f32
    %209 = vector.broadcast %cst_138 : f32 to vector<32x128xf32>
    %210 = arith.maximumf %208, %209 : vector<32x128xf32>
    %211 = arith.truncf %210 : vector<32x128xf32> to vector<32x128xbf16>
    %c23 = arith.constant 23 : index
    %c0_139 = arith.constant 0 : index
    %c0_140 = arith.constant 0 : index
    %212 = vector.load %arg2[%c23, %c0_139, %c0_140] : memref<40x128x128xbf16, #tpu.memory_space<vmem>>, vector<1x128x128xbf16>
    %213 = vector.shape_cast %212 : vector<1x128x128xbf16> to vector<128x128xbf16>
    %cst_141 = arith.constant dense<0.000000e+00> : vector<32x128xf32>
    %214 = tpu.matmul %211, %213, %cst_141 {dimension_numbers = #tpu.dot_dimension_numbers<[1], [0], [0], [1], [0, 0, 1, 1], [], []>} : vector<32x128xbf16>, vector<128x128xbf16>, vector<32x128xf32> -> vector<32x128xf32>
    %c23_142 = arith.constant 23 : index
    %c0_143 = arith.constant 0 : index
    %215 = vector.load %arg3[%c23_142, %c0_143] : memref<40x128xf32, #tpu.memory_space<vmem>>, vector<1x128xf32>
    %216 = vector.broadcast %215 : vector<1x128xf32> to vector<32x128xf32>
    %217 = arith.addf %214, %216 : vector<32x128xf32>
    %cst_144 = arith.constant 0.000000e+00 : f32
    %218 = vector.broadcast %cst_144 : f32 to vector<32x128xf32>
    %219 = arith.maximumf %217, %218 : vector<32x128xf32>
    %220 = arith.truncf %219 : vector<32x128xf32> to vector<32x128xbf16>
    %c24 = arith.constant 24 : index
    %c0_145 = arith.constant 0 : index
    %c0_146 = arith.constant 0 : index
    %221 = vector.load %arg2[%c24, %c0_145, %c0_146] : memref<40x128x128xbf16, #tpu.memory_space<vmem>>, vector<1x128x128xbf16>
    %222 = vector.shape_cast %221 : vector<1x128x128xbf16> to vector<128x128xbf16>
    %cst_147 = arith.constant dense<0.000000e+00> : vector<32x128xf32>
    %223 = tpu.matmul %220, %222, %cst_147 {dimension_numbers = #tpu.dot_dimension_numbers<[1], [0], [0], [1], [0, 0, 1, 1], [], []>} : vector<32x128xbf16>, vector<128x128xbf16>, vector<32x128xf32> -> vector<32x128xf32>
    %c24_148 = arith.constant 24 : index
    %c0_149 = arith.constant 0 : index
    %224 = vector.load %arg3[%c24_148, %c0_149] : memref<40x128xf32, #tpu.memory_space<vmem>>, vector<1x128xf32>
    %225 = vector.broadcast %224 : vector<1x128xf32> to vector<32x128xf32>
    %226 = arith.addf %223, %225 : vector<32x128xf32>
    %cst_150 = arith.constant 0.000000e+00 : f32
    %227 = vector.broadcast %cst_150 : f32 to vector<32x128xf32>
    %228 = arith.maximumf %226, %227 : vector<32x128xf32>
    %229 = arith.truncf %228 : vector<32x128xf32> to vector<32x128xbf16>
    %c25 = arith.constant 25 : index
    %c0_151 = arith.constant 0 : index
    %c0_152 = arith.constant 0 : index
    %230 = vector.load %arg2[%c25, %c0_151, %c0_152] : memref<40x128x128xbf16, #tpu.memory_space<vmem>>, vector<1x128x128xbf16>
    %231 = vector.shape_cast %230 : vector<1x128x128xbf16> to vector<128x128xbf16>
    %cst_153 = arith.constant dense<0.000000e+00> : vector<32x128xf32>
    %232 = tpu.matmul %229, %231, %cst_153 {dimension_numbers = #tpu.dot_dimension_numbers<[1], [0], [0], [1], [0, 0, 1, 1], [], []>} : vector<32x128xbf16>, vector<128x128xbf16>, vector<32x128xf32> -> vector<32x128xf32>
    %c25_154 = arith.constant 25 : index
    %c0_155 = arith.constant 0 : index
    %233 = vector.load %arg3[%c25_154, %c0_155] : memref<40x128xf32, #tpu.memory_space<vmem>>, vector<1x128xf32>
    %234 = vector.broadcast %233 : vector<1x128xf32> to vector<32x128xf32>
    %235 = arith.addf %232, %234 : vector<32x128xf32>
    %cst_156 = arith.constant 0.000000e+00 : f32
    %236 = vector.broadcast %cst_156 : f32 to vector<32x128xf32>
    %237 = arith.maximumf %235, %236 : vector<32x128xf32>
    %238 = arith.truncf %237 : vector<32x128xf32> to vector<32x128xbf16>
    %c26 = arith.constant 26 : index
    %c0_157 = arith.constant 0 : index
    %c0_158 = arith.constant 0 : index
    %239 = vector.load %arg2[%c26, %c0_157, %c0_158] : memref<40x128x128xbf16, #tpu.memory_space<vmem>>, vector<1x128x128xbf16>
    %240 = vector.shape_cast %239 : vector<1x128x128xbf16> to vector<128x128xbf16>
    %cst_159 = arith.constant dense<0.000000e+00> : vector<32x128xf32>
    %241 = tpu.matmul %238, %240, %cst_159 {dimension_numbers = #tpu.dot_dimension_numbers<[1], [0], [0], [1], [0, 0, 1, 1], [], []>} : vector<32x128xbf16>, vector<128x128xbf16>, vector<32x128xf32> -> vector<32x128xf32>
    %c26_160 = arith.constant 26 : index
    %c0_161 = arith.constant 0 : index
    %242 = vector.load %arg3[%c26_160, %c0_161] : memref<40x128xf32, #tpu.memory_space<vmem>>, vector<1x128xf32>
    %243 = vector.broadcast %242 : vector<1x128xf32> to vector<32x128xf32>
    %244 = arith.addf %241, %243 : vector<32x128xf32>
    %cst_162 = arith.constant 0.000000e+00 : f32
    %245 = vector.broadcast %cst_162 : f32 to vector<32x128xf32>
    %246 = arith.maximumf %244, %245 : vector<32x128xf32>
    %247 = arith.truncf %246 : vector<32x128xf32> to vector<32x128xbf16>
    %c27 = arith.constant 27 : index
    %c0_163 = arith.constant 0 : index
    %c0_164 = arith.constant 0 : index
    %248 = vector.load %arg2[%c27, %c0_163, %c0_164] : memref<40x128x128xbf16, #tpu.memory_space<vmem>>, vector<1x128x128xbf16>
    %249 = vector.shape_cast %248 : vector<1x128x128xbf16> to vector<128x128xbf16>
    %cst_165 = arith.constant dense<0.000000e+00> : vector<32x128xf32>
    %250 = tpu.matmul %247, %249, %cst_165 {dimension_numbers = #tpu.dot_dimension_numbers<[1], [0], [0], [1], [0, 0, 1, 1], [], []>} : vector<32x128xbf16>, vector<128x128xbf16>, vector<32x128xf32> -> vector<32x128xf32>
    %c27_166 = arith.constant 27 : index
    %c0_167 = arith.constant 0 : index
    %251 = vector.load %arg3[%c27_166, %c0_167] : memref<40x128xf32, #tpu.memory_space<vmem>>, vector<1x128xf32>
    %252 = vector.broadcast %251 : vector<1x128xf32> to vector<32x128xf32>
    %253 = arith.addf %250, %252 : vector<32x128xf32>
    %cst_168 = arith.constant 0.000000e+00 : f32
    %254 = vector.broadcast %cst_168 : f32 to vector<32x128xf32>
    %255 = arith.maximumf %253, %254 : vector<32x128xf32>
    %256 = arith.truncf %255 : vector<32x128xf32> to vector<32x128xbf16>
    %c28 = arith.constant 28 : index
    %c0_169 = arith.constant 0 : index
    %c0_170 = arith.constant 0 : index
    %257 = vector.load %arg2[%c28, %c0_169, %c0_170] : memref<40x128x128xbf16, #tpu.memory_space<vmem>>, vector<1x128x128xbf16>
    %258 = vector.shape_cast %257 : vector<1x128x128xbf16> to vector<128x128xbf16>
    %cst_171 = arith.constant dense<0.000000e+00> : vector<32x128xf32>
    %259 = tpu.matmul %256, %258, %cst_171 {dimension_numbers = #tpu.dot_dimension_numbers<[1], [0], [0], [1], [0, 0, 1, 1], [], []>} : vector<32x128xbf16>, vector<128x128xbf16>, vector<32x128xf32> -> vector<32x128xf32>
    %c28_172 = arith.constant 28 : index
    %c0_173 = arith.constant 0 : index
    %260 = vector.load %arg3[%c28_172, %c0_173] : memref<40x128xf32, #tpu.memory_space<vmem>>, vector<1x128xf32>
    %261 = vector.broadcast %260 : vector<1x128xf32> to vector<32x128xf32>
    %262 = arith.addf %259, %261 : vector<32x128xf32>
    %cst_174 = arith.constant 0.000000e+00 : f32
    %263 = vector.broadcast %cst_174 : f32 to vector<32x128xf32>
    %264 = arith.maximumf %262, %263 : vector<32x128xf32>
    %265 = arith.truncf %264 : vector<32x128xf32> to vector<32x128xbf16>
    %c29 = arith.constant 29 : index
    %c0_175 = arith.constant 0 : index
    %c0_176 = arith.constant 0 : index
    %266 = vector.load %arg2[%c29, %c0_175, %c0_176] : memref<40x128x128xbf16, #tpu.memory_space<vmem>>, vector<1x128x128xbf16>
    %267 = vector.shape_cast %266 : vector<1x128x128xbf16> to vector<128x128xbf16>
    %cst_177 = arith.constant dense<0.000000e+00> : vector<32x128xf32>
    %268 = tpu.matmul %265, %267, %cst_177 {dimension_numbers = #tpu.dot_dimension_numbers<[1], [0], [0], [1], [0, 0, 1, 1], [], []>} : vector<32x128xbf16>, vector<128x128xbf16>, vector<32x128xf32> -> vector<32x128xf32>
    %c29_178 = arith.constant 29 : index
    %c0_179 = arith.constant 0 : index
    %269 = vector.load %arg3[%c29_178, %c0_179] : memref<40x128xf32, #tpu.memory_space<vmem>>, vector<1x128xf32>
    %270 = vector.broadcast %269 : vector<1x128xf32> to vector<32x128xf32>
    %271 = arith.addf %268, %270 : vector<32x128xf32>
    %cst_180 = arith.constant 0.000000e+00 : f32
    %272 = vector.broadcast %cst_180 : f32 to vector<32x128xf32>
    %273 = arith.maximumf %271, %272 : vector<32x128xf32>
    %274 = arith.truncf %273 : vector<32x128xf32> to vector<32x128xbf16>
    %c30 = arith.constant 30 : index
    %c0_181 = arith.constant 0 : index
    %c0_182 = arith.constant 0 : index
    %275 = vector.load %arg2[%c30, %c0_181, %c0_182] : memref<40x128x128xbf16, #tpu.memory_space<vmem>>, vector<1x128x128xbf16>
    %276 = vector.shape_cast %275 : vector<1x128x128xbf16> to vector<128x128xbf16>
    %cst_183 = arith.constant dense<0.000000e+00> : vector<32x128xf32>
    %277 = tpu.matmul %274, %276, %cst_183 {dimension_numbers = #tpu.dot_dimension_numbers<[1], [0], [0], [1], [0, 0, 1, 1], [], []>} : vector<32x128xbf16>, vector<128x128xbf16>, vector<32x128xf32> -> vector<32x128xf32>
    %c30_184 = arith.constant 30 : index
    %c0_185 = arith.constant 0 : index
    %278 = vector.load %arg3[%c30_184, %c0_185] : memref<40x128xf32, #tpu.memory_space<vmem>>, vector<1x128xf32>
    %279 = vector.broadcast %278 : vector<1x128xf32> to vector<32x128xf32>
    %280 = arith.addf %277, %279 : vector<32x128xf32>
    %cst_186 = arith.constant 0.000000e+00 : f32
    %281 = vector.broadcast %cst_186 : f32 to vector<32x128xf32>
    %282 = arith.maximumf %280, %281 : vector<32x128xf32>
    %283 = arith.truncf %282 : vector<32x128xf32> to vector<32x128xbf16>
    %c31 = arith.constant 31 : index
    %c0_187 = arith.constant 0 : index
    %c0_188 = arith.constant 0 : index
    %284 = vector.load %arg2[%c31, %c0_187, %c0_188] : memref<40x128x128xbf16, #tpu.memory_space<vmem>>, vector<1x128x128xbf16>
    %285 = vector.shape_cast %284 : vector<1x128x128xbf16> to vector<128x128xbf16>
    %cst_189 = arith.constant dense<0.000000e+00> : vector<32x128xf32>
    %286 = tpu.matmul %283, %285, %cst_189 {dimension_numbers = #tpu.dot_dimension_numbers<[1], [0], [0], [1], [0, 0, 1, 1], [], []>} : vector<32x128xbf16>, vector<128x128xbf16>, vector<32x128xf32> -> vector<32x128xf32>
    %c31_190 = arith.constant 31 : index
    %c0_191 = arith.constant 0 : index
    %287 = vector.load %arg3[%c31_190, %c0_191] : memref<40x128xf32, #tpu.memory_space<vmem>>, vector<1x128xf32>
    %288 = vector.broadcast %287 : vector<1x128xf32> to vector<32x128xf32>
    %289 = arith.addf %286, %288 : vector<32x128xf32>
    %cst_192 = arith.constant 0.000000e+00 : f32
    %290 = vector.broadcast %cst_192 : f32 to vector<32x128xf32>
    %291 = arith.maximumf %289, %290 : vector<32x128xf32>
    %292 = arith.truncf %291 : vector<32x128xf32> to vector<32x128xbf16>
    %c32 = arith.constant 32 : index
    %c0_193 = arith.constant 0 : index
    %c0_194 = arith.constant 0 : index
    %293 = vector.load %arg2[%c32, %c0_193, %c0_194] : memref<40x128x128xbf16, #tpu.memory_space<vmem>>, vector<1x128x128xbf16>
    %294 = vector.shape_cast %293 : vector<1x128x128xbf16> to vector<128x128xbf16>
    %cst_195 = arith.constant dense<0.000000e+00> : vector<32x128xf32>
    %295 = tpu.matmul %292, %294, %cst_195 {dimension_numbers = #tpu.dot_dimension_numbers<[1], [0], [0], [1], [0, 0, 1, 1], [], []>} : vector<32x128xbf16>, vector<128x128xbf16>, vector<32x128xf32> -> vector<32x128xf32>
    %c32_196 = arith.constant 32 : index
    %c0_197 = arith.constant 0 : index
    %296 = vector.load %arg3[%c32_196, %c0_197] : memref<40x128xf32, #tpu.memory_space<vmem>>, vector<1x128xf32>
    %297 = vector.broadcast %296 : vector<1x128xf32> to vector<32x128xf32>
    %298 = arith.addf %295, %297 : vector<32x128xf32>
    %cst_198 = arith.constant 0.000000e+00 : f32
    %299 = vector.broadcast %cst_198 : f32 to vector<32x128xf32>
    %300 = arith.maximumf %298, %299 : vector<32x128xf32>
    %301 = arith.truncf %300 : vector<32x128xf32> to vector<32x128xbf16>
    %c33 = arith.constant 33 : index
    %c0_199 = arith.constant 0 : index
    %c0_200 = arith.constant 0 : index
    %302 = vector.load %arg2[%c33, %c0_199, %c0_200] : memref<40x128x128xbf16, #tpu.memory_space<vmem>>, vector<1x128x128xbf16>
    %303 = vector.shape_cast %302 : vector<1x128x128xbf16> to vector<128x128xbf16>
    %cst_201 = arith.constant dense<0.000000e+00> : vector<32x128xf32>
    %304 = tpu.matmul %301, %303, %cst_201 {dimension_numbers = #tpu.dot_dimension_numbers<[1], [0], [0], [1], [0, 0, 1, 1], [], []>} : vector<32x128xbf16>, vector<128x128xbf16>, vector<32x128xf32> -> vector<32x128xf32>
    %c33_202 = arith.constant 33 : index
    %c0_203 = arith.constant 0 : index
    %305 = vector.load %arg3[%c33_202, %c0_203] : memref<40x128xf32, #tpu.memory_space<vmem>>, vector<1x128xf32>
    %306 = vector.broadcast %305 : vector<1x128xf32> to vector<32x128xf32>
    %307 = arith.addf %304, %306 : vector<32x128xf32>
    %cst_204 = arith.constant 0.000000e+00 : f32
    %308 = vector.broadcast %cst_204 : f32 to vector<32x128xf32>
    %309 = arith.maximumf %307, %308 : vector<32x128xf32>
    %310 = arith.truncf %309 : vector<32x128xf32> to vector<32x128xbf16>
    %c34 = arith.constant 34 : index
    %c0_205 = arith.constant 0 : index
    %c0_206 = arith.constant 0 : index
    %311 = vector.load %arg2[%c34, %c0_205, %c0_206] : memref<40x128x128xbf16, #tpu.memory_space<vmem>>, vector<1x128x128xbf16>
    %312 = vector.shape_cast %311 : vector<1x128x128xbf16> to vector<128x128xbf16>
    %cst_207 = arith.constant dense<0.000000e+00> : vector<32x128xf32>
    %313 = tpu.matmul %310, %312, %cst_207 {dimension_numbers = #tpu.dot_dimension_numbers<[1], [0], [0], [1], [0, 0, 1, 1], [], []>} : vector<32x128xbf16>, vector<128x128xbf16>, vector<32x128xf32> -> vector<32x128xf32>
    %c34_208 = arith.constant 34 : index
    %c0_209 = arith.constant 0 : index
    %314 = vector.load %arg3[%c34_208, %c0_209] : memref<40x128xf32, #tpu.memory_space<vmem>>, vector<1x128xf32>
    %315 = vector.broadcast %314 : vector<1x128xf32> to vector<32x128xf32>
    %316 = arith.addf %313, %315 : vector<32x128xf32>
    %cst_210 = arith.constant 0.000000e+00 : f32
    %317 = vector.broadcast %cst_210 : f32 to vector<32x128xf32>
    %318 = arith.maximumf %316, %317 : vector<32x128xf32>
    %319 = arith.truncf %318 : vector<32x128xf32> to vector<32x128xbf16>
    %c35 = arith.constant 35 : index
    %c0_211 = arith.constant 0 : index
    %c0_212 = arith.constant 0 : index
    %320 = vector.load %arg2[%c35, %c0_211, %c0_212] : memref<40x128x128xbf16, #tpu.memory_space<vmem>>, vector<1x128x128xbf16>
    %321 = vector.shape_cast %320 : vector<1x128x128xbf16> to vector<128x128xbf16>
    %cst_213 = arith.constant dense<0.000000e+00> : vector<32x128xf32>
    %322 = tpu.matmul %319, %321, %cst_213 {dimension_numbers = #tpu.dot_dimension_numbers<[1], [0], [0], [1], [0, 0, 1, 1], [], []>} : vector<32x128xbf16>, vector<128x128xbf16>, vector<32x128xf32> -> vector<32x128xf32>
    %c35_214 = arith.constant 35 : index
    %c0_215 = arith.constant 0 : index
    %323 = vector.load %arg3[%c35_214, %c0_215] : memref<40x128xf32, #tpu.memory_space<vmem>>, vector<1x128xf32>
    %324 = vector.broadcast %323 : vector<1x128xf32> to vector<32x128xf32>
    %325 = arith.addf %322, %324 : vector<32x128xf32>
    %cst_216 = arith.constant 0.000000e+00 : f32
    %326 = vector.broadcast %cst_216 : f32 to vector<32x128xf32>
    %327 = arith.maximumf %325, %326 : vector<32x128xf32>
    %328 = arith.truncf %327 : vector<32x128xf32> to vector<32x128xbf16>
    %c36 = arith.constant 36 : index
    %c0_217 = arith.constant 0 : index
    %c0_218 = arith.constant 0 : index
    %329 = vector.load %arg2[%c36, %c0_217, %c0_218] : memref<40x128x128xbf16, #tpu.memory_space<vmem>>, vector<1x128x128xbf16>
    %330 = vector.shape_cast %329 : vector<1x128x128xbf16> to vector<128x128xbf16>
    %cst_219 = arith.constant dense<0.000000e+00> : vector<32x128xf32>
    %331 = tpu.matmul %328, %330, %cst_219 {dimension_numbers = #tpu.dot_dimension_numbers<[1], [0], [0], [1], [0, 0, 1, 1], [], []>} : vector<32x128xbf16>, vector<128x128xbf16>, vector<32x128xf32> -> vector<32x128xf32>
    %c36_220 = arith.constant 36 : index
    %c0_221 = arith.constant 0 : index
    %332 = vector.load %arg3[%c36_220, %c0_221] : memref<40x128xf32, #tpu.memory_space<vmem>>, vector<1x128xf32>
    %333 = vector.broadcast %332 : vector<1x128xf32> to vector<32x128xf32>
    %334 = arith.addf %331, %333 : vector<32x128xf32>
    %cst_222 = arith.constant 0.000000e+00 : f32
    %335 = vector.broadcast %cst_222 : f32 to vector<32x128xf32>
    %336 = arith.maximumf %334, %335 : vector<32x128xf32>
    %337 = arith.negf %336 : vector<32x128xf32>
    %338 = math.exp %337 : vector<32x128xf32>
    %cst_223 = arith.constant 1.000000e+00 : f32
    %339 = vector.broadcast %cst_223 : f32 to vector<32x128xf32>
    %340 = arith.addf %339, %338 : vector<32x128xf32>
    %341 = arith.divf %339, %340 : vector<32x128xf32>
    %342 = arith.truncf %341 : vector<32x128xf32> to vector<32x128xbf16>
    %c37 = arith.constant 37 : index
    %c0_224 = arith.constant 0 : index
    %c0_225 = arith.constant 0 : index
    %343 = vector.load %arg2[%c37, %c0_224, %c0_225] : memref<40x128x128xbf16, #tpu.memory_space<vmem>>, vector<1x128x128xbf16>
    %344 = vector.shape_cast %343 : vector<1x128x128xbf16> to vector<128x128xbf16>
    %cst_226 = arith.constant dense<0.000000e+00> : vector<32x128xf32>
    %345 = tpu.matmul %342, %344, %cst_226 {dimension_numbers = #tpu.dot_dimension_numbers<[1], [0], [0], [1], [0, 0, 1, 1], [], []>} : vector<32x128xbf16>, vector<128x128xbf16>, vector<32x128xf32> -> vector<32x128xf32>
    %c37_227 = arith.constant 37 : index
    %c0_228 = arith.constant 0 : index
    %346 = vector.load %arg3[%c37_227, %c0_228] : memref<40x128xf32, #tpu.memory_space<vmem>>, vector<1x128xf32>
    %347 = vector.broadcast %346 : vector<1x128xf32> to vector<32x128xf32>
    %348 = arith.addf %345, %347 : vector<32x128xf32>
    %cst_229 = arith.constant 0.000000e+00 : f32
    %349 = vector.broadcast %cst_229 : f32 to vector<32x128xf32>
    %350 = arith.maximumf %348, %349 : vector<32x128xf32>
    %351 = arith.truncf %350 : vector<32x128xf32> to vector<32x128xbf16>
    %c38 = arith.constant 38 : index
    %c0_230 = arith.constant 0 : index
    %c0_231 = arith.constant 0 : index
    %352 = vector.load %arg2[%c38, %c0_230, %c0_231] : memref<40x128x128xbf16, #tpu.memory_space<vmem>>, vector<1x128x128xbf16>
    %353 = vector.shape_cast %352 : vector<1x128x128xbf16> to vector<128x128xbf16>
    %cst_232 = arith.constant dense<0.000000e+00> : vector<32x128xf32>
    %354 = tpu.matmul %351, %353, %cst_232 {dimension_numbers = #tpu.dot_dimension_numbers<[1], [0], [0], [1], [0, 0, 1, 1], [], []>} : vector<32x128xbf16>, vector<128x128xbf16>, vector<32x128xf32> -> vector<32x128xf32>
    %c38_233 = arith.constant 38 : index
    %c0_234 = arith.constant 0 : index
    %355 = vector.load %arg3[%c38_233, %c0_234] : memref<40x128xf32, #tpu.memory_space<vmem>>, vector<1x128xf32>
    %356 = vector.broadcast %355 : vector<1x128xf32> to vector<32x128xf32>
    %357 = arith.addf %354, %356 : vector<32x128xf32>
    %cst_235 = arith.constant 0.000000e+00 : f32
    %358 = vector.broadcast %cst_235 : f32 to vector<32x128xf32>
    %359 = arith.maximumf %357, %358 : vector<32x128xf32>
    %360 = arith.truncf %359 : vector<32x128xf32> to vector<32x128xbf16>
    %c39 = arith.constant 39 : index
    %c0_236 = arith.constant 0 : index
    %c0_237 = arith.constant 0 : index
    %361 = vector.load %arg2[%c39, %c0_236, %c0_237] : memref<40x128x128xbf16, #tpu.memory_space<vmem>>, vector<1x128x128xbf16>
    %362 = vector.shape_cast %361 : vector<1x128x128xbf16> to vector<128x128xbf16>
    %cst_238 = arith.constant dense<0.000000e+00> : vector<32x128xf32>
    %363 = tpu.matmul %360, %362, %cst_238 {dimension_numbers = #tpu.dot_dimension_numbers<[1], [0], [0], [1], [0, 0, 1, 1], [], []>} : vector<32x128xbf16>, vector<128x128xbf16>, vector<32x128xf32> -> vector<32x128xf32>
    %c39_239 = arith.constant 39 : index
    %c0_240 = arith.constant 0 : index
    %364 = vector.load %arg3[%c39_239, %c0_240] : memref<40x128xf32, #tpu.memory_space<vmem>>, vector<1x128xf32>
    %365 = vector.broadcast %364 : vector<1x128xf32> to vector<32x128xf32>
    %366 = arith.addf %363, %365 : vector<32x128xf32>
    %cst_241 = arith.constant 0.000000e+00 : f32
    %367 = vector.broadcast %cst_241 : f32 to vector<32x128xf32>
    %368 = arith.maximumf %366, %367 : vector<32x128xf32>
    %369 = arith.negf %368 : vector<32x128xf32>
    %370 = math.exp %369 : vector<32x128xf32>
    %cst_242 = arith.constant 1.000000e+00 : f32
    %371 = vector.broadcast %cst_242 : f32 to vector<32x128xf32>
    %372 = arith.addf %371, %370 : vector<32x128xf32>
    %373 = arith.divf %371, %372 : vector<32x128xf32>
    %c0_243 = arith.constant 0 : index
    %c0_244 = arith.constant 0 : index
    %374 = vector.load %arg4[%c0_243, %c0_244] : memref<32x128xf32, #tpu.memory_space<vmem>>, vector<32x128xf32>
    tpu.vector_store %arg4[%c0_243, %c0_244], %373 {strides = array<i32>} : memref<32x128xf32, #tpu.memory_space<vmem>>, vector<32x128xf32>,
    return
  }
  func.func @transform_0(%arg0: i32) -> (i32, i32) {
    %c0_i32 = arith.constant 0 : i32
    %c0_i32_0 = arith.constant 0 : i32
    return %arg0, %c0_i32 : i32, i32
  }
  func.func @transform_1(%arg0: i32) -> (i32, i32, i32) {
    %c0_i32 = arith.constant 0 : i32
    %c0_i32_0 = arith.constant 0 : i32
    %c0_i32_1 = arith.constant 0 : i32
    %c0_i32_2 = arith.constant 0 : i32
    return %c0_i32, %c0_i32_0, %c0_i32_1 : i32, i32, i32
  }
  func.func @transform_2(%arg0: i32) -> (i32, i32) {
    %c0_i32 = arith.constant 0 : i32
    %c0_i32_0 = arith.constant 0 : i32
    %c0_i32_1 = arith.constant 0 : i32
    return %c0_i32, %c0_i32_0 : i32, i32
  }
  func.func @transform_3(%arg0: i32) -> (i32, i32) {
    %c0_i32 = arith.constant 0 : i32
    %c0_i32_0 = arith.constant 0 : i32
    return %arg0, %c0_i32 : i32, i32
  }
}

</mosaic_0001>

<bundles_post_ra>
// kernel: denoising_ae_forward.1
= control target key start
LH: loop header
LB: loop body
LE: loop exit
PB: predicated region body
PF: predicated region fallthrough
CT: control target
= control target key end

     0   :  { %8 = vsyncpa [#allocation3], 0  ;;  %s6292_s0 = inlined_call_operand.vmem [shape: f32[64,128], index: 0, kind: input, shape index: {}]   ;;  %s6293_s1 = inlined_call_operand.hbm [shape: bf16[40,128,128], index: 1, kind: input, shape index: {}]   ;;  %s6294_s2 = inlined_call_operand.hbm [shape: f32[40,128], index: 2, kind: input, shape index: {}]   ;;  %s6295_s3 = inlined_call_operand.hbm [shape: f32[64,128], index: 3, kind: output, shape index: {}]  }
   0x1   :  { %9 = vsyncpa [#allocation6], 0 }
   0x2   :  { %10 = vsyncpa [#allocation4], 0 }
   0x3   :  { %12 = vsyncpa [#allocation4 + $0x1], 0  ;;  %s6160_s12 = smov 0   ;;  %s6162_s13 = smov 0  }
   0x4   :  { %s6164_s14 = smov 0   ;;  %s6166_s15 = smov 0  }
   0x5 LB: > { %s6181_s16 = sadd.s32 4294967295, %s6130_s15   ;;  %s4217_s17 = sadd.s32 4294967294, %s6130_s15   ;;  %s6130_s15 = sphi %s6166_s15, %s6306_s15   ;;  %s6126_s14 = sphi %s6164_s14, %s6305_s14   ;;  %s6122_s13 = sphi %s6162_s13, %s6304_s13   ;;  %s6118_s12 = sphi %s6160_s12, %s6303_s12  }
   0x6   : > { %s6185_s18 = sadd.s32 1, %s6130_s15   ;;  %s93_s19 = sadd.s32 1, %s6126_s14 }
   0x7   : > { %s90_s20 = ssub.s32 %s6130_s15, %s6185_s18  ;;  %p103_p0 = scmp.ne.s32.totalorder %s6126_s14, %s6122_s13 }
   0x8   : > { %p91_p1 = scmp.eq.s32.totalorder %s90_s20, 0  ;;  %p104_p2 = scmp.eq.s32.totalorder %s6181_s16, 1 }
   0x9   : > { %p109_p3 = scmp.ne.s32.totalorder %s6122_s13, %s6118_s12  ;;  %p110_p4 = scmp.eq.s32.totalorder %s4217_s17, 1 }
   0xa   : > { %s6196_s21 = scalar_select %p91_p1, %s6126_s14, %s93_s19  }
   0xb   : > { %p6198_p5 = por %p104_p2, %p103_p0  ;;  %p6202_p6 = por %p110_p4, %p109_p3 }
   0xc   : > { %p4218_p7 = scmp.ge.s32.totalorder %s6130_s15, 1  ;;  %p117_p8 = scmp.lt.s32.totalorder %s6130_s15, 3 }
   0xd   : > { %p5867_p9 = scmp.eq.s32.totalorder %s6181_s16, 0  ;;  %s128_s27 = sshll.u32 %s6293_s1, 4  ;;  %s129_s27 = int_to_ptr.hbm [resolvable:$true] %s128_s27 }
   0xe   : > { %p6209_p10 = pnand %p4218_p7, %p117_p8  ;;  %s6132_s28 = smov [#allocation2]  }
   0xf   : > { %s130_s29 = sshll.u32 %s6132_s28, 4  ;;  %s142_s5 = sshll.u32 %s6294_s2, 4  ;;  %s131_s29 = int_to_ptr.vmem [resolvable:$true] %s130_s29  ;;  %s143_s5 = int_to_ptr.hbm [resolvable:$true] %s142_s5 }
  0x10   : > { %p5856_p11 = pneg %p6209_p10  ;;  %s6133_s6 = smov 64  }
  0x11   : > { %s6134_s7 = smov 4   ;;  %s6135_s8 = smov [#allocation5]  }
  0x12   : > { %p5857_p12 = pnand %p5867_p9, %p5856_p11  ;;  %s144_s9 = sshll.u32 %s6135_s8, 4  ;;  %s145_s9 = int_to_ptr.vmem [resolvable:$true] %s144_s9 }
  0x13   : > { %s6136_s10 = smov 128   ;;  %s6137_s11 = smov 8  }
  0x14   : > { %5859 = dma.hbm_to_vmem [thread:$0]  (!%p5857_p12), %s129_s27, 40960, %s131_s29, [#allocation3], %s6133_s6, %s6133_s6, %s6134_s7  }
  0x15   : > { %5862 = dma.hbm_to_vmem [thread:$0]  (!%p5857_p12), %s143_s5, 640, %s145_s9, [#allocation6], %s6136_s10, %s6136_s10, %s6137_s11  }
  0x16   : > { %169 = sbr.rel (%p6209_p10) target bundleno = 5882 (0x16fa), region = 32 }
  0x1b   : > { %6105 = dma.done.wait (%p5867_p9), [#allocation3], 40960  }
  0x1c   : > { %6107 = vsyncadd (%p5867_p9), [#allocation3], 4294926336 }
  0x1d   : > { %6109 = dma.done.wait (%p5867_p9), [#allocation6], 640  }
  0x1e   : > { %6111 = vsyncadd (%p5867_p9), [#allocation6], 4294966656  ;;  %s4226_s17 = sshll.u32 %s6181_s16, 2  ;;  %v5532_v0 = vld [vmem:[#allocation2 + $0x38] sm:$0xff]  ;;  %v5531_v1 = vld [vmem:[#allocation2 + $0x30] sm:$0xff]  ;;  %s196_s26 = sand.u32 1, %s6122_s13  }
  0x1f   : > { %p200_p13 = scmp.lt.s32.totalorder %s4226_s17, 7  ;;  %278 = vmatpush.bf16.msra.mxu0 %v5532_v0  ;;  %v5530_v2 = vld [vmem:[#allocation2 + $0x28] sm:$0xff]  ;;  %v5529_v3 = vld [vmem:[#allocation2 + $0x20] sm:$0xff]  ;;  %v5528_v4 = vld [vmem:[#allocation2 + $0x18] sm:$0xff]  ;;  %s4225_s27 = sshll.u32 %s196_s26, 5 }
  0x20   : > { %v5540_v5 = vld [vmem:[#allocation2 + $0x78] sm:$0xff]  ;;  %v5527_v6 = vld [vmem:[#allocation2 + $0x10] sm:$0xff]  ;;  %v5526_v8 = vld [vmem:[#allocation2 + $0x8] sm:$0xff]  ;;  %s6252_s28 = scalar_lea.vmem [#allocation7], %s4225_s27  ;;  %s5845_s29 = sshll.u32 %s6181_s16, 5 }
  0x21   : > { %s6308_s17 = smov (!%p200_p13, %s4226_s17), 7  ;;  %370 = vmatpush.bf16.msra.mxu1 %v5540_v5  ;;  %v5539_v7 = vld [vmem:[#allocation2 + $0x70] sm:$0xff]  ;;  %v5538_v9 = vld [vmem:[#allocation2 + $0x68] sm:$0xff]  ;;  %v5525_v10 = vld [vmem:[#allocation2] sm:$0xff]  ;;  %s4129_s5 = scalar_lea.hbm %s6295_s3, %s5845_s29 }
  0x22   : > { %s4227_s19 = sshll.u32 %s6308_s17, 3  ;;  %v5537_v13 = vld [vmem:[#allocation2 + $0x60] sm:$0xff]  ;;  %v5536_v18 = vld [vmem:[#allocation2 + $0x58] sm:$0xff]  ;;  %v5535_v19 = vld [vmem:[#allocation2 + $0x50] sm:$0xff]  ;;  %s4130_s16 = sshll.u32 %s6252_s28, 4  ;;  %s4131_s16 = int_to_ptr.vmem [resolvable:$true] %s4130_s16 }
  0x23   : > { %279 = vmatpush.bf16.msra.mxu0 %v5531_v1  ;;  %s203_s25 = scalar_lea.vmem %s6292_s0, %s4227_s19  ;;  %v5534_v20 = vld [vmem:[#allocation2 + $0x48] sm:$0xff]  ;;  %v5533_v21 = vld [vmem:[#allocation2 + $0x40] sm:$0xff]  ;;  %v5548_v22 = vld [vmem:[#allocation2 + $0xb8] sm:$0xff]  ;;  %s4132_s6 = sshll.u32 %s4129_s5, 4  ;;  %s4133_s6 = int_to_ptr.hbm [resolvable:$true] %s4132_s6 }
  0x24   : > { %v206_v11 = vld [vmem:[%s203_s25] sm:$0xff]  ;;  %v207_v12 = vld [vmem:[%s203_s25 + $0x8] sm:$0xff]  ;;  %v208_v15 = vld [vmem:[%s203_s25 + $0x10] sm:$0xff]  ;;  %462 = vmatpush.bf16.msra.mxu2 %v5548_v22  ;;  %s4118_s7 = scalar_lea.sflag [#allocation4], %s196_s26  ;;  %s6074_s8 = sshra.s32 %s4133_s6, 4  ;;  %s6075_s8 = int_to_ptr.hbm [resolvable:$true] %s6074_s8 }
  0x25   : > { %371 = vmatpush.bf16.msra.mxu1 %v5539_v7  ;;  %v210_v14 = vpack.c.bf16 %v207_v12, %v206_v11  ;;  %v209_v16 = vld [vmem:[%s203_s25 + $0x18] sm:$0xff]  ;;  %v5547_v24 = vld [vmem:[#allocation2 + $0xb0] sm:$0xff]  ;;  %v5912_v25 = vld [vmem:[#allocation5] ss:$0 sm:$0xff]  ;;  %s6076_s9 = scalar_lea.hbm %s6075_s8, 32  ;;  %s6080_s17 = scalar_lea.hbm %s6295_s3, 64 }
  0x26   : > { %v211_v17 = vpack.c.bf16 %v209_v16, %v208_v15  ;;  %v5546_v26 = vld [vmem:[#allocation2 + $0xa8] sm:$0xff]  ;;  %v5545_v30 = vld [vmem:[#allocation2 + $0xa0] sm:$0xff]  ;;  %v5544_v41 = vld [vmem:[#allocation2 + $0x98] sm:$0xff]  ;;  %p6077_p0 = scmp.ne.s32.totalorder %s6075_s8, %s6076_s9  ;;  %p6081_p3 = scmp.lt.s32.totalorder %s6075_s8, %s6295_s3 }
  0x27   : > { %280 = vmatpush.bf16.msra.mxu0 %v5530_v2  ;;  %v5543_v42 = vld [vmem:[#allocation2 + $0x90] sm:$0xff]  ;;  %v5542_v43 = vld [vmem:[#allocation2 + $0x88] sm:$0xff]  ;;  %v5541_v44 = vld [vmem:[#allocation2 + $0x80] sm:$0xff]  ;;  %p6082_p4 = scmp.lt.s32.totalorder %s6080_s17, %s6076_s9 }
  0x28   : > { %463 = vmatpush.bf16.msra.mxu2 %v5547_v24  ;;  %v5556_v45 = vld [vmem:[#allocation2 + $0xf8] sm:$0xff]  ;;  %v5555_v47 = vld [vmem:[#allocation2 + $0xf0] sm:$0xff]  ;;  %v5913_v48 = vld [vmem:[#allocation5 + $0x1] ss:$0 sm:$0xff]  ;;  %p6078_p1 = pnand %p6077_p0, %p6198_p5 }
  0x29   : > { %372 = vmatpush.bf16.msra.mxu1 %v5538_v9  ;;  %554 = vmatpush.bf16.msra.mxu3 %v5556_v45  ;;  %v5554_v49 = vld [vmem:[#allocation2 + $0xe8] sm:$0xff]  ;;  %v5553_v53 = vld [vmem:[#allocation2 + $0xe0] sm:$0xff]  ;;  %v5552_v0 = vld [vmem:[#allocation2 + $0xd8] sm:$0xff]  ;;  %p6083_p7 = por %p6082_p4, %p6081_p3 }
  0x2a   : > { %v5551_v1 = vld [vmem:[#allocation2 + $0xd0] sm:$0xff]  ;;  %v5550_v2 = vld [vmem:[#allocation2 + $0xc8] sm:$0xff]  ;;  %v5914_v7 = vld [vmem:[#allocation5 + $0x2] ss:$0 sm:$0xff]  ;;  %p6079_p2 = pneg %p6078_p1 }
  0x2b   : > { %281 = vmatpush.bf16.msra.mxu0 %v5529_v3  ;;  %v5549_v3 = vld [vmem:[#allocation2 + $0xc0] sm:$0xff]  ;;  %v5560_v16 = vld [vmem:[#allocation2 + $0x118] sm:$0xff]  ;;  %v5559_v24 = vld [vmem:[#allocation2 + $0x110] sm:$0xff] }
  0x2c   : > { %464 = vmatpush.bf16.msra.mxu2 %v5546_v26  ;;  %v5561_v12 = vld [vmem:[#allocation2 + $0x120] sm:$0xff]  ;;  %p6084_p8 = pnand %p6083_p7, %p6079_p2 }
  0x2d   : > { %373 = vmatpush.bf16.msra.mxu1 %v5537_v13  ;;  %555 = vmatpush.bf16.msra.mxu3 %v5555_v47  ;;  %v5557_v26 = vld [vmem:[#allocation2 + $0x100] sm:$0xff]  ;;  %v5567_v47 = vld [vmem:[#allocation2 + $0x150] sm:$0xff] }
  0x2f   : > { %282 = vmatpush.bf16.msra.mxu0 %v5528_v4  ;;  %v5564_v4 = vld [vmem:[#allocation2 + $0x138] sm:$0xff] }
  0x30   : > { %465 = vmatpush.bf16.msra.mxu2 %v5545_v30  ;;  %v5915_v30 = vld [vmem:[#allocation5 + $0x3] ss:$0 sm:$0xff] }
  0x31   : > { %374 = vmatpush.bf16.msra.mxu1 %v5536_v18  ;;  %556 = vmatpush.bf16.msra.mxu3 %v5554_v49  ;;  %v5565_v49 = vld [vmem:[#allocation2 + $0x140] sm:$0xff] }
  0x33   : > { %283 = vmatpush.bf16.msra.mxu0 %v5527_v6  ;;  %v5563_v6 = vld [vmem:[#allocation2 + $0x130] sm:$0xff] }
  0x34   : > { %466 = vmatpush.bf16.msra.mxu2 %v5544_v41 }
  0x35   : > { %375 = vmatpush.bf16.msra.mxu1 %v5535_v19  ;;  %557 = vmatpush.bf16.msra.mxu3 %v5553_v53  ;;  %v5916_v53 = vld [vmem:[#allocation5 + $0x4] ss:$0 sm:$0xff] }
  0x37   : > { %284 = vmatpush.bf16.msra.mxu0 %v5526_v8  ;;  %v5562_v8 = vld [vmem:[#allocation2 + $0x128] sm:$0xff] }
  0x38   : > { %467 = vmatpush.bf16.msra.mxu2 %v5543_v42 }
  0x39   : > { %376 = vmatpush.bf16.msra.mxu1 %v5534_v20  ;;  %558 = vmatpush.bf16.msra.mxu3 %v5552_v0 }
  0x3b   : > { %285 = vmatpush.bf16.msra.mxu0 %v5525_v10 }
  0x3c   : > { %468 = vmatpush.bf16.msra.mxu2 %v5542_v43 }
  0x3d   : > { %377 = vmatpush.bf16.msra.mxu1 %v5533_v21  ;;  %559 = vmatpush.bf16.msra.mxu3 %v5551_v1 }
  0x3e   : > { %286 = vmatmul.bf16.vlgmr.msra.gmra.mxu0 %v210_v14 }
  0x3f   : > { %646 = vmatpush.bf16.msrb.mxu0 %v5564_v4 }
  0x40   : > { %469 = vmatpush.bf16.msra.mxu2 %v5541_v44 }
  0x41   : > { %560 = vmatpush.bf16.msra.mxu3 %v5550_v2 }
  0x43   : > { %647 = vmatpush.bf16.msrb.mxu0 %v5563_v6  ;;  %v5575_v6 = vld [vmem:[#allocation2 + $0x190] sm:$0xff] }
  0x45   : > { %561 = vmatpush.bf16.msra.mxu3 %v5549_v3 }
  0x47   : > { %648 = vmatpush.bf16.msrb.mxu0 %v5562_v8  ;;  %v5573_v8 = vld [vmem:[#allocation2 + $0x180] sm:$0xff] }
  0x4b   : > { %649 = vmatpush.bf16.msrb.mxu0 %v5561_v12  ;;  %v5917_v12 = vld [vmem:[#allocation5 + $0x5] ss:$0 sm:$0xff] }
  0x4e   : > { %291 = vmatmul.bf16.gmra.mxu0 %v211_v17 }
  0x4f   : > { %650 = vmatpush.bf16.msrb.mxu0 %v5560_v16 }
  0x53   : > { %651 = vmatpush.bf16.msrb.mxu0 %v5559_v24 }
  0xbb   : > { %v287_v23 = vpop.f32.mrf.mxu0 }
  0xbc   : > { %v288_v27 = vadd.f32 %v5912_v25, %v287_v23 }
  0xbe   : > { %v297_v31 = vmax.f32 %v288_v27, 0.0  ;;  %v5572_v27 = vld [vmem:[#allocation2 + $0x178] sm:$0xff] }
  0xbf   : > { %738 = vmatpush.bf16.msrb.mxu1 %v5572_v27 }
  0xc3   : > { %v289_v28 = vpop.f32.mrf.mxu0 }
  0xc4   : > { %v290_v29 = vadd.f32 %v5912_v25, %v289_v28 }
  0xc6   : > { %v298_v32 = vmax.f32 %v290_v29, 0.0  ;;  %v5571_v29 = vld [vmem:[#allocation2 + $0x170] sm:$0xff] }
  0xc7   : > { %739 = vmatpush.bf16.msrb.mxu1 %v5571_v29  ;;  %v5583_v29 = vld [vmem:[#allocation2 + $0x1d0] sm:$0xff] }
  0xc8   : > { %v301_v33 = vpack.c.bf16 %v298_v32, %v297_v31  ;;  %v5570_v31 = vld [vmem:[#allocation2 + $0x168] sm:$0xff] }
  0xca   : > { %378 = vmatmul.bf16.vlgmr.msra.gmra.mxu1 %v301_v33 }
  0xcb   : > { %v292_v34 = vpop.f32.mrf.mxu0  ;;  %740 = vmatpush.bf16.msrb.mxu1 %v5570_v31  ;;  %v5581_v31 = vld [vmem:[#allocation2 + $0x1c0] sm:$0xff] }
  0xcc   : > { %v293_v35 = vadd.f32 %v5912_v25, %v292_v34 }
  0xce   : > { %v299_v38 = vmax.f32 %v293_v35, 0.0  ;;  %v5569_v35 = vld [vmem:[#allocation2 + $0x160] sm:$0xff] }
  0xcf   : > { %741 = vmatpush.bf16.msrb.mxu1 %v5569_v35  ;;  %v5918_v35 = vld [vmem:[#allocation5 + $0x6] ss:$0 sm:$0xff] }
  0xd3   : > { %v294_v36 = vpop.f32.mrf.mxu0 }
  0xd4   : > { %v295_v37 = vadd.f32 %v5912_v25, %v294_v36  ;;  %v5558_v25 = vld [vmem:[#allocation2 + $0x108] sm:$0xff] }
  0xd5   : > { %652 = vmatpush.bf16.msrb.mxu0 %v5558_v25 }
  0xd6   : > { %v300_v39 = vmax.f32 %v295_v37, 0.0 }
  0xd8   : > { %v302_v40 = vpack.c.bf16 %v300_v39, %v299_v38  ;;  %v5568_v39 = vld [vmem:[#allocation2 + $0x158] sm:$0xff] }
  0xd9   : > { %653 = vmatpush.bf16.msrb.mxu0 %v5557_v26  ;;  %742 = vmatpush.bf16.msrb.mxu1 %v5568_v39 }
  0xda   : > { %383 = vmatmul.bf16.gmra.mxu1 %v302_v40 }
  0xdd   : > { %743 = vmatpush.bf16.msrb.mxu1 %v5567_v47 }
 0x147   : > { %v379_v46 = vpop.f32.mrf.mxu1 }
 0x148   : > { %v380_v50 = vadd.f32 %v5913_v48, %v379_v46 }
 0x14a   : > { %v389_v54 = vmax.f32 %v380_v50, 0.0  ;;  %v5580_v50 = vld [vmem:[#allocation2 + $0x1b8] sm:$0xff] }
 0x14b   : > { %830 = vmatpush.bf16.msrb.mxu2 %v5580_v50 }
 0x14f   : > { %v381_v51 = vpop.f32.mrf.mxu1 }
 0x150   : > { %v382_v52 = vadd.f32 %v5913_v48, %v381_v51 }
 0x152   : > { %v390_v55 = vmax.f32 %v382_v52, 0.0  ;;  %v5579_v52 = vld [vmem:[#allocation2 + $0x1b0] sm:$0xff] }
 0x153   : > { %831 = vmatpush.bf16.msrb.mxu2 %v5579_v52  ;;  %v5591_v52 = vld [vmem:[#allocation2 + $0x210] sm:$0xff] }
 0x154   : > { %v393_v56 = vpack.c.bf16 %v390_v55, %v389_v54  ;;  %v5578_v54 = vld [vmem:[#allocation2 + $0x1a8] sm:$0xff] }
 0x156   : > { %470 = vmatmul.bf16.vlgmr.msra.gmra.mxu2 %v393_v56 }
 0x157   : > { %v384_v57 = vpop.f32.mrf.mxu1  ;;  %832 = vmatpush.bf16.msrb.mxu2 %v5578_v54  ;;  %v5589_v54 = vld [vmem:[#allocation2 + $0x200] sm:$0xff] }
 0x158   : > { %v385_v58 = vadd.f32 %v5913_v48, %v384_v57 }
 0x15a   : > { %v391_v61 = vmax.f32 %v385_v58, 0.0  ;;  %v5577_v58 = vld [vmem:[#allocation2 + $0x1a0] sm:$0xff] }
 0x15b   : > { %833 = vmatpush.bf16.msrb.mxu2 %v5577_v58  ;;  %v5919_v58 = vld [vmem:[#allocation5 + $0x7] ss:$0 sm:$0xff] }
 0x15f   : > { %v386_v59 = vpop.f32.mrf.mxu1 }
 0x160   : > { %v387_v60 = vadd.f32 %v5913_v48, %v386_v59  ;;  %v5566_v48 = vld [vmem:[#allocation2 + $0x148] sm:$0xff] }
 0x161   : > { %744 = vmatpush.bf16.msrb.mxu1 %v5566_v48 }
 0x162   : > { %v392_v62 = vmax.f32 %v387_v60, 0.0 }
 0x164   : > { %v394_v63 = vpack.c.bf16 %v392_v62, %v391_v61  ;;  %v5576_v62 = vld [vmem:[#allocation2 + $0x198] sm:$0xff] }
 0x165   : > { %745 = vmatpush.bf16.msrb.mxu1 %v5565_v49  ;;  %834 = vmatpush.bf16.msrb.mxu2 %v5576_v62 }
 0x166   : > { %475 = vmatmul.bf16.gmra.mxu2 %v394_v63 }
 0x169   : > { %835 = vmatpush.bf16.msrb.mxu2 %v5575_v6 }
 0x1d9   : > { %v471_v5 = vpop.f32.mrf.mxu2 }
 0x1da   : > { %v472_v9 = vadd.f32 %v5914_v7, %v471_v5 }
 0x1dc   : > { %v481_v13 = vmax.f32 %v472_v9, 0.0  ;;  %v5588_v9 = vld [vmem:[#allocation2 + $0x1f8] sm:$0xff] }
 0x1dd   : > { %922 = vmatpush.bf16.msrb.mxu3 %v5588_v9 }
 0x1e1   : > { %v473_v10 = vpop.f32.mrf.mxu2 }
 0x1e2   : > { %v474_v11 = vadd.f32 %v5914_v7, %v473_v10 }
 0x1e4   : > { %v482_v14 = vmax.f32 %v474_v11, 0.0  ;;  %v5587_v11 = vld [vmem:[#allocation2 + $0x1f0] sm:$0xff] }
 0x1e5   : > { %923 = vmatpush.bf16.msrb.mxu3 %v5587_v11  ;;  %v5599_v11 = vld [vmem:[#allocation2 + $0x250] sm:$0xff] }
 0x1e6   : > { %v485_v15 = vpack.c.bf16 %v482_v14, %v481_v13  ;;  %v5586_v13 = vld [vmem:[#allocation2 + $0x1e8] sm:$0xff] }
 0x1e8   : > { %562 = vmatmul.bf16.vlgmr.msra.gmra.mxu3 %v485_v15 }
 0x1e9   : > { %v476_v17 = vpop.f32.mrf.mxu2  ;;  %924 = vmatpush.bf16.msrb.mxu3 %v5586_v13  ;;  %v5597_v13 = vld [vmem:[#allocation2 + $0x240] sm:$0xff] }
 0x1ea   : > { %v477_v18 = vadd.f32 %v5914_v7, %v476_v17  ;;  %v5585_v17 = vld [vmem:[#allocation2 + $0x1e0] sm:$0xff] }
 0x1ec   : > { %v483_v21 = vmax.f32 %v477_v18, 0.0 }
 0x1ed   : > { %925 = vmatpush.bf16.msrb.mxu3 %v5585_v17 }
 0x1f1   : > { %v478_v19 = vpop.f32.mrf.mxu2 }
 0x1f2   : > { %v479_v20 = vadd.f32 %v5914_v7, %v478_v19  ;;  %v5574_v7 = vld [vmem:[#allocation2 + $0x188] sm:$0xff] }
 0x1f3   : > { %836 = vmatpush.bf16.msrb.mxu2 %v5574_v7 }
 0x1f4   : > { %v484_v22 = vmax.f32 %v479_v20, 0.0 }
 0x1f6   : > { %v486_v23 = vpack.c.bf16 %v484_v22, %v483_v21  ;;  %v5584_v21 = vld [vmem:[#allocation2 + $0x1d8] sm:$0xff] }
 0x1f7   : > { %837 = vmatpush.bf16.msrb.mxu2 %v5573_v8  ;;  %926 = vmatpush.bf16.msrb.mxu3 %v5584_v21 }
 0x1f8   : > { %567 = vmatmul.bf16.gmra.mxu3 %v486_v23 }
 0x1fb   : > { %927 = vmatpush.bf16.msrb.mxu3 %v5583_v29  ;;  %v5612_v29 = vld [vmem:[#allocation2 + $0x2b8] sm:$0xff] }
 0x1fc   : > { %1270 = vmatpush.bf16.msra.mxu2 %v5612_v29 }
 0x26b   : > { %v563_v28 = vpop.f32.mrf.mxu3 }
 0x26c   : > { %v564_v32 = vadd.f32 %v5915_v30, %v563_v28 }
 0x26e   : > { %v573_v36 = vmax.f32 %v564_v32, 0.0  ;;  %v5596_v32 = vld [vmem:[#allocation2 + $0x238] sm:$0xff] }
 0x26f   : > { %1014 = vmatpush.bf16.msra.mxu0 %v5596_v32  ;;  %v5609_v32 = vld [vmem:[#allocation2 + $0x2a0] sm:$0xff] }
 0x273   : > { %v565_v33 = vpop.f32.mrf.mxu3 }
 0x274   : > { %v566_v34 = vadd.f32 %v5915_v30, %v565_v33 }
 0x276   : > { %v574_v37 = vmax.f32 %v566_v34, 0.0  ;;  %v5595_v34 = vld [vmem:[#allocation2 + $0x230] sm:$0xff] }
 0x277   : > { %1015 = vmatpush.bf16.msra.mxu0 %v5595_v34  ;;  %v5607_v34 = vld [vmem:[#allocation2 + $0x290] sm:$0xff] }
 0x278   : > { %v577_v38 = vpack.c.bf16 %v574_v37, %v573_v36  ;;  %v5594_v36 = vld [vmem:[#allocation2 + $0x228] sm:$0xff] }
 0x27a   : > { %654 = vmatmul.bf16.vlgmr.msrb.gmra.mxu0 %v577_v38 }
 0x27b   : > { %v568_v40 = vpop.f32.mrf.mxu3  ;;  %1016 = vmatpush.bf16.msra.mxu0 %v5594_v36 }
 0x27c   : > { %v569_v41 = vadd.f32 %v5915_v30, %v568_v40  ;;  %v5593_v40 = vld [vmem:[#allocation2 + $0x220] sm:$0xff] }
 0x27e   : > { %v575_v44 = vmax.f32 %v569_v41, 0.0 }
 0x27f   : > { %1017 = vmatpush.bf16.msra.mxu0 %v5593_v40  ;;  %v5605_v40 = vld [vmem:[#allocation2 + $0x280] sm:$0xff] }
 0x283   : > { %v570_v42 = vpop.f32.mrf.mxu3 }
 0x284   : > { %v571_v43 = vadd.f32 %v5915_v30, %v570_v42  ;;  %v5582_v30 = vld [vmem:[#allocation2 + $0x1c8] sm:$0xff] }
 0x285   : > { %928 = vmatpush.bf16.msrb.mxu3 %v5582_v30  ;;  %v5611_v30 = vld [vmem:[#allocation2 + $0x2b0] sm:$0xff] }
 0x286   : > { %v576_v45 = vmax.f32 %v571_v43, 0.0  ;;  %1271 = vmatpush.bf16.msra.mxu2 %v5611_v30 }
 0x288   : > { %v578_v46 = vpack.c.bf16 %v576_v45, %v575_v44  ;;  %v5592_v44 = vld [vmem:[#allocation2 + $0x218] sm:$0xff] }
 0x289   : > { %929 = vmatpush.bf16.msrb.mxu3 %v5581_v31  ;;  %1018 = vmatpush.bf16.msra.mxu0 %v5592_v44  ;;  %v5610_v31 = vld [vmem:[#allocation2 + $0x2a8] sm:$0xff] }
 0x28a   : > { %659 = vmatmul.bf16.gmra.mxu0 %v578_v46  ;;  %1272 = vmatpush.bf16.msra.mxu2 %v5610_v31 }
 0x28d   : > { %1019 = vmatpush.bf16.msra.mxu0 %v5591_v52 }
 0x28e   : > { %1273 = vmatpush.bf16.msra.mxu2 %v5609_v32 }
 0x2f7   : > { %v655_v51 = vpop.f32.mrf.mxu0 }
 0x2f8   : > { %v656_v55 = vadd.f32 %v5916_v53, %v655_v51 }
 0x2fa   : > { %v665_v59 = vmax.f32 %v656_v55, 0.0  ;;  %v5604_v55 = vld [vmem:[#allocation2 + $0x278] sm:$0xff] }
 0x2fb   : > { %1106 = vmatpush.bf16.msra.mxu1 %v5604_v55 }
 0x2ff   : > { %v657_v56 = vpop.f32.mrf.mxu0 }
 0x300   : > { %v658_v57 = vadd.f32 %v5916_v53, %v657_v56 }
 0x302   : > { %v666_v60 = vmax.f32 %v658_v57, 0.0  ;;  %v5603_v57 = vld [vmem:[#allocation2 + $0x270] sm:$0xff] }
 0x303   : > { %1107 = vmatpush.bf16.msra.mxu1 %v5603_v57 }
 0x304   : > { %v669_v61 = vpack.c.bf16 %v666_v60, %v665_v59  ;;  %v5602_v59 = vld [vmem:[#allocation2 + $0x268] sm:$0xff] }
 0x306   : > { %746 = vmatmul.bf16.vlgmr.msrb.gmra.mxu1 %v669_v61 }
 0x307   : > { %v660_v63 = vpop.f32.mrf.mxu0  ;;  %1108 = vmatpush.bf16.msra.mxu1 %v5602_v59 }
 0x308   : > { %v661_v0 = vadd.f32 %v5916_v53, %v660_v63  ;;  %v5601_v63 = vld [vmem:[#allocation2 + $0x260] sm:$0xff] }
 0x30a   : > { %v667_v3 = vmax.f32 %v661_v0, 0.0 }
 0x30b   : > { %1109 = vmatpush.bf16.msra.mxu1 %v5601_v63 }
 0x30f   : > { %v662_v1 = vpop.f32.mrf.mxu0 }
 0x310   : > { %v663_v2 = vadd.f32 %v5916_v53, %v662_v1  ;;  %v5590_v53 = vld [vmem:[#allocation2 + $0x208] sm:$0xff] }
 0x311   : > { %1020 = vmatpush.bf16.msra.mxu0 %v5590_v53 }
 0x312   : > { %v668_v4 = vmax.f32 %v663_v2, 0.0 }
 0x314   : > { %v670_v5 = vpack.c.bf16 %v668_v4, %v667_v3  ;;  %v5600_v3 = vld [vmem:[#allocation2 + $0x258] sm:$0xff] }
 0x315   : > { %1021 = vmatpush.bf16.msra.mxu0 %v5589_v54  ;;  %1110 = vmatpush.bf16.msra.mxu1 %v5600_v3 }
 0x316   : > { %751 = vmatmul.bf16.gmra.mxu1 %v670_v5 }
 0x319   : > { %1111 = vmatpush.bf16.msra.mxu1 %v5599_v11 }
 0x383   : > { %v747_v10 = vpop.f32.mrf.mxu1 }
 0x384   : > { %v748_v14 = vadd.f32 %v5917_v12, %v747_v10 }
 0x386   : > { %v757_v18 = vmax.f32 %v748_v14, 0.0 }
 0x38b   : > { %v749_v15 = vpop.f32.mrf.mxu1 }
 0x38c   : > { %v750_v16 = vadd.f32 %v5917_v12, %v749_v15  ;;  %v5920_v15 = vld [vmem:[#allocation5 + $0x8] ss:$0 sm:$0xff] }
 0x38e   : > { %v758_v19 = vmax.f32 %v750_v16, 0.0 }
 0x390   : > { %v761_v20 = vpack.c.bf16 %v758_v19, %v757_v18 }
 0x392   : > { %838 = vmatmul.bf16.vlgmr.msrb.gmra.mxu2 %v761_v20 }
 0x393   : > { %v752_v22 = vpop.f32.mrf.mxu1 }
 0x394   : > { %v753_v23 = vadd.f32 %v5917_v12, %v752_v22 }
 0x396   : > { %v759_v26 = vmax.f32 %v753_v23, 0.0 }
 0x39b   : > { %v754_v24 = vpop.f32.mrf.mxu1 }
 0x39c   : > { %v755_v25 = vadd.f32 %v5917_v12, %v754_v24  ;;  %v5598_v12 = vld [vmem:[#allocation2 + $0x248] sm:$0xff] }
 0x39d   : > { %1112 = vmatpush.bf16.msra.mxu1 %v5598_v12  ;;  %v5617_v12 = vld [vmem:[#allocation2 + $0x2e0] sm:$0xff] }
 0x39e   : > { %v760_v27 = vmax.f32 %v755_v25, 0.0 }
 0x3a0   : > { %v762_v28 = vpack.c.bf16 %v760_v27, %v759_v26 }
 0x3a1   : > { %1113 = vmatpush.bf16.msra.mxu1 %v5597_v13 }
 0x3a2   : > { %843 = vmatmul.bf16.gmra.mxu2 %v762_v28 }
 0x415   : > { %v839_v33 = vpop.f32.mrf.mxu2 }
 0x416   : > { %v840_v37 = vadd.f32 %v5918_v35, %v839_v33  ;;  %v5608_v33 = vld [vmem:[#allocation2 + $0x298] sm:$0xff] }
 0x417   : > { %1274 = vmatpush.bf16.msra.mxu2 %v5608_v33 }
 0x418   : > { %v849_v41 = vmax.f32 %v840_v37, 0.0  ;;  %v5606_v37 = vld [vmem:[#allocation2 + $0x288] sm:$0xff] }
 0x41b   : > { %1275 = vmatpush.bf16.msra.mxu2 %v5607_v34 }
 0x41d   : > { %v841_v38 = vpop.f32.mrf.mxu2 }
 0x41e   : > { %v842_v39 = vadd.f32 %v5918_v35, %v841_v38 }
 0x41f   : > { %1276 = vmatpush.bf16.msra.mxu2 %v5606_v37 }
 0x420   : > { %v850_v42 = vmax.f32 %v842_v39, 0.0 }
 0x422   : > { %v853_v43 = vpack.c.bf16 %v850_v42, %v849_v41 }
 0x423   : > { %1277 = vmatpush.bf16.msra.mxu2 %v5605_v40 }
 0x424   : > { %930 = vmatmul.bf16.vlgmr.msrb.gmra.mxu3 %v853_v43 }
 0x425   : > { %v844_v45 = vpop.f32.mrf.mxu2 }
 0x426   : > { %v845_v46 = vadd.f32 %v5918_v35, %v844_v45 }
 0x428   : > { %v851_v49 = vmax.f32 %v845_v46, 0.0 }
 0x42d   : > { %v846_v47 = vpop.f32.mrf.mxu2 }
 0x42e   : > { %v847_v48 = vadd.f32 %v5918_v35, %v846_v47  ;;  %v5921_v35 = vld [vmem:[#allocation5 + $0x9] ss:$0 sm:$0xff] }
 0x430   : > { %v852_v50 = vmax.f32 %v847_v48, 0.0 }
 0x432   : > { %v854_v51 = vpack.c.bf16 %v852_v50, %v851_v49 }
 0x434   : > { %935 = vmatmul.bf16.gmra.mxu3 %v854_v51 }
 0x4a7   : > { %v931_v56 = vpop.f32.mrf.mxu3 }
 0x4a8   : > { %v932_v60 = vadd.f32 %v5919_v58, %v931_v56  ;;  %v5620_v56 = vld [vmem:[#allocation2 + $0x2f8] sm:$0xff] }
 0x4a9   : > { %1362 = vmatpush.bf16.msra.mxu3 %v5620_v56 }
 0x4aa   : > { %v941_v0 = vmax.f32 %v932_v60, 0.0  ;;  %v5619_v60 = vld [vmem:[#allocation2 + $0x2f0] sm:$0xff] }
 0x4ad   : > { %1363 = vmatpush.bf16.msra.mxu3 %v5619_v60 }
 0x4af   : > { %v933_v61 = vpop.f32.mrf.mxu3 }
 0x4b0   : > { %v934_v62 = vadd.f32 %v5919_v58, %v933_v61 }
 0x4b2   : > { %v942_v1 = vmax.f32 %v934_v62, 0.0 }
 0x4b4   : > { %v945_v2 = vpack.c.bf16 %v942_v1, %v941_v0 }
 0x4b6   : > { %1022 = vmatmul.bf16.vlgmr.msra.gmra.mxu0 %v945_v2  ;;  %v5618_v2 = vld [vmem:[#allocation2 + $0x2e8] sm:$0xff] }
 0x4b7   : > { %v936_v4 = vpop.f32.mrf.mxu3  ;;  %1364 = vmatpush.bf16.msra.mxu3 %v5618_v2  ;;  %v5622_v2 = vld [vmem:[#allocation2 + $0x308] sm:$0xff] }
 0x4b8   : > { %v937_v5 = vadd.f32 %v5919_v58, %v936_v4 }
 0x4ba   : > { %v943_v8 = vmax.f32 %v937_v5, 0.0 }
 0x4bb   : > { %1365 = vmatpush.bf16.msra.mxu3 %v5617_v12  ;;  %v5633_v12 = vld [vmem:[#allocation2 + $0x360] sm:$0xff] }
 0x4bf   : > { %v938_v6 = vpop.f32.mrf.mxu3 }
 0x4c0   : > { %v939_v7 = vadd.f32 %v5919_v58, %v938_v6 }
 0x4c2   : > { %v944_v9 = vmax.f32 %v939_v7, 0.0 }
 0x4c4   : > { %v946_v10 = vpack.c.bf16 %v944_v9, %v943_v8  ;;  %v5634_v8 = vld [vmem:[#allocation2 + $0x368] sm:$0xff] }
 0x4c6   : > { %1027 = vmatmul.bf16.gmra.mxu0 %v946_v10 }
 0x533   : > { %v1023_v14 = vpop.f32.mrf.mxu0 }
 0x534   : > { %v1024_v16 = vadd.f32 %v5920_v15, %v1023_v14 }
 0x536   : > { %v1033_v19 = vmax.f32 %v1024_v16, 0.0 }
 0x53b   : > { %v1025_v17 = vpop.f32.mrf.mxu0 }
 0x53c   : > { %v1026_v18 = vadd.f32 %v5920_v15, %v1025_v17 }
 0x53e   : > { %v1034_v20 = vmax.f32 %v1026_v18, 0.0 }
 0x540   : > { %v1037_v21 = vpack.c.bf16 %v1034_v20, %v1033_v19 }
 0x542   : > { %1114 = vmatmul.bf16.vlgmr.msra.gmra.mxu1 %v1037_v21 }
 0x543   : > { %v1028_v22 = vpop.f32.mrf.mxu0 }
 0x544   : > { %v1029_v23 = vadd.f32 %v5920_v15, %v1028_v22 }
 0x546   : > { %v1035_v26 = vmax.f32 %v1029_v23, 0.0  ;;  %v5616_v23 = vld [vmem:[#allocation2 + $0x2d8] sm:$0xff] }
 0x547   : > { %1366 = vmatpush.bf16.msra.mxu3 %v5616_v23 }
 0x54b   : > { %v1030_v24 = vpop.f32.mrf.mxu0 }
 0x54c   : > { %v1031_v25 = vadd.f32 %v5920_v15, %v1030_v24 }
 0x54e   : > { %v1036_v27 = vmax.f32 %v1031_v25, 0.0 }
 0x550   : > { %v1038_v28 = vpack.c.bf16 %v1036_v27, %v1035_v26 }
 0x552   : > { %1119 = vmatmul.bf16.gmra.mxu1 %v1038_v28 }
 0x5bf   : > { %v1115_v36 = vpop.f32.mrf.mxu1 }
 0x5c0   : > { %v1116_v38 = vadd.f32 %v5921_v35, %v1115_v36 }
 0x5c2   : > { %v4548_v39 = vmul.f32 -1.442695, %v1116_v38 }
 0x5c4   : > { %5952 = vpow2.f32 %v4548_v39 }
 0x5c7   : > { %v1117_v41 = vpop.f32.mrf.mxu1 }
 0x5c8   : > { %v1118_v42 = vadd.f32 %v5921_v35, %v1117_v41 }
 0x5ca   : > { %v5953_v43 = vpop.eup %5952  ;;  %v4549_v44 = vmul.f32 -1.442695, %v1118_v42  ;;  %v5615_v42 = vld [vmem:[#allocation2 + $0x2d0] sm:$0xff] }
 0x5cb   : > { %v1137_v45 = vadd.f32 1.0, %v5953_v43  ;;  %1367 = vmatpush.bf16.msra.mxu3 %v5615_v42  ;;  %v5614_v43 = vld [vmem:[#allocation2 + $0x2c8] sm:$0xff] }
 0x5cc   : > { %5954 = vpow2.f32 %v4549_v44  ;;  %v5613_v44 = vld [vmem:[#allocation2 + $0x2c0] sm:$0xff] }
 0x5cd   : > { %5956 = vrcp.f32 %v1137_v45  ;;  %vm1146_vm1 = vweird.f32 %v1137_v45  ;;  %v1152_v3 = vand.u32 2147483648, %v1137_v45  ;;  %v1150_v5 = vand.u32 2147483647, %v1137_v45 }
 0x5cf   : > { %v1120_v46 = vpop.f32.mrf.mxu1  ;;  %v1153_v15 = vor.u32 1.1754944e-38, %v1152_v3  ;;  %vm1151_vm6 = vcmp.eq.f32.partialorder %v1150_v5, 8.507059e+37  ;;  %1368 = vmatpush.bf16.msra.mxu3 %v5614_v43  ;;  %v5621_v3 = vld [vmem:[#allocation2 + $0x300] sm:$0xff] }
 0x5d0   : > { %v1121_v47 = vadd.f32 %v5921_v35, %v1120_v46 }
 0x5d2   : > { %v5955_v48 = vpop.eup %5954  ;;  %v4550_v49 = vmul.f32 -1.442695, %v1121_v47  ;;  %v5627_v47 = vld [vmem:[#allocation2 + $0x330] sm:$0xff] }
 0x5d3   : > { %v5957_v50 = vpop.eup %5956  ;;  %v1138_v51 = vadd.f32 1.0, %v5955_v48  ;;  %1369 = vmatpush.bf16.msra.mxu3 %v5613_v44  ;;  %v5922_v48 = vld [vmem:[#allocation5 + $0xa] ss:$0 sm:$0xff] }
 0x5d4   : > { %v1142_v52 = vmul.f32 %v5957_v50, %v1137_v45  ;;  %5958 = vpow2.f32 %v4550_v49  ;;  %vm1147_vm0 = vweird.f32 %v5957_v50  ;;  %v5628_v45 = vld [vmem:[#allocation2 + $0x338] sm:$0xff]  ;;  %v5626_v49 = vld [vmem:[#allocation2 + $0x328] sm:$0xff] }
 0x5d5   : > { %5960 = vrcp.f32 %v1138_v51  ;;  %v1167_v4 = vand.u32 2147483648, %v1138_v51  ;;  %v1165_v7 = vand.u32 2147483647, %v1138_v51  ;;  %vm6237_vm3 = vmor %vm1146_vm1, %vm1147_vm0  ;;  %vm1161_vm4 = vweird.f32 %v1138_v51  ;;  %1454 = vmatpush.bf16.msrb.mxu0 %v5628_v45 }
 0x5d6   : > { %v1143_v53 = vsub.f32 1.0, %v1142_v52 }
 0x5d7   : > { %v1122_v54 = vpop.f32.mrf.mxu1  ;;  %v1168_v16 = vor.u32 1.1754944e-38, %v1167_v4  ;;  %vm1166_vm7 = vcmp.eq.f32.partialorder %v1165_v7, 8.507059e+37  ;;  %v5636_v4 = vld [vmem:[#allocation2 + $0x378] sm:$0xff]  ;;  %v5923_v7 = vld [vmem:[#allocation5 + $0xb] ss:$0 sm:$0xff] }
 0x5d8   : > { %v1123_v55 = vadd.f32 %v5921_v35, %v1122_v54  ;;  %v1144_v59 = vmul.f32 %v5957_v50, %v1143_v53  ;;  %v5625_v53 = vld [vmem:[#allocation2 + $0x320] sm:$0xff]  ;;  %1546 = vmatpush.bf16.msrb.mxu1 %v5636_v4 }
 0x5d9   : > { %1455 = vmatpush.bf16.msrb.mxu0 %v5627_v47  ;;  %v5639_v47 = vld [vmem:[#allocation2 + $0x390] sm:$0xff] }
 0x5da   : > { %v5959_v57 = vpop.eup %5958  ;;  %v4551_v58 = vmul.f32 -1.442695, %v1123_v55  ;;  %v1145_v1 = vadd.f32 %v5957_v50, %v1144_v59 }
 0x5db   : > { %v5961_v61 = vpop.eup %5960  ;;  %v1139_v62 = vadd.f32 1.0, %v5959_v57  ;;  %v5624_v57 = vld [vmem:[#allocation2 + $0x318] sm:$0xff] }
 0x5dc   : > { %v1157_v63 = vmul.f32 %v5961_v61, %v1138_v51  ;;  %5962 = vpow2.f32 %v4551_v58  ;;  %vm1162_vm2 = vweird.f32 %v5961_v61  ;;  %v1149_v10 = vsel %vm6237_vm3, %v5957_v50, %v1145_v1  ;;  %v5623_v1 = vld [vmem:[#allocation2 + $0x310] sm:$0xff] }
 0x5dd   : > { %5964 = vrcp.f32 %v1139_v62  ;;  %vm1163_vm5 = vmor %vm1161_vm4, %vm1162_vm2  ;;  %v1154_v19 = vsel %vm1151_vm6, %v1153_v15, %v1149_v10  ;;  %vm1176_vm9 = vweird.f32 %v1139_v62  ;;  %v1182_v29 = vand.u32 2147483648, %v1139_v62  ;;  %1456 = vmatpush.bf16.msrb.mxu0 %v5626_v49  ;;  %v5637_v49 = vld [vmem:[#allocation2 + $0x380] sm:$0xff] }
 0x5de   : > { %v1158_v0 = vsub.f32 1.0, %v1157_v63  ;;  %v1180_v31 = vand.u32 2147483647, %v1139_v62 }
 0x5df   : > { %v1183_v36 = vor.u32 1.1754944e-38, %v1182_v29  ;;  %v5643_v29 = vld [vmem:[#allocation2 + $0x3b0] sm:$0xff] }
 0x5e0   : > { %v1159_v6 = vmul.f32 %v5961_v61, %v1158_v0  ;;  %vm1181_vm14 = vcmp.eq.f32.partialorder %v1180_v31, 8.507059e+37  ;;  %v5642_v31 = vld [vmem:[#allocation2 + $0x3a8] sm:$0xff] }
 0x5e1   : > { %1457 = vmatpush.bf16.msrb.mxu0 %v5625_v53  ;;  %v5925_v53 = vld [vmem:[#allocation5 + $0xd] ss:$0 sm:$0xff] }
 0x5e2   : > { %v5963_v9 = vpop.eup %5962  ;;  %v1160_v11 = vadd.f32 %v5961_v61, %v1159_v6  ;;  %v5635_v6 = vld [vmem:[#allocation2 + $0x370] sm:$0xff] }
 0x5e3   : > { %v5965_v13 = vpop.eup %5964  ;;  %v1140_v14 = vadd.f32 1.0, %v5963_v9  ;;  %1547 = vmatpush.bf16.msrb.mxu1 %v5635_v6  ;;  %v5647_v6 = vld [vmem:[#allocation2 + $0x3d0] sm:$0xff] }
 0x5e4   : > { %v1164_v17 = vsel %vm1163_vm5, %v5961_v61, %v1160_v11  ;;  %v1172_v18 = vmul.f32 %v5965_v13, %v1139_v62  ;;  %vm1177_vm8 = vweird.f32 %v5965_v13 }
 0x5e5   : > { %5966 = vrcp.f32 %v1140_v14  ;;  %v1169_v20 = vsel %vm1166_vm7, %v1168_v16, %v1164_v17  ;;  %v1197_v30 = vand.u32 2147483648, %v1140_v14  ;;  %v1195_v33 = vand.u32 2147483647, %v1140_v14  ;;  %vm1178_vm11 = vmor %vm1176_vm9, %vm1177_vm8  ;;  %1458 = vmatpush.bf16.msrb.mxu0 %v5624_v57  ;;  %v5632_v16 = vld [vmem:[#allocation2 + $0x358] sm:$0xff] }
 0x5e6   : > { %v1201_v21 = vpack.c.bf16 %v1169_v20, %v1154_v19  ;;  %v1173_v22 = vsub.f32 1.0, %v1172_v18  ;;  %vm1191_vm12 = vweird.f32 %v1140_v14 }
 0x5e7   : > { %v1198_v37 = vor.u32 1.1754944e-38, %v1197_v30  ;;  %vm1196_vm15 = vcmp.eq.f32.partialorder %v1195_v33, 8.507059e+37  ;;  %1548 = vmatpush.bf16.msrb.mxu1 %v5634_v8  ;;  %v5924_v30 = vld [vmem:[#allocation5 + $0xc] ss:$0 sm:$0xff]  ;;  %v5645_v8 = vld [vmem:[#allocation2 + $0x3c0] sm:$0xff] }
 0x5e8   : > { %1278 = vmatmul.bf16.vlgmr.msra.gmra.mxu2 %v1201_v21  ;;  %v1174_v24 = vmul.f32 %v5965_v13, %v1173_v22 }
 0x5e9   : > { %1459 = vmatpush.bf16.msrb.mxu0 %v5623_v1 }
 0x5ea   : > { %v1175_v27 = vadd.f32 %v5965_v13, %v1174_v24  ;;  %v5631_v24 = vld [vmem:[#allocation2 + $0x350] sm:$0xff] }
 0x5eb   : > { %v5967_v25 = vpop.eup %5966  ;;  %1549 = vmatpush.bf16.msrb.mxu1 %v5633_v12  ;;  %v5926_v12 = vld [vmem:[#allocation5 + $0xe] ss:$0 sm:$0xff] }
 0x5ec   : > { %v1187_v26 = vmul.f32 %v5967_v25, %v1140_v14  ;;  %vm1192_vm10 = vweird.f32 %v5967_v25  ;;  %v1179_v34 = vsel %vm1178_vm11, %v5965_v13, %v1175_v27  ;;  %v5644_v27 = vld [vmem:[#allocation2 + $0x3b8] sm:$0xff] }
 0x5ed   : > { %vm1193_vm13 = vmor %vm1191_vm12, %vm1192_vm10  ;;  %v1184_v39 = vsel %vm1181_vm14, %v1183_v36, %v1179_v34  ;;  %1460 = vmatpush.bf16.msrb.mxu0 %v5622_v2  ;;  %1638 = vmatpush.bf16.msrb.mxu2 %v5644_v27 }
 0x5ee   : > { %v1188_v28 = vsub.f32 1.0, %v1187_v26  ;;  %v5629_v26 = vld [vmem:[#allocation2 + $0x340] sm:$0xff] }
 0x5ef   : > { %1550 = vmatpush.bf16.msrb.mxu1 %v5632_v16 }
 0x5f0   : > { %v1189_v32 = vmul.f32 %v5967_v25, %v1188_v28 }
 0x5f1   : > { %1461 = vmatpush.bf16.msrb.mxu0 %v5621_v3  ;;  %1639 = vmatpush.bf16.msrb.mxu2 %v5643_v29  ;;  %v5655_v29 = vld [vmem:[#allocation2 + $0x410] sm:$0xff] }
 0x5f2   : > { %v1190_v35 = vadd.f32 %v5967_v25, %v1189_v32 }
 0x5f3   : > { %1551 = vmatpush.bf16.msrb.mxu1 %v5631_v24 }
 0x5f4   : > { %v1194_v38 = vsel %vm1193_vm13, %v5967_v25, %v1190_v35  ;;  %v5630_v25 = vld [vmem:[#allocation2 + $0x348] sm:$0xff]  ;;  %v5641_v35 = vld [vmem:[#allocation2 + $0x3a0] sm:$0xff] }
 0x5f5   : > { %v1199_v40 = vsel %vm1196_vm15, %v1198_v37, %v1194_v38  ;;  %1640 = vmatpush.bf16.msrb.mxu2 %v5642_v31  ;;  %v5653_v31 = vld [vmem:[#allocation2 + $0x400] sm:$0xff] }
 0x5f6   : > { %v1202_v41 = vpack.c.bf16 %v1199_v40, %v1184_v39  ;;  %v5640_v39 = vld [vmem:[#allocation2 + $0x398] sm:$0xff] }
 0x5f7   : > { %1552 = vmatpush.bf16.msrb.mxu1 %v5630_v25 }
 0x5f8   : > { %1283 = vmatmul.bf16.gmra.mxu2 %v1202_v41 }
 0x5f9   : > { %1641 = vmatpush.bf16.msrb.mxu2 %v5641_v35  ;;  %v5927_v35 = vld [vmem:[#allocation5 + $0xf] ss:$0 sm:$0xff] }
 0x5fb   : > { %1553 = vmatpush.bf16.msrb.mxu1 %v5629_v26 }
 0x5fd   : > { %1642 = vmatpush.bf16.msrb.mxu2 %v5640_v39 }
 0x601   : > { %1643 = vmatpush.bf16.msrb.mxu2 %v5639_v47 }
 0x66b   : > { %v1279_v46 = vpop.f32.mrf.mxu2 }
 0x66c   : > { %v1280_v50 = vadd.f32 %v5922_v48, %v1279_v46 }
 0x66e   : > { %v1289_v54 = vmax.f32 %v1280_v50, 0.0  ;;  %v5652_v50 = vld [vmem:[#allocation2 + $0x3f8] sm:$0xff] }
 0x66f   : > { %1730 = vmatpush.bf16.msrb.mxu3 %v5652_v50 }
 0x673   : > { %v1281_v51 = vpop.f32.mrf.mxu2 }
 0x674   : > { %v1282_v52 = vadd.f32 %v5922_v48, %v1281_v51 }
 0x676   : > { %v1290_v55 = vmax.f32 %v1282_v52, 0.0  ;;  %v5651_v52 = vld [vmem:[#allocation2 + $0x3f0] sm:$0xff] }
 0x677   : > { %1731 = vmatpush.bf16.msrb.mxu3 %v5651_v52  ;;  %v5663_v52 = vld [vmem:[#allocation2 + $0x450] sm:$0xff] }
 0x678   : > { %v1293_v56 = vpack.c.bf16 %v1290_v55, %v1289_v54  ;;  %v5650_v54 = vld [vmem:[#allocation2 + $0x3e8] sm:$0xff] }
 0x67a   : > { %1370 = vmatmul.bf16.vlgmr.msra.gmra.mxu3 %v1293_v56 }
 0x67b   : > { %v1284_v58 = vpop.f32.mrf.mxu2  ;;  %1732 = vmatpush.bf16.msrb.mxu3 %v5650_v54  ;;  %v5661_v54 = vld [vmem:[#allocation2 + $0x440] sm:$0xff] }
 0x67c   : > { %v1285_v59 = vadd.f32 %v5922_v48, %v1284_v58  ;;  %v5649_v58 = vld [vmem:[#allocation2 + $0x3e0] sm:$0xff] }
 0x67e   : > { %v1291_v62 = vmax.f32 %v1285_v59, 0.0 }
 0x67f   : > { %1733 = vmatpush.bf16.msrb.mxu3 %v5649_v58  ;;  %v5928_v58 = vld [vmem:[#allocation5 + $0x10] ss:$0 sm:$0xff] }
 0x683   : > { %v1286_v60 = vpop.f32.mrf.mxu2 }
 0x684   : > { %v1287_v61 = vadd.f32 %v5922_v48, %v1286_v60  ;;  %v5638_v48 = vld [vmem:[#allocation2 + $0x388] sm:$0xff] }
 0x685   : > { %1644 = vmatpush.bf16.msrb.mxu2 %v5638_v48 }
 0x686   : > { %v1292_v63 = vmax.f32 %v1287_v61, 0.0 }
 0x688   : > { %v1294_v0 = vpack.c.bf16 %v1292_v63, %v1291_v62  ;;  %v5648_v62 = vld [vmem:[#allocation2 + $0x3d8] sm:$0xff] }
 0x689   : > { %1645 = vmatpush.bf16.msrb.mxu2 %v5637_v49  ;;  %1734 = vmatpush.bf16.msrb.mxu3 %v5648_v62 }
 0x68a   : > { %1375 = vmatmul.bf16.gmra.mxu3 %v1294_v0 }
 0x68d   : > { %1735 = vmatpush.bf16.msrb.mxu3 %v5647_v6 }
 0x6fd   : > { %v1371_v5 = vpop.f32.mrf.mxu3 }
 0x6fe   : > { %v1372_v9 = vadd.f32 %v5923_v7, %v1371_v5 }
 0x700   : > { %v1381_v13 = vmax.f32 %v1372_v9, 0.0  ;;  %v5660_v9 = vld [vmem:[#allocation2 + $0x438] sm:$0xff] }
 0x701   : > { %1822 = vmatpush.bf16.msra.mxu0 %v5660_v9 }
 0x705   : > { %v1373_v10 = vpop.f32.mrf.mxu3 }
 0x706   : > { %v1374_v11 = vadd.f32 %v5923_v7, %v1373_v10 }
 0x708   : > { %v1382_v14 = vmax.f32 %v1374_v11, 0.0  ;;  %v5659_v11 = vld [vmem:[#allocation2 + $0x430] sm:$0xff] }
 0x709   : > { %1823 = vmatpush.bf16.msra.mxu0 %v5659_v11  ;;  %v5671_v11 = vld [vmem:[#allocation2 + $0x490] sm:$0xff] }
 0x70a   : > { %v1385_v15 = vpack.c.bf16 %v1382_v14, %v1381_v13  ;;  %v5658_v13 = vld [vmem:[#allocation2 + $0x428] sm:$0xff] }
 0x70c   : > { %1462 = vmatmul.bf16.vlgmr.msrb.gmra.mxu0 %v1385_v15 }
 0x70d   : > { %v1376_v17 = vpop.f32.mrf.mxu3  ;;  %1824 = vmatpush.bf16.msra.mxu0 %v5658_v13  ;;  %v5669_v13 = vld [vmem:[#allocation2 + $0x480] sm:$0xff] }
 0x70e   : > { %v1377_v18 = vadd.f32 %v5923_v7, %v1376_v17  ;;  %v5657_v17 = vld [vmem:[#allocation2 + $0x420] sm:$0xff] }
 0x710   : > { %v1383_v21 = vmax.f32 %v1377_v18, 0.0 }
 0x711   : > { %1825 = vmatpush.bf16.msra.mxu0 %v5657_v17  ;;  %v5929_v17 = vld [vmem:[#allocation5 + $0x11] ss:$0 sm:$0xff] }
 0x715   : > { %v1378_v19 = vpop.f32.mrf.mxu3 }
 0x716   : > { %v1379_v20 = vadd.f32 %v5923_v7, %v1378_v19  ;;  %v5646_v7 = vld [vmem:[#allocation2 + $0x3c8] sm:$0xff] }
 0x717   : > { %1736 = vmatpush.bf16.msrb.mxu3 %v5646_v7 }
 0x718   : > { %v1384_v22 = vmax.f32 %v1379_v20, 0.0 }
 0x71a   : > { %v1386_v23 = vpack.c.bf16 %v1384_v22, %v1383_v21  ;;  %v5656_v21 = vld [vmem:[#allocation2 + $0x418] sm:$0xff] }
 0x71b   : > { %1737 = vmatpush.bf16.msrb.mxu3 %v5645_v8  ;;  %1826 = vmatpush.bf16.msra.mxu0 %v5656_v21 }
 0x71c   : > { %1467 = vmatmul.bf16.gmra.mxu0 %v1386_v23 }
 0x71f   : > { %1827 = vmatpush.bf16.msra.mxu0 %v5655_v29 }
 0x789   : > { %v1463_v28 = vpop.f32.mrf.mxu0 }
 0x78a   : > { %v1464_v32 = vadd.f32 %v5924_v30, %v1463_v28 }
 0x78c   : > { %v1473_v36 = vmax.f32 %v1464_v32, 0.0  ;;  %v5668_v32 = vld [vmem:[#allocation2 + $0x478] sm:$0xff] }
 0x78d   : > { %1914 = vmatpush.bf16.msra.mxu1 %v5668_v32 }
 0x791   : > { %v1465_v33 = vpop.f32.mrf.mxu0 }
 0x792   : > { %v1466_v34 = vadd.f32 %v5924_v30, %v1465_v33 }
 0x794   : > { %v1474_v37 = vmax.f32 %v1466_v34, 0.0  ;;  %v5667_v34 = vld [vmem:[#allocation2 + $0x470] sm:$0xff] }
 0x795   : > { %1915 = vmatpush.bf16.msra.mxu1 %v5667_v34  ;;  %v5679_v34 = vld [vmem:[#allocation2 + $0x4d0] sm:$0xff] }
 0x796   : > { %v1477_v38 = vpack.c.bf16 %v1474_v37, %v1473_v36  ;;  %v5666_v36 = vld [vmem:[#allocation2 + $0x468] sm:$0xff] }
 0x798   : > { %1554 = vmatmul.bf16.vlgmr.msrb.gmra.mxu1 %v1477_v38 }
 0x799   : > { %v1468_v40 = vpop.f32.mrf.mxu0  ;;  %1916 = vmatpush.bf16.msra.mxu1 %v5666_v36  ;;  %v5677_v36 = vld [vmem:[#allocation2 + $0x4c0] sm:$0xff] }
 0x79a   : > { %v1469_v41 = vadd.f32 %v5924_v30, %v1468_v40  ;;  %v5665_v40 = vld [vmem:[#allocation2 + $0x460] sm:$0xff] }
 0x79c   : > { %v1475_v44 = vmax.f32 %v1469_v41, 0.0 }
 0x79d   : > { %1917 = vmatpush.bf16.msra.mxu1 %v5665_v40  ;;  %v5930_v40 = vld [vmem:[#allocation5 + $0x12] ss:$0 sm:$0xff] }
 0x7a1   : > { %v1470_v42 = vpop.f32.mrf.mxu0 }
 0x7a2   : > { %v1471_v43 = vadd.f32 %v5924_v30, %v1470_v42  ;;  %v5654_v30 = vld [vmem:[#allocation2 + $0x408] sm:$0xff] }
 0x7a3   : > { %1828 = vmatpush.bf16.msra.mxu0 %v5654_v30 }
 0x7a4   : > { %v1476_v45 = vmax.f32 %v1471_v43, 0.0 }
 0x7a6   : > { %v1478_v46 = vpack.c.bf16 %v1476_v45, %v1475_v44  ;;  %v5664_v44 = vld [vmem:[#allocation2 + $0x458] sm:$0xff] }
 0x7a7   : > { %1829 = vmatpush.bf16.msra.mxu0 %v5653_v31  ;;  %1918 = vmatpush.bf16.msra.mxu1 %v5664_v44 }
 0x7a8   : > { %1559 = vmatmul.bf16.gmra.mxu1 %v1478_v46 }
 0x7ab   : > { %1919 = vmatpush.bf16.msra.mxu1 %v5663_v52 }
 0x815   : > { %v1555_v51 = vpop.f32.mrf.mxu1 }
 0x816   : > { %v1556_v55 = vadd.f32 %v5925_v53, %v1555_v51 }
 0x818   : > { %v1565_v59 = vmax.f32 %v1556_v55, 0.0  ;;  %v5676_v55 = vld [vmem:[#allocation2 + $0x4b8] sm:$0xff] }
 0x819   : > { %2006 = vmatpush.bf16.msra.mxu2 %v5676_v55 }
 0x81d   : > { %v1557_v56 = vpop.f32.mrf.mxu1 }
 0x81e   : > { %v1558_v57 = vadd.f32 %v5925_v53, %v1557_v56 }
 0x820   : > { %v1566_v60 = vmax.f32 %v1558_v57, 0.0  ;;  %v5675_v57 = vld [vmem:[#allocation2 + $0x4b0] sm:$0xff] }
 0x821   : > { %2007 = vmatpush.bf16.msra.mxu2 %v5675_v57  ;;  %v5687_v57 = vld [vmem:[#allocation2 + $0x510] sm:$0xff] }
 0x822   : > { %v1569_v61 = vpack.c.bf16 %v1566_v60, %v1565_v59  ;;  %v5674_v59 = vld [vmem:[#allocation2 + $0x4a8] sm:$0xff] }
 0x824   : > { %1646 = vmatmul.bf16.vlgmr.msrb.gmra.mxu2 %v1569_v61 }
 0x825   : > { %v1560_v63 = vpop.f32.mrf.mxu1  ;;  %2008 = vmatpush.bf16.msra.mxu2 %v5674_v59  ;;  %v5685_v59 = vld [vmem:[#allocation2 + $0x500] sm:$0xff] }
 0x826   : > { %v1561_v0 = vadd.f32 %v5925_v53, %v1560_v63  ;;  %v5673_v63 = vld [vmem:[#allocation2 + $0x4a0] sm:$0xff] }
 0x828   : > { %v1567_v3 = vmax.f32 %v1561_v0, 0.0 }
 0x829   : > { %2009 = vmatpush.bf16.msra.mxu2 %v5673_v63  ;;  %v5931_v63 = vld [vmem:[#allocation5 + $0x13] ss:$0 sm:$0xff] }
 0x82d   : > { %v1562_v1 = vpop.f32.mrf.mxu1 }
 0x82e   : > { %v1563_v2 = vadd.f32 %v5925_v53, %v1562_v1  ;;  %v5662_v53 = vld [vmem:[#allocation2 + $0x448] sm:$0xff] }
 0x82f   : > { %1920 = vmatpush.bf16.msra.mxu1 %v5662_v53 }
 0x830   : > { %v1568_v4 = vmax.f32 %v1563_v2, 0.0 }
 0x832   : > { %v1570_v5 = vpack.c.bf16 %v1568_v4, %v1567_v3  ;;  %v5672_v3 = vld [vmem:[#allocation2 + $0x498] sm:$0xff] }
 0x833   : > { %1921 = vmatpush.bf16.msra.mxu1 %v5661_v54  ;;  %2010 = vmatpush.bf16.msra.mxu2 %v5672_v3 }
 0x834   : > { %1651 = vmatmul.bf16.gmra.mxu2 %v1570_v5 }
 0x837   : > { %2011 = vmatpush.bf16.msra.mxu2 %v5671_v11 }
 0x8a7   : > { %v1647_v10 = vpop.f32.mrf.mxu2 }
 0x8a8   : > { %v1648_v14 = vadd.f32 %v5926_v12, %v1647_v10 }
 0x8aa   : > { %v1657_v18 = vmax.f32 %v1648_v14, 0.0  ;;  %v5684_v14 = vld [vmem:[#allocation2 + $0x4f8] sm:$0xff] }
 0x8ab   : > { %2098 = vmatpush.bf16.msra.mxu3 %v5684_v14 }
 0x8af   : > { %v1649_v15 = vpop.f32.mrf.mxu2 }
 0x8b0   : > { %v1650_v16 = vadd.f32 %v5926_v12, %v1649_v15 }
 0x8b2   : > { %v1658_v19 = vmax.f32 %v1650_v16, 0.0  ;;  %v5683_v16 = vld [vmem:[#allocation2 + $0x4f0] sm:$0xff] }
 0x8b3   : > { %2099 = vmatpush.bf16.msra.mxu3 %v5683_v16  ;;  %v5695_v16 = vld [vmem:[#allocation2 + $0x550] sm:$0xff] }
 0x8b4   : > { %v1661_v20 = vpack.c.bf16 %v1658_v19, %v1657_v18  ;;  %v5682_v18 = vld [vmem:[#allocation2 + $0x4e8] sm:$0xff] }
 0x8b6   : > { %1738 = vmatmul.bf16.vlgmr.msrb.gmra.mxu3 %v1661_v20 }
 0x8b7   : > { %v1652_v22 = vpop.f32.mrf.mxu2  ;;  %2100 = vmatpush.bf16.msra.mxu3 %v5682_v18  ;;  %v5693_v18 = vld [vmem:[#allocation2 + $0x540] sm:$0xff] }
 0x8b8   : > { %v1653_v23 = vadd.f32 %v5926_v12, %v1652_v22  ;;  %v5681_v22 = vld [vmem:[#allocation2 + $0x4e0] sm:$0xff] }
 0x8ba   : > { %v1659_v26 = vmax.f32 %v1653_v23, 0.0 }
 0x8bb   : > { %2101 = vmatpush.bf16.msra.mxu3 %v5681_v22  ;;  %v5932_v22 = vld [vmem:[#allocation5 + $0x14] ss:$0 sm:$0xff] }
 0x8bf   : > { %v1654_v24 = vpop.f32.mrf.mxu2 }
 0x8c0   : > { %v1655_v25 = vadd.f32 %v5926_v12, %v1654_v24  ;;  %v5670_v12 = vld [vmem:[#allocation2 + $0x488] sm:$0xff] }
 0x8c1   : > { %2012 = vmatpush.bf16.msra.mxu2 %v5670_v12 }
 0x8c2   : > { %v1660_v27 = vmax.f32 %v1655_v25, 0.0 }
 0x8c4   : > { %v1662_v28 = vpack.c.bf16 %v1660_v27, %v1659_v26  ;;  %v5680_v26 = vld [vmem:[#allocation2 + $0x4d8] sm:$0xff] }
 0x8c5   : > { %2013 = vmatpush.bf16.msra.mxu2 %v5669_v13  ;;  %2102 = vmatpush.bf16.msra.mxu3 %v5680_v26 }
 0x8c6   : > { %1743 = vmatmul.bf16.gmra.mxu3 %v1662_v28 }
 0x8c9   : > { %2103 = vmatpush.bf16.msra.mxu3 %v5679_v34 }
 0x939   : > { %v1739_v33 = vpop.f32.mrf.mxu3 }
 0x93a   : > { %v1740_v37 = vadd.f32 %v5927_v35, %v1739_v33 }
 0x93c   : > { %v1749_v41 = vmax.f32 %v1740_v37, 0.0  ;;  %v5692_v37 = vld [vmem:[#allocation2 + $0x538] sm:$0xff] }
 0x93d   : > { %2190 = vmatpush.bf16.msrb.mxu0 %v5692_v37 }
 0x941   : > { %v1741_v38 = vpop.f32.mrf.mxu3 }
 0x942   : > { %v1742_v39 = vadd.f32 %v5927_v35, %v1741_v38 }
 0x944   : > { %v1750_v42 = vmax.f32 %v1742_v39, 0.0  ;;  %v5691_v39 = vld [vmem:[#allocation2 + $0x530] sm:$0xff] }
 0x945   : > { %2191 = vmatpush.bf16.msrb.mxu0 %v5691_v39  ;;  %v5703_v39 = vld [vmem:[#allocation2 + $0x590] sm:$0xff] }
 0x946   : > { %v1753_v43 = vpack.c.bf16 %v1750_v42, %v1749_v41  ;;  %v5690_v41 = vld [vmem:[#allocation2 + $0x528] sm:$0xff] }
 0x948   : > { %1830 = vmatmul.bf16.vlgmr.msra.gmra.mxu0 %v1753_v43 }
 0x949   : > { %v1744_v45 = vpop.f32.mrf.mxu3  ;;  %2192 = vmatpush.bf16.msrb.mxu0 %v5690_v41  ;;  %v5701_v41 = vld [vmem:[#allocation2 + $0x580] sm:$0xff] }
 0x94a   : > { %v1745_v46 = vadd.f32 %v5927_v35, %v1744_v45  ;;  %v5689_v45 = vld [vmem:[#allocation2 + $0x520] sm:$0xff] }
 0x94c   : > { %v1751_v49 = vmax.f32 %v1745_v46, 0.0 }
 0x94d   : > { %2193 = vmatpush.bf16.msrb.mxu0 %v5689_v45  ;;  %v5933_v45 = vld [vmem:[#allocation5 + $0x15] ss:$0 sm:$0xff] }
 0x951   : > { %v1746_v47 = vpop.f32.mrf.mxu3 }
 0x952   : > { %v1747_v48 = vadd.f32 %v5927_v35, %v1746_v47  ;;  %v5678_v35 = vld [vmem:[#allocation2 + $0x4c8] sm:$0xff] }
 0x953   : > { %2104 = vmatpush.bf16.msra.mxu3 %v5678_v35 }
 0x954   : > { %v1752_v50 = vmax.f32 %v1747_v48, 0.0 }
 0x956   : > { %v1754_v51 = vpack.c.bf16 %v1752_v50, %v1751_v49  ;;  %v5688_v49 = vld [vmem:[#allocation2 + $0x518] sm:$0xff] }
 0x957   : > { %2105 = vmatpush.bf16.msra.mxu3 %v5677_v36  ;;  %2194 = vmatpush.bf16.msrb.mxu0 %v5688_v49 }
 0x958   : > { %1835 = vmatmul.bf16.gmra.mxu0 %v1754_v51 }
 0x95b   : > { %2195 = vmatpush.bf16.msrb.mxu0 %v5687_v57 }
 0x9c5   : > { %v1831_v56 = vpop.f32.mrf.mxu0 }
 0x9c6   : > { %v1832_v60 = vadd.f32 %v5928_v58, %v1831_v56 }
 0x9c8   : > { %v1841_v0 = vmax.f32 %v1832_v60, 0.0  ;;  %v5700_v60 = vld [vmem:[#allocation2 + $0x578] sm:$0xff] }
 0x9c9   : > { %2282 = vmatpush.bf16.msrb.mxu1 %v5700_v60 }
 0x9cd   : > { %v1833_v61 = vpop.f32.mrf.mxu0 }
 0x9ce   : > { %v1834_v62 = vadd.f32 %v5928_v58, %v1833_v61 }
 0x9d0   : > { %v1842_v1 = vmax.f32 %v1834_v62, 0.0  ;;  %v5699_v62 = vld [vmem:[#allocation2 + $0x570] sm:$0xff] }
 0x9d1   : > { %2283 = vmatpush.bf16.msrb.mxu1 %v5699_v62  ;;  %v5711_v62 = vld [vmem:[#allocation2 + $0x5d0] sm:$0xff] }
 0x9d2   : > { %v1845_v2 = vpack.c.bf16 %v1842_v1, %v1841_v0  ;;  %v5698_v0 = vld [vmem:[#allocation2 + $0x568] sm:$0xff] }
 0x9d4   : > { %1922 = vmatmul.bf16.vlgmr.msra.gmra.mxu1 %v1845_v2 }
 0x9d5   : > { %v1836_v4 = vpop.f32.mrf.mxu0  ;;  %2284 = vmatpush.bf16.msrb.mxu1 %v5698_v0  ;;  %v5709_v0 = vld [vmem:[#allocation2 + $0x5c0] sm:$0xff] }
 0x9d6   : > { %v1837_v5 = vadd.f32 %v5928_v58, %v1836_v4  ;;  %v5697_v4 = vld [vmem:[#allocation2 + $0x560] sm:$0xff] }
 0x9d8   : > { %v1843_v8 = vmax.f32 %v1837_v5, 0.0 }
 0x9d9   : > { %2285 = vmatpush.bf16.msrb.mxu1 %v5697_v4  ;;  %v5934_v4 = vld [vmem:[#allocation5 + $0x16] ss:$0 sm:$0xff] }
 0x9dd   : > { %v1838_v6 = vpop.f32.mrf.mxu0 }
 0x9de   : > { %v1839_v7 = vadd.f32 %v5928_v58, %v1838_v6  ;;  %v5686_v58 = vld [vmem:[#allocation2 + $0x508] sm:$0xff] }
 0x9df   : > { %2196 = vmatpush.bf16.msrb.mxu0 %v5686_v58 }
 0x9e0   : > { %v1844_v9 = vmax.f32 %v1839_v7, 0.0 }
 0x9e2   : > { %v1846_v10 = vpack.c.bf16 %v1844_v9, %v1843_v8  ;;  %v5696_v8 = vld [vmem:[#allocation2 + $0x558] sm:$0xff] }
 0x9e3   : > { %2197 = vmatpush.bf16.msrb.mxu0 %v5685_v59  ;;  %2286 = vmatpush.bf16.msrb.mxu1 %v5696_v8 }
 0x9e4   : > { %1927 = vmatmul.bf16.gmra.mxu1 %v1846_v10 }
 0x9e7   : > { %2287 = vmatpush.bf16.msrb.mxu1 %v5695_v16 }
 0xa51   : > { %v1923_v15 = vpop.f32.mrf.mxu1 }
 0xa52   : > { %v1924_v19 = vadd.f32 %v5929_v17, %v1923_v15 }
 0xa54   : > { %v1933_v23 = vmax.f32 %v1924_v19, 0.0  ;;  %v5708_v19 = vld [vmem:[#allocation2 + $0x5b8] sm:$0xff] }
 0xa55   : > { %2374 = vmatpush.bf16.msrb.mxu2 %v5708_v19 }
 0xa59   : > { %v1925_v20 = vpop.f32.mrf.mxu1 }
 0xa5a   : > { %v1926_v21 = vadd.f32 %v5929_v17, %v1925_v20 }
 0xa5c   : > { %v1934_v24 = vmax.f32 %v1926_v21, 0.0  ;;  %v5707_v21 = vld [vmem:[#allocation2 + $0x5b0] sm:$0xff] }
 0xa5d   : > { %2375 = vmatpush.bf16.msrb.mxu2 %v5707_v21  ;;  %v5719_v21 = vld [vmem:[#allocation2 + $0x610] sm:$0xff] }
 0xa5e   : > { %v1937_v25 = vpack.c.bf16 %v1934_v24, %v1933_v23  ;;  %v5706_v23 = vld [vmem:[#allocation2 + $0x5a8] sm:$0xff] }
 0xa60   : > { %2014 = vmatmul.bf16.vlgmr.msra.gmra.mxu2 %v1937_v25 }
 0xa61   : > { %v1928_v27 = vpop.f32.mrf.mxu1  ;;  %2376 = vmatpush.bf16.msrb.mxu2 %v5706_v23  ;;  %v5717_v23 = vld [vmem:[#allocation2 + $0x600] sm:$0xff] }
 0xa62   : > { %v1929_v28 = vadd.f32 %v5929_v17, %v1928_v27  ;;  %v5705_v27 = vld [vmem:[#allocation2 + $0x5a0] sm:$0xff] }
 0xa64   : > { %v1935_v31 = vmax.f32 %v1929_v28, 0.0 }
 0xa65   : > { %2377 = vmatpush.bf16.msrb.mxu2 %v5705_v27  ;;  %v5935_v27 = vld [vmem:[#allocation5 + $0x17] ss:$0 sm:$0xff] }
 0xa69   : > { %v1930_v29 = vpop.f32.mrf.mxu1 }
 0xa6a   : > { %v1931_v30 = vadd.f32 %v5929_v17, %v1930_v29  ;;  %v5694_v17 = vld [vmem:[#allocation2 + $0x548] sm:$0xff] }
 0xa6b   : > { %2288 = vmatpush.bf16.msrb.mxu1 %v5694_v17 }
 0xa6c   : > { %v1936_v32 = vmax.f32 %v1931_v30, 0.0 }
 0xa6e   : > { %v1938_v33 = vpack.c.bf16 %v1936_v32, %v1935_v31  ;;  %v5704_v31 = vld [vmem:[#allocation2 + $0x598] sm:$0xff] }
 0xa6f   : > { %2289 = vmatpush.bf16.msrb.mxu1 %v5693_v18  ;;  %2378 = vmatpush.bf16.msrb.mxu2 %v5704_v31 }
 0xa70   : > { %2019 = vmatmul.bf16.gmra.mxu2 %v1938_v33 }
 0xa73   : > { %2379 = vmatpush.bf16.msrb.mxu2 %v5703_v39 }
 0xae3   : > { %v2015_v38 = vpop.f32.mrf.mxu2 }
 0xae4   : > { %v2016_v42 = vadd.f32 %v5930_v40, %v2015_v38 }
 0xae6   : > { %v2025_v46 = vmax.f32 %v2016_v42, 0.0  ;;  %v5716_v42 = vld [vmem:[#allocation2 + $0x5f8] sm:$0xff] }
 0xae7   : > { %2466 = vmatpush.bf16.msrb.mxu3 %v5716_v42 }
 0xaeb   : > { %v2017_v43 = vpop.f32.mrf.mxu2 }
 0xaec   : > { %v2018_v44 = vadd.f32 %v5930_v40, %v2017_v43 }
 0xaee   : > { %v2026_v47 = vmax.f32 %v2018_v44, 0.0  ;;  %v5715_v44 = vld [vmem:[#allocation2 + $0x5f0] sm:$0xff] }
 0xaef   : > { %2467 = vmatpush.bf16.msrb.mxu3 %v5715_v44  ;;  %v5727_v44 = vld [vmem:[#allocation2 + $0x650] sm:$0xff] }
 0xaf0   : > { %v2029_v48 = vpack.c.bf16 %v2026_v47, %v2025_v46  ;;  %v5714_v46 = vld [vmem:[#allocation2 + $0x5e8] sm:$0xff] }
 0xaf2   : > { %2106 = vmatmul.bf16.vlgmr.msra.gmra.mxu3 %v2029_v48 }
 0xaf3   : > { %v2020_v50 = vpop.f32.mrf.mxu2  ;;  %2468 = vmatpush.bf16.msrb.mxu3 %v5714_v46  ;;  %v5725_v46 = vld [vmem:[#allocation2 + $0x640] sm:$0xff] }
 0xaf4   : > { %v2021_v51 = vadd.f32 %v5930_v40, %v2020_v50  ;;  %v5713_v50 = vld [vmem:[#allocation2 + $0x5e0] sm:$0xff] }
 0xaf6   : > { %v2027_v54 = vmax.f32 %v2021_v51, 0.0 }
 0xaf7   : > { %2469 = vmatpush.bf16.msrb.mxu3 %v5713_v50  ;;  %v5936_v50 = vld [vmem:[#allocation5 + $0x18] ss:$0 sm:$0xff] }
 0xafb   : > { %v2022_v52 = vpop.f32.mrf.mxu2 }
 0xafc   : > { %v2023_v53 = vadd.f32 %v5930_v40, %v2022_v52  ;;  %v5702_v40 = vld [vmem:[#allocation2 + $0x588] sm:$0xff] }
 0xafd   : > { %2380 = vmatpush.bf16.msrb.mxu2 %v5702_v40 }
 0xafe   : > { %v2028_v55 = vmax.f32 %v2023_v53, 0.0 }
 0xb00   : > { %v2030_v56 = vpack.c.bf16 %v2028_v55, %v2027_v54  ;;  %v5712_v54 = vld [vmem:[#allocation2 + $0x5d8] sm:$0xff] }
 0xb01   : > { %2381 = vmatpush.bf16.msrb.mxu2 %v5701_v41  ;;  %2470 = vmatpush.bf16.msrb.mxu3 %v5712_v54 }
 0xb02   : > { %2111 = vmatmul.bf16.gmra.mxu3 %v2030_v56 }
 0xb05   : > { %2471 = vmatpush.bf16.msrb.mxu3 %v5711_v62 }
 0xb75   : > { %v2107_v61 = vpop.f32.mrf.mxu3 }
 0xb76   : > { %v2108_v1 = vadd.f32 %v5931_v63, %v2107_v61 }
 0xb78   : > { %v2117_v5 = vmax.f32 %v2108_v1, 0.0  ;;  %v5724_v1 = vld [vmem:[#allocation2 + $0x638] sm:$0xff] }
 0xb79   : > { %2558 = vmatpush.bf16.msra.mxu0 %v5724_v1 }
 0xb7d   : > { %v2109_v2 = vpop.f32.mrf.mxu3 }
 0xb7e   : > { %v2110_v3 = vadd.f32 %v5931_v63, %v2109_v2 }
 0xb80   : > { %v2118_v6 = vmax.f32 %v2110_v3, 0.0  ;;  %v5723_v3 = vld [vmem:[#allocation2 + $0x630] sm:$0xff] }
 0xb81   : > { %2559 = vmatpush.bf16.msra.mxu0 %v5723_v3  ;;  %v5735_v3 = vld [vmem:[#allocation2 + $0x690] sm:$0xff] }
 0xb82   : > { %v2121_v7 = vpack.c.bf16 %v2118_v6, %v2117_v5  ;;  %v5722_v5 = vld [vmem:[#allocation2 + $0x628] sm:$0xff] }
 0xb84   : > { %2198 = vmatmul.bf16.vlgmr.msrb.gmra.mxu0 %v2121_v7 }
 0xb85   : > { %v2112_v9 = vpop.f32.mrf.mxu3  ;;  %2560 = vmatpush.bf16.msra.mxu0 %v5722_v5  ;;  %v5733_v5 = vld [vmem:[#allocation2 + $0x680] sm:$0xff] }
 0xb86   : > { %v2113_v10 = vadd.f32 %v5931_v63, %v2112_v9  ;;  %v5721_v9 = vld [vmem:[#allocation2 + $0x620] sm:$0xff] }
 0xb88   : > { %v2119_v13 = vmax.f32 %v2113_v10, 0.0 }
 0xb89   : > { %2561 = vmatpush.bf16.msra.mxu0 %v5721_v9  ;;  %v5937_v9 = vld [vmem:[#allocation5 + $0x19] ss:$0 sm:$0xff] }
 0xb8d   : > { %v2114_v11 = vpop.f32.mrf.mxu3 }
 0xb8e   : > { %v2115_v12 = vadd.f32 %v5931_v63, %v2114_v11  ;;  %v5710_v63 = vld [vmem:[#allocation2 + $0x5c8] sm:$0xff] }
 0xb8f   : > { %2472 = vmatpush.bf16.msrb.mxu3 %v5710_v63 }
 0xb90   : > { %v2120_v14 = vmax.f32 %v2115_v12, 0.0 }
 0xb92   : > { %v2122_v15 = vpack.c.bf16 %v2120_v14, %v2119_v13  ;;  %v5720_v13 = vld [vmem:[#allocation2 + $0x618] sm:$0xff] }
 0xb93   : > { %2473 = vmatpush.bf16.msrb.mxu3 %v5709_v0  ;;  %2562 = vmatpush.bf16.msra.mxu0 %v5720_v13 }
 0xb94   : > { %2203 = vmatmul.bf16.gmra.mxu0 %v2122_v15 }
 0xb97   : > { %2563 = vmatpush.bf16.msra.mxu0 %v5719_v21 }
 0xc01   : > { %v2199_v20 = vpop.f32.mrf.mxu0 }
 0xc02   : > { %v2200_v24 = vadd.f32 %v5932_v22, %v2199_v20 }
 0xc04   : > { %v2209_v28 = vmax.f32 %v2200_v24, 0.0  ;;  %v5732_v24 = vld [vmem:[#allocation2 + $0x678] sm:$0xff] }
 0xc05   : > { %2650 = vmatpush.bf16.msra.mxu1 %v5732_v24 }
 0xc09   : > { %v2201_v25 = vpop.f32.mrf.mxu0 }
 0xc0a   : > { %v2202_v26 = vadd.f32 %v5932_v22, %v2201_v25 }
 0xc0c   : > { %v2210_v29 = vmax.f32 %v2202_v26, 0.0  ;;  %v5731_v26 = vld [vmem:[#allocation2 + $0x670] sm:$0xff] }
 0xc0d   : > { %2651 = vmatpush.bf16.msra.mxu1 %v5731_v26  ;;  %v5743_v26 = vld [vmem:[#allocation2 + $0x6d0] sm:$0xff] }
 0xc0e   : > { %v2213_v30 = vpack.c.bf16 %v2210_v29, %v2209_v28  ;;  %v5730_v28 = vld [vmem:[#allocation2 + $0x668] sm:$0xff] }
 0xc10   : > { %2290 = vmatmul.bf16.vlgmr.msrb.gmra.mxu1 %v2213_v30 }
 0xc11   : > { %v2204_v32 = vpop.f32.mrf.mxu0  ;;  %2652 = vmatpush.bf16.msra.mxu1 %v5730_v28  ;;  %v5741_v28 = vld [vmem:[#allocation2 + $0x6c0] sm:$0xff] }
 0xc12   : > { %v2205_v33 = vadd.f32 %v5932_v22, %v2204_v32  ;;  %v5729_v32 = vld [vmem:[#allocation2 + $0x660] sm:$0xff] }
 0xc14   : > { %v2211_v36 = vmax.f32 %v2205_v33, 0.0 }
 0xc15   : > { %2653 = vmatpush.bf16.msra.mxu1 %v5729_v32  ;;  %v5938_v32 = vld [vmem:[#allocation5 + $0x1a] ss:$0 sm:$0xff] }
 0xc19   : > { %v2206_v34 = vpop.f32.mrf.mxu0 }
 0xc1a   : > { %v2207_v35 = vadd.f32 %v5932_v22, %v2206_v34  ;;  %v5718_v22 = vld [vmem:[#allocation2 + $0x608] sm:$0xff] }
 0xc1b   : > { %2564 = vmatpush.bf16.msra.mxu0 %v5718_v22 }
 0xc1c   : > { %v2212_v37 = vmax.f32 %v2207_v35, 0.0 }
 0xc1e   : > { %v2214_v38 = vpack.c.bf16 %v2212_v37, %v2211_v36  ;;  %v5728_v36 = vld [vmem:[#allocation2 + $0x658] sm:$0xff] }
 0xc1f   : > { %2565 = vmatpush.bf16.msra.mxu0 %v5717_v23  ;;  %2654 = vmatpush.bf16.msra.mxu1 %v5728_v36 }
 0xc20   : > { %2295 = vmatmul.bf16.gmra.mxu1 %v2214_v38 }
 0xc23   : > { %2655 = vmatpush.bf16.msra.mxu1 %v5727_v44 }
 0xc8d   : > { %v2291_v43 = vpop.f32.mrf.mxu1 }
 0xc8e   : > { %v2292_v47 = vadd.f32 %v5933_v45, %v2291_v43 }
 0xc90   : > { %v2301_v51 = vmax.f32 %v2292_v47, 0.0  ;;  %v5740_v47 = vld [vmem:[#allocation2 + $0x6b8] sm:$0xff] }
 0xc91   : > { %2742 = vmatpush.bf16.msra.mxu2 %v5740_v47 }
 0xc95   : > { %v2293_v48 = vpop.f32.mrf.mxu1 }
 0xc96   : > { %v2294_v49 = vadd.f32 %v5933_v45, %v2293_v48 }
 0xc98   : > { %v2302_v52 = vmax.f32 %v2294_v49, 0.0  ;;  %v5739_v49 = vld [vmem:[#allocation2 + $0x6b0] sm:$0xff] }
 0xc99   : > { %2743 = vmatpush.bf16.msra.mxu2 %v5739_v49  ;;  %v5751_v49 = vld [vmem:[#allocation2 + $0x710] sm:$0xff] }
 0xc9a   : > { %v2305_v53 = vpack.c.bf16 %v2302_v52, %v2301_v51  ;;  %v5738_v51 = vld [vmem:[#allocation2 + $0x6a8] sm:$0xff] }
 0xc9c   : > { %2382 = vmatmul.bf16.vlgmr.msrb.gmra.mxu2 %v2305_v53 }
 0xc9d   : > { %v2296_v55 = vpop.f32.mrf.mxu1  ;;  %2744 = vmatpush.bf16.msra.mxu2 %v5738_v51  ;;  %v5749_v51 = vld [vmem:[#allocation2 + $0x700] sm:$0xff] }
 0xc9e   : > { %v2297_v56 = vadd.f32 %v5933_v45, %v2296_v55  ;;  %v5737_v55 = vld [vmem:[#allocation2 + $0x6a0] sm:$0xff] }
 0xca0   : > { %v2303_v59 = vmax.f32 %v2297_v56, 0.0 }
 0xca1   : > { %2745 = vmatpush.bf16.msra.mxu2 %v5737_v55  ;;  %v5939_v55 = vld [vmem:[#allocation5 + $0x1b] ss:$0 sm:$0xff] }
 0xca5   : > { %v2298_v57 = vpop.f32.mrf.mxu1 }
 0xca6   : > { %v2299_v58 = vadd.f32 %v5933_v45, %v2298_v57  ;;  %v5726_v45 = vld [vmem:[#allocation2 + $0x648] sm:$0xff] }
 0xca7   : > { %2656 = vmatpush.bf16.msra.mxu1 %v5726_v45 }
 0xca8   : > { %v2304_v60 = vmax.f32 %v2299_v58, 0.0 }
 0xcaa   : > { %v2306_v61 = vpack.c.bf16 %v2304_v60, %v2303_v59  ;;  %v5736_v59 = vld [vmem:[#allocation2 + $0x698] sm:$0xff] }
 0xcab   : > { %2657 = vmatpush.bf16.msra.mxu1 %v5725_v46  ;;  %2746 = vmatpush.bf16.msra.mxu2 %v5736_v59 }
 0xcac   : > { %2387 = vmatmul.bf16.gmra.mxu2 %v2306_v61 }
 0xcaf   : > { %2747 = vmatpush.bf16.msra.mxu2 %v5735_v3 }
 0xd1f   : > { %v2383_v2 = vpop.f32.mrf.mxu2 }
 0xd20   : > { %v2384_v6 = vadd.f32 %v5934_v4, %v2383_v2 }
 0xd22   : > { %v2393_v10 = vmax.f32 %v2384_v6, 0.0  ;;  %v5748_v6 = vld [vmem:[#allocation2 + $0x6f8] sm:$0xff] }
 0xd23   : > { %2834 = vmatpush.bf16.msra.mxu3 %v5748_v6 }
 0xd27   : > { %v2385_v7 = vpop.f32.mrf.mxu2 }
 0xd28   : > { %v2386_v8 = vadd.f32 %v5934_v4, %v2385_v7 }
 0xd2a   : > { %v2394_v11 = vmax.f32 %v2386_v8, 0.0  ;;  %v5747_v8 = vld [vmem:[#allocation2 + $0x6f0] sm:$0xff] }
 0xd2b   : > { %2835 = vmatpush.bf16.msra.mxu3 %v5747_v8  ;;  %v5759_v8 = vld [vmem:[#allocation2 + $0x750] sm:$0xff] }
 0xd2c   : > { %v2397_v12 = vpack.c.bf16 %v2394_v11, %v2393_v10  ;;  %v5746_v10 = vld [vmem:[#allocation2 + $0x6e8] sm:$0xff] }
 0xd2e   : > { %2474 = vmatmul.bf16.vlgmr.msrb.gmra.mxu3 %v2397_v12 }
 0xd2f   : > { %v2388_v14 = vpop.f32.mrf.mxu2  ;;  %2836 = vmatpush.bf16.msra.mxu3 %v5746_v10  ;;  %v5757_v10 = vld [vmem:[#allocation2 + $0x740] sm:$0xff] }
 0xd30   : > { %v2389_v15 = vadd.f32 %v5934_v4, %v2388_v14  ;;  %v5745_v14 = vld [vmem:[#allocation2 + $0x6e0] sm:$0xff] }
 0xd32   : > { %v2395_v18 = vmax.f32 %v2389_v15, 0.0 }
 0xd33   : > { %2837 = vmatpush.bf16.msra.mxu3 %v5745_v14  ;;  %v5940_v14 = vld [vmem:[#allocation5 + $0x1c] ss:$0 sm:$0xff] }
 0xd37   : > { %v2390_v16 = vpop.f32.mrf.mxu2 }
 0xd38   : > { %v2391_v17 = vadd.f32 %v5934_v4, %v2390_v16  ;;  %v5734_v4 = vld [vmem:[#allocation2 + $0x688] sm:$0xff] }
 0xd39   : > { %2748 = vmatpush.bf16.msra.mxu2 %v5734_v4 }
 0xd3a   : > { %v2396_v19 = vmax.f32 %v2391_v17, 0.0 }
 0xd3c   : > { %v2398_v20 = vpack.c.bf16 %v2396_v19, %v2395_v18  ;;  %v5744_v18 = vld [vmem:[#allocation2 + $0x6d8] sm:$0xff] }
 0xd3d   : > { %2749 = vmatpush.bf16.msra.mxu2 %v5733_v5  ;;  %2838 = vmatpush.bf16.msra.mxu3 %v5744_v18 }
 0xd3e   : > { %2479 = vmatmul.bf16.gmra.mxu3 %v2398_v20 }
 0xd41   : > { %2839 = vmatpush.bf16.msra.mxu3 %v5743_v26 }
 0xdb1   : > { %v2475_v25 = vpop.f32.mrf.mxu3 }
 0xdb2   : > { %v2476_v29 = vadd.f32 %v5935_v27, %v2475_v25 }
 0xdb4   : > { %v2485_v33 = vmax.f32 %v2476_v29, 0.0  ;;  %v5756_v29 = vld [vmem:[#allocation2 + $0x738] sm:$0xff] }
 0xdb5   : > { %2926 = vmatpush.bf16.msrb.mxu0 %v5756_v29 }
 0xdb9   : > { %v2477_v30 = vpop.f32.mrf.mxu3 }
 0xdba   : > { %v2478_v31 = vadd.f32 %v5935_v27, %v2477_v30 }
 0xdbc   : > { %v2486_v34 = vmax.f32 %v2478_v31, 0.0  ;;  %v5755_v31 = vld [vmem:[#allocation2 + $0x730] sm:$0xff] }
 0xdbd   : > { %2927 = vmatpush.bf16.msrb.mxu0 %v5755_v31  ;;  %v5767_v31 = vld [vmem:[#allocation2 + $0x790] sm:$0xff] }
 0xdbe   : > { %v2489_v35 = vpack.c.bf16 %v2486_v34, %v2485_v33  ;;  %v5754_v33 = vld [vmem:[#allocation2 + $0x728] sm:$0xff] }
 0xdc0   : > { %2566 = vmatmul.bf16.vlgmr.msra.gmra.mxu0 %v2489_v35 }
 0xdc1   : > { %v2480_v37 = vpop.f32.mrf.mxu3  ;;  %2928 = vmatpush.bf16.msrb.mxu0 %v5754_v33  ;;  %v5765_v33 = vld [vmem:[#allocation2 + $0x780] sm:$0xff] }
 0xdc2   : > { %v2481_v38 = vadd.f32 %v5935_v27, %v2480_v37  ;;  %v5753_v37 = vld [vmem:[#allocation2 + $0x720] sm:$0xff] }
 0xdc4   : > { %v2487_v41 = vmax.f32 %v2481_v38, 0.0 }
 0xdc5   : > { %2929 = vmatpush.bf16.msrb.mxu0 %v5753_v37  ;;  %v5941_v37 = vld [vmem:[#allocation5 + $0x1d] ss:$0 sm:$0xff] }
 0xdc9   : > { %v2482_v39 = vpop.f32.mrf.mxu3 }
 0xdca   : > { %v2483_v40 = vadd.f32 %v5935_v27, %v2482_v39  ;;  %v5742_v27 = vld [vmem:[#allocation2 + $0x6c8] sm:$0xff] }
 0xdcb   : > { %2840 = vmatpush.bf16.msra.mxu3 %v5742_v27 }
 0xdcc   : > { %v2488_v42 = vmax.f32 %v2483_v40, 0.0 }
 0xdce   : > { %v2490_v43 = vpack.c.bf16 %v2488_v42, %v2487_v41  ;;  %v5752_v41 = vld [vmem:[#allocation2 + $0x718] sm:$0xff] }
 0xdcf   : > { %2841 = vmatpush.bf16.msra.mxu3 %v5741_v28  ;;  %2930 = vmatpush.bf16.msrb.mxu0 %v5752_v41 }
 0xdd0   : > { %2571 = vmatmul.bf16.gmra.mxu0 %v2490_v43 }
 0xdd3   : > { %2931 = vmatpush.bf16.msrb.mxu0 %v5751_v49 }
 0xe3d   : > { %v2567_v48 = vpop.f32.mrf.mxu0 }
 0xe3e   : > { %v2568_v52 = vadd.f32 %v5936_v50, %v2567_v48 }
 0xe40   : > { %v2577_v56 = vmax.f32 %v2568_v52, 0.0  ;;  %v5764_v52 = vld [vmem:[#allocation2 + $0x778] sm:$0xff] }
 0xe41   : > { %3018 = vmatpush.bf16.msrb.mxu1 %v5764_v52 }
 0xe45   : > { %v2569_v53 = vpop.f32.mrf.mxu0 }
 0xe46   : > { %v2570_v54 = vadd.f32 %v5936_v50, %v2569_v53 }
 0xe48   : > { %v2578_v57 = vmax.f32 %v2570_v54, 0.0  ;;  %v5763_v54 = vld [vmem:[#allocation2 + $0x770] sm:$0xff] }
 0xe49   : > { %3019 = vmatpush.bf16.msrb.mxu1 %v5763_v54  ;;  %v5775_v54 = vld [vmem:[#allocation2 + $0x7d0] sm:$0xff] }
 0xe4a   : > { %v2581_v58 = vpack.c.bf16 %v2578_v57, %v2577_v56  ;;  %v5762_v56 = vld [vmem:[#allocation2 + $0x768] sm:$0xff] }
 0xe4c   : > { %2658 = vmatmul.bf16.vlgmr.msra.gmra.mxu1 %v2581_v58 }
 0xe4d   : > { %v2572_v60 = vpop.f32.mrf.mxu0  ;;  %3020 = vmatpush.bf16.msrb.mxu1 %v5762_v56  ;;  %v5773_v56 = vld [vmem:[#allocation2 + $0x7c0] sm:$0xff] }
 0xe4e   : > { %v2573_v61 = vadd.f32 %v5936_v50, %v2572_v60  ;;  %v5761_v60 = vld [vmem:[#allocation2 + $0x760] sm:$0xff] }
 0xe50   : > { %v2579_v0 = vmax.f32 %v2573_v61, 0.0 }
 0xe51   : > { %3021 = vmatpush.bf16.msrb.mxu1 %v5761_v60  ;;  %v5942_v60 = vld [vmem:[#allocation5 + $0x1e] ss:$0 sm:$0xff] }
 0xe55   : > { %v2574_v62 = vpop.f32.mrf.mxu0 }
 0xe56   : > { %v2575_v63 = vadd.f32 %v5936_v50, %v2574_v62  ;;  %v5750_v50 = vld [vmem:[#allocation2 + $0x708] sm:$0xff] }
 0xe57   : > { %2932 = vmatpush.bf16.msrb.mxu0 %v5750_v50 }
 0xe58   : > { %v2580_v1 = vmax.f32 %v2575_v63, 0.0 }
 0xe5a   : > { %v2582_v2 = vpack.c.bf16 %v2580_v1, %v2579_v0  ;;  %v5760_v0 = vld [vmem:[#allocation2 + $0x758] sm:$0xff] }
 0xe5b   : > { %2933 = vmatpush.bf16.msrb.mxu0 %v5749_v51  ;;  %3022 = vmatpush.bf16.msrb.mxu1 %v5760_v0 }
 0xe5c   : > { %2663 = vmatmul.bf16.gmra.mxu1 %v2582_v2 }
 0xe5f   : > { %3023 = vmatpush.bf16.msrb.mxu1 %v5759_v8 }
 0xec9   : > { %v2659_v7 = vpop.f32.mrf.mxu1 }
 0xeca   : > { %v2660_v11 = vadd.f32 %v5937_v9, %v2659_v7 }
 0xecc   : > { %v2669_v15 = vmax.f32 %v2660_v11, 0.0  ;;  %v5772_v11 = vld [vmem:[#allocation2 + $0x7b8] sm:$0xff] }
 0xecd   : > { %3110 = vmatpush.bf16.msrb.mxu2 %v5772_v11 }
 0xed1   : > { %v2661_v12 = vpop.f32.mrf.mxu1 }
 0xed2   : > { %v2662_v13 = vadd.f32 %v5937_v9, %v2661_v12 }
 0xed4   : > { %v2670_v16 = vmax.f32 %v2662_v13, 0.0  ;;  %v5771_v13 = vld [vmem:[#allocation2 + $0x7b0] sm:$0xff] }
 0xed5   : > { %3111 = vmatpush.bf16.msrb.mxu2 %v5771_v13  ;;  %v5783_v13 = vld [vmem:[#allocation2 + $0x810] sm:$0xff] }
 0xed6   : > { %v2673_v17 = vpack.c.bf16 %v2670_v16, %v2669_v15  ;;  %v5770_v15 = vld [vmem:[#allocation2 + $0x7a8] sm:$0xff] }
 0xed8   : > { %2750 = vmatmul.bf16.vlgmr.msra.gmra.mxu2 %v2673_v17 }
 0xed9   : > { %v2664_v19 = vpop.f32.mrf.mxu1  ;;  %3112 = vmatpush.bf16.msrb.mxu2 %v5770_v15  ;;  %v5781_v15 = vld [vmem:[#allocation2 + $0x800] sm:$0xff] }
 0xeda   : > { %v2665_v20 = vadd.f32 %v5937_v9, %v2664_v19  ;;  %v5769_v19 = vld [vmem:[#allocation2 + $0x7a0] sm:$0xff] }
 0xedc   : > { %v2671_v23 = vmax.f32 %v2665_v20, 0.0 }
 0xedd   : > { %3113 = vmatpush.bf16.msrb.mxu2 %v5769_v19  ;;  %v5943_v19 = vld [vmem:[#allocation5 + $0x1f] ss:$0 sm:$0xff] }
 0xee1   : > { %v2666_v21 = vpop.f32.mrf.mxu1 }
 0xee2   : > { %v2667_v22 = vadd.f32 %v5937_v9, %v2666_v21  ;;  %v5758_v9 = vld [vmem:[#allocation2 + $0x748] sm:$0xff] }
 0xee3   : > { %3024 = vmatpush.bf16.msrb.mxu1 %v5758_v9 }
 0xee4   : > { %v2672_v24 = vmax.f32 %v2667_v22, 0.0 }
 0xee6   : > { %v2674_v25 = vpack.c.bf16 %v2672_v24, %v2671_v23  ;;  %v5768_v23 = vld [vmem:[#allocation2 + $0x798] sm:$0xff] }
 0xee7   : > { %3025 = vmatpush.bf16.msrb.mxu1 %v5757_v10  ;;  %3114 = vmatpush.bf16.msrb.mxu2 %v5768_v23 }
 0xee8   : > { %2755 = vmatmul.bf16.gmra.mxu2 %v2674_v25 }
 0xeeb   : > { %3115 = vmatpush.bf16.msrb.mxu2 %v5767_v31 }
 0xf5b   : > { %v2751_v30 = vpop.f32.mrf.mxu2 }
 0xf5c   : > { %v2752_v34 = vadd.f32 %v5938_v32, %v2751_v30 }
 0xf5e   : > { %v2761_v38 = vmax.f32 %v2752_v34, 0.0  ;;  %v5780_v34 = vld [vmem:[#allocation2 + $0x7f8] sm:$0xff] }
 0xf5f   : > { %3202 = vmatpush.bf16.msrb.mxu3 %v5780_v34 }
 0xf63   : > { %v2753_v35 = vpop.f32.mrf.mxu2 }
 0xf64   : > { %v2754_v36 = vadd.f32 %v5938_v32, %v2753_v35 }
 0xf66   : > { %v2762_v39 = vmax.f32 %v2754_v36, 0.0  ;;  %v5779_v36 = vld [vmem:[#allocation2 + $0x7f0] sm:$0xff] }
 0xf67   : > { %3203 = vmatpush.bf16.msrb.mxu3 %v5779_v36  ;;  %v5791_v36 = vld [vmem:[#allocation2 + $0x850] sm:$0xff] }
 0xf68   : > { %v2765_v40 = vpack.c.bf16 %v2762_v39, %v2761_v38  ;;  %v5778_v38 = vld [vmem:[#allocation2 + $0x7e8] sm:$0xff] }
 0xf6a   : > { %2842 = vmatmul.bf16.vlgmr.msra.gmra.mxu3 %v2765_v40 }
 0xf6b   : > { %v2756_v42 = vpop.f32.mrf.mxu2  ;;  %3204 = vmatpush.bf16.msrb.mxu3 %v5778_v38  ;;  %v5789_v38 = vld [vmem:[#allocation2 + $0x840] sm:$0xff] }
 0xf6c   : > { %v2757_v43 = vadd.f32 %v5938_v32, %v2756_v42  ;;  %v5777_v42 = vld [vmem:[#allocation2 + $0x7e0] sm:$0xff] }
 0xf6e   : > { %v2763_v46 = vmax.f32 %v2757_v43, 0.0 }
 0xf6f   : > { %3205 = vmatpush.bf16.msrb.mxu3 %v5777_v42  ;;  %v5944_v42 = vld [vmem:[#allocation5 + $0x20] ss:$0 sm:$0xff] }
 0xf73   : > { %v2758_v44 = vpop.f32.mrf.mxu2 }
 0xf74   : > { %v2759_v45 = vadd.f32 %v5938_v32, %v2758_v44  ;;  %v5766_v32 = vld [vmem:[#allocation2 + $0x788] sm:$0xff] }
 0xf75   : > { %3116 = vmatpush.bf16.msrb.mxu2 %v5766_v32 }
 0xf76   : > { %v2764_v47 = vmax.f32 %v2759_v45, 0.0 }
 0xf78   : > { %v2766_v48 = vpack.c.bf16 %v2764_v47, %v2763_v46  ;;  %v5776_v46 = vld [vmem:[#allocation2 + $0x7d8] sm:$0xff] }
 0xf79   : > { %3117 = vmatpush.bf16.msrb.mxu2 %v5765_v33  ;;  %3206 = vmatpush.bf16.msrb.mxu3 %v5776_v46 }
 0xf7a   : > { %2847 = vmatmul.bf16.gmra.mxu3 %v2766_v48 }
 0xf7d   : > { %3207 = vmatpush.bf16.msrb.mxu3 %v5775_v54 }
 0xfed   : > { %v2843_v53 = vpop.f32.mrf.mxu3 }
 0xfee   : > { %v2844_v57 = vadd.f32 %v5939_v55, %v2843_v53 }
 0xff0   : > { %v2853_v61 = vmax.f32 %v2844_v57, 0.0  ;;  %v5788_v57 = vld [vmem:[#allocation2 + $0x838] sm:$0xff] }
 0xff1   : > { %3294 = vmatpush.bf16.msra.mxu0 %v5788_v57 }
 0xff5   : > { %v2845_v58 = vpop.f32.mrf.mxu3 }
 0xff6   : > { %v2846_v59 = vadd.f32 %v5939_v55, %v2845_v58 }
 0xff8   : > { %v2854_v62 = vmax.f32 %v2846_v59, 0.0  ;;  %v5787_v59 = vld [vmem:[#allocation2 + $0x830] sm:$0xff] }
 0xff9   : > { %3295 = vmatpush.bf16.msra.mxu0 %v5787_v59  ;;  %v5799_v59 = vld [vmem:[#allocation2 + $0x890] sm:$0xff] }
 0xffa   : > { %v2857_v63 = vpack.c.bf16 %v2854_v62, %v2853_v61  ;;  %v5786_v61 = vld [vmem:[#allocation2 + $0x828] sm:$0xff] }
 0xffc   : > { %2934 = vmatmul.bf16.vlgmr.msrb.gmra.mxu0 %v2857_v63 }
 0xffd   : > { %v2848_v1 = vpop.f32.mrf.mxu3  ;;  %3296 = vmatpush.bf16.msra.mxu0 %v5786_v61  ;;  %v5797_v61 = vld [vmem:[#allocation2 + $0x880] sm:$0xff] }
 0xffe   : > { %v2849_v2 = vadd.f32 %v5939_v55, %v2848_v1  ;;  %v5785_v1 = vld [vmem:[#allocation2 + $0x820] sm:$0xff] }
0x1000   : > { %v2855_v5 = vmax.f32 %v2849_v2, 0.0 }
0x1001   : > { %3297 = vmatpush.bf16.msra.mxu0 %v5785_v1  ;;  %v5945_v1 = vld [vmem:[#allocation5 + $0x21] ss:$0 sm:$0xff] }
0x1005   : > { %v2850_v3 = vpop.f32.mrf.mxu3 }
0x1006   : > { %v2851_v4 = vadd.f32 %v5939_v55, %v2850_v3  ;;  %v5774_v55 = vld [vmem:[#allocation2 + $0x7c8] sm:$0xff] }
0x1007   : > { %3208 = vmatpush.bf16.msrb.mxu3 %v5774_v55 }
0x1008   : > { %v2856_v6 = vmax.f32 %v2851_v4, 0.0 }
0x100a   : > { %v2858_v7 = vpack.c.bf16 %v2856_v6, %v2855_v5  ;;  %v5784_v5 = vld [vmem:[#allocation2 + $0x818] sm:$0xff] }
0x100b   : > { %3209 = vmatpush.bf16.msrb.mxu3 %v5773_v56  ;;  %3298 = vmatpush.bf16.msra.mxu0 %v5784_v5 }
0x100c   : > { %2939 = vmatmul.bf16.gmra.mxu0 %v2858_v7 }
0x100f   : > { %3299 = vmatpush.bf16.msra.mxu0 %v5783_v13 }
0x1079   : > { %v2935_v12 = vpop.f32.mrf.mxu0 }
0x107a   : > { %v2936_v16 = vadd.f32 %v5940_v14, %v2935_v12 }
0x107c   : > { %v2945_v20 = vmax.f32 %v2936_v16, 0.0  ;;  %v5796_v16 = vld [vmem:[#allocation2 + $0x878] sm:$0xff] }
0x107d   : > { %3386 = vmatpush.bf16.msra.mxu1 %v5796_v16 }
0x1081   : > { %v2937_v17 = vpop.f32.mrf.mxu0 }
0x1082   : > { %v2938_v18 = vadd.f32 %v5940_v14, %v2937_v17 }
0x1084   : > { %v2946_v21 = vmax.f32 %v2938_v18, 0.0  ;;  %v5795_v18 = vld [vmem:[#allocation2 + $0x870] sm:$0xff] }
0x1085   : > { %3387 = vmatpush.bf16.msra.mxu1 %v5795_v18  ;;  %v5807_v18 = vld [vmem:[#allocation2 + $0x8d0] sm:$0xff] }
0x1086   : > { %v2949_v22 = vpack.c.bf16 %v2946_v21, %v2945_v20  ;;  %v5794_v20 = vld [vmem:[#allocation2 + $0x868] sm:$0xff] }
0x1088   : > { %3026 = vmatmul.bf16.vlgmr.msrb.gmra.mxu1 %v2949_v22 }
0x1089   : > { %v2940_v24 = vpop.f32.mrf.mxu0  ;;  %3388 = vmatpush.bf16.msra.mxu1 %v5794_v20  ;;  %v5805_v20 = vld [vmem:[#allocation2 + $0x8c0] sm:$0xff] }
0x108a   : > { %v2941_v25 = vadd.f32 %v5940_v14, %v2940_v24  ;;  %v5793_v24 = vld [vmem:[#allocation2 + $0x860] sm:$0xff] }
0x108c   : > { %v2947_v28 = vmax.f32 %v2941_v25, 0.0 }
0x108d   : > { %3389 = vmatpush.bf16.msra.mxu1 %v5793_v24  ;;  %v5946_v24 = vld [vmem:[#allocation5 + $0x22] ss:$0 sm:$0xff] }
0x1091   : > { %v2942_v26 = vpop.f32.mrf.mxu0 }
0x1092   : > { %v2943_v27 = vadd.f32 %v5940_v14, %v2942_v26  ;;  %v5782_v14 = vld [vmem:[#allocation2 + $0x808] sm:$0xff] }
0x1093   : > { %3300 = vmatpush.bf16.msra.mxu0 %v5782_v14 }
0x1094   : > { %v2948_v29 = vmax.f32 %v2943_v27, 0.0 }
0x1096   : > { %v2950_v30 = vpack.c.bf16 %v2948_v29, %v2947_v28  ;;  %v5792_v28 = vld [vmem:[#allocation2 + $0x858] sm:$0xff] }
0x1097   : > { %3301 = vmatpush.bf16.msra.mxu0 %v5781_v15  ;;  %3390 = vmatpush.bf16.msra.mxu1 %v5792_v28 }
0x1098   : > { %3031 = vmatmul.bf16.gmra.mxu1 %v2950_v30 }
0x109b   : > { %3391 = vmatpush.bf16.msra.mxu1 %v5791_v36 }
0x1105   : > { %v3027_v35 = vpop.f32.mrf.mxu1 }
0x1106   : > { %v3028_v39 = vadd.f32 %v5941_v37, %v3027_v35 }
0x1108   : > { %v3037_v43 = vmax.f32 %v3028_v39, 0.0  ;;  %v5804_v39 = vld [vmem:[#allocation2 + $0x8b8] sm:$0xff] }
0x1109   : > { %3478 = vmatpush.bf16.msra.mxu2 %v5804_v39 }
0x110d   : > { %v3029_v40 = vpop.f32.mrf.mxu1 }
0x110e   : > { %v3030_v41 = vadd.f32 %v5941_v37, %v3029_v40 }
0x1110   : > { %v3038_v44 = vmax.f32 %v3030_v41, 0.0  ;;  %v5803_v41 = vld [vmem:[#allocation2 + $0x8b0] sm:$0xff] }
0x1111   : > { %3479 = vmatpush.bf16.msra.mxu2 %v5803_v41  ;;  %v5815_v41 = vld [vmem:[#allocation2 + $0x910] sm:$0xff] }
0x1112   : > { %v3041_v45 = vpack.c.bf16 %v3038_v44, %v3037_v43  ;;  %v5802_v43 = vld [vmem:[#allocation2 + $0x8a8] sm:$0xff] }
0x1114   : > { %3118 = vmatmul.bf16.vlgmr.msrb.gmra.mxu2 %v3041_v45 }
0x1115   : > { %v3032_v47 = vpop.f32.mrf.mxu1  ;;  %3480 = vmatpush.bf16.msra.mxu2 %v5802_v43  ;;  %v5813_v43 = vld [vmem:[#allocation2 + $0x900] sm:$0xff] }
0x1116   : > { %v3033_v48 = vadd.f32 %v5941_v37, %v3032_v47  ;;  %v5801_v47 = vld [vmem:[#allocation2 + $0x8a0] sm:$0xff] }
0x1118   : > { %v3039_v51 = vmax.f32 %v3033_v48, 0.0 }
0x1119   : > { %3481 = vmatpush.bf16.msra.mxu2 %v5801_v47 }
0x111d   : > { %v3034_v49 = vpop.f32.mrf.mxu1 }
0x111e   : > { %v3035_v50 = vadd.f32 %v5941_v37, %v3034_v49  ;;  %v5790_v37 = vld [vmem:[#allocation2 + $0x848] sm:$0xff] }
0x111f   : > { %3392 = vmatpush.bf16.msra.mxu1 %v5790_v37 }
0x1120   : > { %v3040_v52 = vmax.f32 %v3035_v50, 0.0 }
0x1122   : > { %v3042_v53 = vpack.c.bf16 %v3040_v52, %v3039_v51  ;;  %v5800_v51 = vld [vmem:[#allocation2 + $0x898] sm:$0xff] }
0x1123   : > { %3393 = vmatpush.bf16.msra.mxu1 %v5789_v38  ;;  %3482 = vmatpush.bf16.msra.mxu2 %v5800_v51 }
0x1124   : > { %3123 = vmatmul.bf16.gmra.mxu2 %v3042_v53 }
0x1127   : > { %3483 = vmatpush.bf16.msra.mxu2 %v5799_v59  ;;  %v5828_v59 = vld [vmem:[#allocation2 + $0x978] sm:$0xff] }
0x1128   : > { %3830 = vmatpush.bf16.msrb.mxu1 %v5828_v59 }
0x1197   : > { %v3119_v58 = vpop.f32.mrf.mxu2 }
0x1198   : > { %v3120_v62 = vadd.f32 %v5942_v60, %v3119_v58 }
0x119a   : > { %v3129_v2 = vmax.f32 %v3120_v62, 0.0  ;;  %v5812_v62 = vld [vmem:[#allocation2 + $0x8f8] sm:$0xff] }
0x119b   : > { %3570 = vmatpush.bf16.msra.mxu3 %v5812_v62  ;;  %v5825_v62 = vld [vmem:[#allocation2 + $0x960] sm:$0xff] }
0x119f   : > { %v3121_v63 = vpop.f32.mrf.mxu2 }
0x11a0   : > { %v3122_v0 = vadd.f32 %v5942_v60, %v3121_v63 }
0x11a2   : > { %v3130_v3 = vmax.f32 %v3122_v0, 0.0  ;;  %v5811_v0 = vld [vmem:[#allocation2 + $0x8f0] sm:$0xff] }
0x11a3   : > { %3571 = vmatpush.bf16.msra.mxu3 %v5811_v0  ;;  %v5948_v0 = vld [vmem:[#allocation5 + $0x24] ss:$0 sm:$0xff] }
0x11a4   : > { %v3133_v4 = vpack.c.bf16 %v3130_v3, %v3129_v2  ;;  %v5810_v2 = vld [vmem:[#allocation2 + $0x8e8] sm:$0xff] }
0x11a6   : > { %3210 = vmatmul.bf16.vlgmr.msrb.gmra.mxu3 %v3133_v4 }
0x11a7   : > { %v3124_v6 = vpop.f32.mrf.mxu2  ;;  %3572 = vmatpush.bf16.msra.mxu3 %v5810_v2 }
0x11a8   : > { %v3125_v7 = vadd.f32 %v5942_v60, %v3124_v6  ;;  %v5809_v6 = vld [vmem:[#allocation2 + $0x8e0] sm:$0xff] }
0x11aa   : > { %v3131_v10 = vmax.f32 %v3125_v7, 0.0 }
0x11ab   : > { %3573 = vmatpush.bf16.msra.mxu3 %v5809_v6 }
0x11af   : > { %v3126_v8 = vpop.f32.mrf.mxu2 }
0x11b0   : > { %v3127_v9 = vadd.f32 %v5942_v60, %v3126_v8  ;;  %v5798_v60 = vld [vmem:[#allocation2 + $0x888] sm:$0xff] }
0x11b1   : > { %3484 = vmatpush.bf16.msra.mxu2 %v5798_v60  ;;  %v5827_v60 = vld [vmem:[#allocation2 + $0x970] sm:$0xff] }
0x11b2   : > { %v3132_v11 = vmax.f32 %v3127_v9, 0.0  ;;  %3831 = vmatpush.bf16.msrb.mxu1 %v5827_v60 }
0x11b4   : > { %v3134_v12 = vpack.c.bf16 %v3132_v11, %v3131_v10  ;;  %v5808_v10 = vld [vmem:[#allocation2 + $0x8d8] sm:$0xff] }
0x11b5   : > { %3485 = vmatpush.bf16.msra.mxu2 %v5797_v61  ;;  %3574 = vmatpush.bf16.msra.mxu3 %v5808_v10  ;;  %v5826_v61 = vld [vmem:[#allocation2 + $0x968] sm:$0xff] }
0x11b6   : > { %3215 = vmatmul.bf16.gmra.mxu3 %v3134_v12  ;;  %3832 = vmatpush.bf16.msrb.mxu1 %v5826_v61 }
0x11b9   : > { %3575 = vmatpush.bf16.msra.mxu3 %v5807_v18 }
0x11ba   : > { %3833 = vmatpush.bf16.msrb.mxu1 %v5825_v62 }
0x1229   : > { %v3211_v17 = vpop.f32.mrf.mxu3 }
0x122a   : > { %v3212_v21 = vadd.f32 %v5943_v19, %v3211_v17 }
0x122c   : > { %v3221_v25 = vmax.f32 %v3212_v21, 0.0  ;;  %v5820_v21 = vld [vmem:[#allocation2 + $0x938] sm:$0xff] }
0x122d   : > { %3662 = vmatpush.bf16.msrb.mxu0 %v5820_v21 }
0x1231   : > { %v3213_v22 = vpop.f32.mrf.mxu3 }
0x1232   : > { %v3214_v23 = vadd.f32 %v5943_v19, %v3213_v22 }
0x1234   : > { %v3222_v26 = vmax.f32 %v3214_v23, 0.0  ;;  %v5819_v23 = vld [vmem:[#allocation2 + $0x930] sm:$0xff] }
0x1235   : > { %3663 = vmatpush.bf16.msrb.mxu0 %v5819_v23 }
0x1236   : > { %v3225_v27 = vpack.c.bf16 %v3222_v26, %v3221_v25  ;;  %v5818_v25 = vld [vmem:[#allocation2 + $0x928] sm:$0xff] }
0x1238   : > { %3302 = vmatmul.bf16.vlgmr.msra.gmra.mxu0 %v3225_v27 }
0x1239   : > { %v3216_v29 = vpop.f32.mrf.mxu3  ;;  %3664 = vmatpush.bf16.msrb.mxu0 %v5818_v25 }
0x123a   : > { %v3217_v30 = vadd.f32 %v5943_v19, %v3216_v29  ;;  %v5817_v29 = vld [vmem:[#allocation2 + $0x920] sm:$0xff] }
0x123c   : > { %v3223_v33 = vmax.f32 %v3217_v30, 0.0 }
0x123d   : > { %3665 = vmatpush.bf16.msrb.mxu0 %v5817_v29 }
0x1241   : > { %v3218_v31 = vpop.f32.mrf.mxu3 }
0x1242   : > { %v3219_v32 = vadd.f32 %v5943_v19, %v3218_v31  ;;  %v5806_v19 = vld [vmem:[#allocation2 + $0x8c8] sm:$0xff] }
0x1243   : > { %3576 = vmatpush.bf16.msra.mxu3 %v5806_v19 }
0x1244   : > { %v3224_v34 = vmax.f32 %v3219_v32, 0.0 }
0x1246   : > { %v3226_v35 = vpack.c.bf16 %v3224_v34, %v3223_v33  ;;  %v5816_v33 = vld [vmem:[#allocation2 + $0x918] sm:$0xff] }
0x1247   : > { %3577 = vmatpush.bf16.msra.mxu3 %v5805_v20  ;;  %3666 = vmatpush.bf16.msrb.mxu0 %v5816_v33 }
0x1248   : > { %3307 = vmatmul.bf16.gmra.mxu0 %v3226_v35 }
0x124b   : > { %3667 = vmatpush.bf16.msrb.mxu0 %v5815_v41 }
0x12b5   : > { %v3303_v40 = vpop.f32.mrf.mxu0 }
0x12b6   : > { %v3304_v44 = vadd.f32 %v5944_v42, %v3303_v40 }
0x12b8   : > { %v3313_v48 = vmax.f32 %v3304_v44, 0.0 }
0x12bd   : > { %v3305_v45 = vpop.f32.mrf.mxu0 }
0x12be   : > { %v3306_v46 = vadd.f32 %v5944_v42, %v3305_v45  ;;  %v5947_v45 = vld [vmem:[#allocation5 + $0x23] ss:$0 sm:$0xff] }
0x12c0   : > { %v3314_v49 = vmax.f32 %v3306_v46, 0.0 }
0x12c2   : > { %v3317_v50 = vpack.c.bf16 %v3314_v49, %v3313_v48 }
0x12c4   : > { %3394 = vmatmul.bf16.vlgmr.msra.gmra.mxu1 %v3317_v50 }
0x12c5   : > { %v3308_v52 = vpop.f32.mrf.mxu0 }
0x12c6   : > { %v3309_v53 = vadd.f32 %v5944_v42, %v3308_v52 }
0x12c8   : > { %v3315_v56 = vmax.f32 %v3309_v53, 0.0 }
0x12cd   : > { %v3310_v54 = vpop.f32.mrf.mxu0 }
0x12ce   : > { %v3311_v55 = vadd.f32 %v5944_v42, %v3310_v54  ;;  %v5814_v42 = vld [vmem:[#allocation2 + $0x908] sm:$0xff] }
0x12cf   : > { %3668 = vmatpush.bf16.msrb.mxu0 %v5814_v42 }
0x12d0   : > { %v3316_v57 = vmax.f32 %v3311_v55, 0.0 }
0x12d2   : > { %v3318_v58 = vpack.c.bf16 %v3316_v57, %v3315_v56 }
0x12d3   : > { %3669 = vmatpush.bf16.msrb.mxu0 %v5813_v43 }
0x12d4   : > { %3399 = vmatmul.bf16.gmra.mxu1 %v3318_v58 }
0x1341   : > { %v3395_v63 = vpop.f32.mrf.mxu1 }
0x1342   : > { %v3396_v3 = vadd.f32 %v5945_v1, %v3395_v63  ;;  %v5824_v63 = vld [vmem:[#allocation2 + $0x958] sm:$0xff] }
0x1343   : > { %3834 = vmatpush.bf16.msrb.mxu1 %v5824_v63 }
0x1344   : > { %v3405_v7 = vmax.f32 %v3396_v3, 0.0 }
0x1349   : > { %v3397_v4 = vpop.f32.mrf.mxu1 }
0x134a   : > { %v3398_v5 = vadd.f32 %v5945_v1, %v3397_v4 }
0x134c   : > { %v3406_v8 = vmax.f32 %v3398_v5, 0.0  ;;  %v5822_v5 = vld [vmem:[#allocation2 + $0x948] sm:$0xff] }
0x134e   : > { %v3409_v9 = vpack.c.bf16 %v3406_v8, %v3405_v7  ;;  %v5821_v7 = vld [vmem:[#allocation2 + $0x940] sm:$0xff] }
0x1350   : > { %3486 = vmatmul.bf16.vlgmr.msra.gmra.mxu2 %v3409_v9 }
0x1351   : > { %v3400_v11 = vpop.f32.mrf.mxu1 }
0x1352   : > { %v3401_v12 = vadd.f32 %v5945_v1, %v3400_v11 }
0x1354   : > { %v3407_v15 = vmax.f32 %v3401_v12, 0.0 }
0x1359   : > { %v3402_v13 = vpop.f32.mrf.mxu1 }
0x135a   : > { %v3403_v14 = vadd.f32 %v5945_v1, %v3402_v13  ;;  %v5823_v1 = vld [vmem:[#allocation2 + $0x950] sm:$0xff] }
0x135b   : > { %3835 = vmatpush.bf16.msrb.mxu1 %v5823_v1 }
0x135c   : > { %v3408_v16 = vmax.f32 %v3403_v14, 0.0 }
0x135e   : > { %v3410_v17 = vpack.c.bf16 %v3408_v16, %v3407_v15 }
0x135f   : > { %3836 = vmatpush.bf16.msrb.mxu1 %v5822_v5 }
0x1360   : > { %3491 = vmatmul.bf16.gmra.mxu2 %v3410_v17 }
0x1363   : > { %3837 = vmatpush.bf16.msrb.mxu1 %v5821_v7 }
0x13d3   : > { %v3487_v22 = vpop.f32.mrf.mxu2 }
0x13d4   : > { %v3488_v26 = vadd.f32 %v5946_v24, %v3487_v22 }
0x13d6   : > { %v3497_v30 = vmax.f32 %v3488_v26, 0.0  ;;  %v5836_v26 = vld [vmem:[#allocation2 + $0x9b8] sm:$0xff] }
0x13d7   : > { %3922 = vmatpush.bf16.msrb.mxu2 %v5836_v26 }
0x13db   : > { %v3489_v27 = vpop.f32.mrf.mxu2 }
0x13dc   : > { %v3490_v28 = vadd.f32 %v5946_v24, %v3489_v27 }
0x13de   : > { %v3498_v31 = vmax.f32 %v3490_v28, 0.0 }
0x13e0   : > { %v3501_v32 = vpack.c.bf16 %v3498_v31, %v3497_v30  ;;  %v5835_v30 = vld [vmem:[#allocation2 + $0x9b0] sm:$0xff] }
0x13e1   : > { %3923 = vmatpush.bf16.msrb.mxu2 %v5835_v30 }
0x13e2   : > { %3578 = vmatmul.bf16.vlgmr.msra.gmra.mxu3 %v3501_v32 }
0x13e3   : > { %v3492_v34 = vpop.f32.mrf.mxu2 }
0x13e4   : > { %v3493_v35 = vadd.f32 %v5946_v24, %v3492_v34 }
0x13e6   : > { %v3499_v38 = vmax.f32 %v3493_v35, 0.0 }
0x13eb   : > { %v3494_v36 = vpop.f32.mrf.mxu2 }
0x13ec   : > { %v3495_v37 = vadd.f32 %v5946_v24, %v3494_v36  ;;  %v5834_v36 = vld [vmem:[#allocation2 + $0x9a8] sm:$0xff] }
0x13ed   : > { %3924 = vmatpush.bf16.msrb.mxu2 %v5834_v36  ;;  %v5838_v36 = vld [vmem:[#allocation2 + $0x9c8] sm:$0xff] }
0x13ee   : > { %v3500_v39 = vmax.f32 %v3495_v37, 0.0 }
0x13f0   : > { %v3502_v40 = vpack.c.bf16 %v3500_v39, %v3499_v38 }
0x13f2   : > { %3583 = vmatmul.bf16.gmra.mxu3 %v3502_v40 }
0x1465   : > { %v3579_v44 = vpop.f32.mrf.mxu3 }
0x1466   : > { %v3580_v46 = vadd.f32 %v5947_v45, %v3579_v44 }
0x1468   : > { %v3589_v49 = vmax.f32 %v3580_v46, 0.0  ;;  %v5833_v46 = vld [vmem:[#allocation2 + $0x9a0] sm:$0xff] }
0x1469   : > { %3925 = vmatpush.bf16.msrb.mxu2 %v5833_v46 }
0x146d   : > { %v3581_v47 = vpop.f32.mrf.mxu3 }
0x146e   : > { %v3582_v48 = vadd.f32 %v5947_v45, %v3581_v47 }
0x1470   : > { %v3590_v50 = vmax.f32 %v3582_v48, 0.0 }
0x1472   : > { %v3593_v51 = vpack.c.bf16 %v3590_v50, %v3589_v49 }
0x1474   : > { %3670 = vmatmul.bf16.vlgmr.msrb.gmra.mxu0 %v3593_v51 }
0x1475   : > { %v3584_v52 = vpop.f32.mrf.mxu3 }
0x1476   : > { %v3585_v53 = vadd.f32 %v5947_v45, %v3584_v52 }
0x1478   : > { %v3591_v56 = vmax.f32 %v3585_v53, 0.0 }
0x147d   : > { %v3586_v54 = vpop.f32.mrf.mxu3 }
0x147e   : > { %v3587_v55 = vadd.f32 %v5947_v45, %v3586_v54 }
0x1480   : > { %v3592_v57 = vmax.f32 %v3587_v55, 0.0 }
0x1482   : > { %v3594_v58 = vpack.c.bf16 %v3592_v57, %v3591_v56  ;;  %v5832_v57 = vld [vmem:[#allocation2 + $0x998] sm:$0xff] }
0x1483   : > { %3926 = vmatpush.bf16.msrb.mxu2 %v5832_v57 }
0x1484   : > { %3675 = vmatmul.bf16.gmra.mxu0 %v3594_v58 }
0x14f1   : > { %v3671_v2 = vpop.f32.mrf.mxu0 }
0x14f2   : > { %v3672_v3 = vadd.f32 %v5948_v0, %v3671_v2 }
0x14f4   : > { %v3681_v4 = vmax.f32 %v3672_v3, 0.0 }
0x14f6   : > { %v5416_v6 = vmul.f32 -1.442695, %v3681_v4 }
0x14f8   : > { %5968 = vpow2.f32 %v5416_v6 }
0x14f9   : > { %v3673_v8 = vpop.f32.mrf.mxu0 }
0x14fa   : > { %v3674_v9 = vadd.f32 %v5948_v0, %v3673_v8 }
0x14fc   : > { %v3682_v10 = vmax.f32 %v3674_v9, 0.0 }
0x14fe   : > { %v5969_v11 = vpop.eup %5968  ;;  %v5417_v12 = vmul.f32 -1.442695, %v3682_v10 }
0x14ff   : > { %v3697_v13 = vadd.f32 1.0, %v5969_v11 }
0x1500   : > { %5970 = vpow2.f32 %v5417_v12  ;;  %v5831_v12 = vld [vmem:[#allocation2 + $0x990] sm:$0xff] }
0x1501   : > { %5972 = vrcp.f32 %v3697_v13  ;;  %v3676_v14 = vpop.f32.mrf.mxu0  ;;  %vm3706_vm1 = vweird.f32 %v3697_v13  ;;  %v3712_v37 = vand.u32 2147483648, %v3697_v13  ;;  %v3710_v40 = vand.u32 2147483647, %v3697_v13  ;;  %3927 = vmatpush.bf16.msrb.mxu2 %v5831_v12 }
0x1502   : > { %v3677_v15 = vadd.f32 %v5948_v0, %v3676_v14  ;;  %v5829_v14 = vld [vmem:[#allocation2 + $0x980] sm:$0xff] }
0x1503   : > { %v3713_v48 = vor.u32 1.1754944e-38, %v3712_v37  ;;  %vm3711_vm6 = vcmp.eq.f32.partialorder %v3710_v40, 8.507059e+37  ;;  %v5837_v37 = vld [vmem:[#allocation2 + $0x9c0] sm:$0xff] }
0x1504   : > { %v3683_v16 = vmax.f32 %v3677_v15, 0.0  ;;  %v5844_v15 = vld [vmem:[#allocation2 + $0x9f8] sm:$0xff] }
0x1505   : > { %4014 = vmatpush.bf16.msrb.mxu3 %v5844_v15 }
0x1506   : > { %v5971_v17 = vpop.eup %5970  ;;  %v5418_v18 = vmul.f32 -1.442695, %v3683_v16 }
0x1507   : > { %v5973_v19 = vpop.eup %5972  ;;  %v3698_v20 = vadd.f32 1.0, %v5971_v17  ;;  %v5843_v17 = vld [vmem:[#allocation2 + $0x9f0] sm:$0xff] }
0x1508   : > { %v3702_v21 = vmul.f32 %v5973_v19, %v3697_v13  ;;  %5974 = vpow2.f32 %v5418_v18  ;;  %vm3707_vm0 = vweird.f32 %v5973_v19  ;;  %v5830_v13 = vld [vmem:[#allocation2 + $0x988] sm:$0xff]  ;;  %v5949_v18 = vld [vmem:[#allocation5 + $0x25] ss:$0 sm:$0xff] }
0x1509   : > { %5976 = vrcp.f32 %v3698_v20  ;;  %v3678_v22 = vpop.f32.mrf.mxu0  ;;  %v3727_v38 = vand.u32 2147483648, %v3698_v20  ;;  %v3725_v41 = vand.u32 2147483647, %v3698_v20  ;;  %vm6243_vm3 = vmor %vm3706_vm1, %vm3707_vm0  ;;  %vm3721_vm4 = vweird.f32 %v3698_v20  ;;  %3928 = vmatpush.bf16.msrb.mxu2 %v5830_v13  ;;  %4015 = vmatpush.bf16.msrb.mxu3 %v5843_v17 }
0x150a   : > { %v3703_v23 = vsub.f32 1.0, %v3702_v21  ;;  %v3679_v24 = vadd.f32 %v5948_v0, %v3678_v22 }
0x150b   : > { %v3728_v49 = vor.u32 1.1754944e-38, %v3727_v38  ;;  %vm3726_vm7 = vcmp.eq.f32.partialorder %v3725_v41, 8.507059e+37 }
0x150c   : > { %v3684_v25 = vmax.f32 %v3679_v24, 0.0  ;;  %v3704_v28 = vmul.f32 %v5973_v19, %v3703_v23  ;;  %v5841_v23 = vld [vmem:[#allocation2 + $0x9e0] sm:$0xff] }
0x150d   : > { %3929 = vmatpush.bf16.msrb.mxu2 %v5829_v14 }
0x150e   : > { %v5975_v27 = vpop.eup %5974  ;;  %v5419_v29 = vmul.f32 -1.442695, %v3684_v25  ;;  %v3705_v35 = vadd.f32 %v5973_v19, %v3704_v28 }
0x150f   : > { %v5977_v31 = vpop.eup %5976  ;;  %v3699_v32 = vadd.f32 1.0, %v5975_v27  ;;  %v5840_v27 = vld [vmem:[#allocation2 + $0x9d8] sm:$0xff] }
0x1510   : > { %v3717_v33 = vmul.f32 %v5977_v31, %v3698_v20  ;;  %5978 = vpow2.f32 %v5419_v29  ;;  %vm3722_vm2 = vweird.f32 %v5977_v31  ;;  %v3709_v44 = vsel %vm6243_vm3, %v5973_v19, %v3705_v35  ;;  %v5842_v19 = vld [vmem:[#allocation2 + $0x9e8] sm:$0xff]  ;;  %v5839_v35 = vld [vmem:[#allocation2 + $0x9d0] sm:$0xff] }
0x1511   : > { %5980 = vrcp.f32 %v3699_v32  ;;  %vm3723_vm5 = vmor %vm3721_vm4, %vm3722_vm2  ;;  %v3714_v53 = vsel %vm3711_vm6, %v3713_v48, %v3709_v44  ;;  %vm3736_vm9 = vweird.f32 %v3699_v32  ;;  %v3742_v63 = vand.u32 2147483648, %v3699_v32  ;;  %4016 = vmatpush.bf16.msrb.mxu3 %v5842_v19 }
0x1512   : > { %v3718_v34 = vsub.f32 1.0, %v3717_v33  ;;  %v3740_v1 = vand.u32 2147483647, %v3699_v32 }
0x1513   : > { %v3743_v6 = vor.u32 1.1754944e-38, %v3742_v63 }
0x1514   : > { %v3719_v39 = vmul.f32 %v5977_v31, %v3718_v34  ;;  %vm3741_vm14 = vcmp.eq.f32.partialorder %v3740_v1, 8.507059e+37 }
0x1515   : > { %4017 = vmatpush.bf16.msrb.mxu3 %v5841_v23 }
0x1516   : > { %v5979_v43 = vpop.eup %5978  ;;  %v3720_v45 = vadd.f32 %v5977_v31, %v3719_v39  ;;  %v5950_v39 = vld [vmem:[#allocation5 + $0x26] ss:$0 sm:$0xff] }
0x1517   : > { %v5981_v47 = vpop.eup %5980  ;;  %v3700_v50 = vadd.f32 1.0, %v5979_v43 }
0x1518   : > { %v3724_v51 = vsel %vm3723_vm5, %v5977_v31, %v3720_v45  ;;  %v3732_v52 = vmul.f32 %v5981_v47, %v3699_v32  ;;  %vm3737_vm8 = vweird.f32 %v5981_v47 }
0x1519   : > { %5982 = vrcp.f32 %v3700_v50  ;;  %v3729_v54 = vsel %vm3726_vm7, %v3728_v49, %v3724_v51  ;;  %v3757_v0 = vand.u32 2147483648, %v3700_v50  ;;  %v3755_v3 = vand.u32 2147483647, %v3700_v50  ;;  %vm3738_vm11 = vmor %vm3736_vm9, %vm3737_vm8  ;;  %4018 = vmatpush.bf16.msrb.mxu3 %v5840_v27 }
0x151a   : > { %v3761_v55 = vpack.c.bf16 %v3729_v54, %v3714_v53  ;;  %v3733_v56 = vsub.f32 1.0, %v3732_v52  ;;  %vm3751_vm12 = vweird.f32 %v3700_v50  ;;  %v5951_v53 = vld [vmem:[#allocation5 + $0x27] ss:$0 sm:$0xff] }
0x151b   : > { %v3758_v7 = vor.u32 1.1754944e-38, %v3757_v0  ;;  %vm3756_vm15 = vcmp.eq.f32.partialorder %v3755_v3, 8.507059e+37 }
0x151c   : > { %3838 = vmatmul.bf16.vlgmr.msrb.gmra.mxu1 %v3761_v55  ;;  %v3734_v58 = vmul.f32 %v5981_v47, %v3733_v56 }
0x151d   : > { %4019 = vmatpush.bf16.msrb.mxu3 %v5839_v35 }
0x151e   : > { %v3735_v61 = vadd.f32 %v5981_v47, %v3734_v58 }
0x151f   : > { %v5983_v59 = vpop.eup %5982 }
0x1520   : > { %v3747_v60 = vmul.f32 %v5983_v59, %v3700_v50  ;;  %vm3752_vm10 = vweird.f32 %v5983_v59  ;;  %v3739_v4 = vsel %vm3738_vm11, %v5981_v47, %v3735_v61 }
0x1521   : > { %vm3753_vm13 = vmor %vm3751_vm12, %vm3752_vm10  ;;  %v3744_v9 = vsel %vm3741_vm14, %v3743_v6, %v3739_v4  ;;  %4020 = vmatpush.bf16.msrb.mxu3 %v5838_v36 }
0x1522   : > { %v3748_v62 = vsub.f32 1.0, %v3747_v60 }
0x1524   : > { %v3749_v2 = vmul.f32 %v5983_v59, %v3748_v62 }
0x1525   : > { %4021 = vmatpush.bf16.msrb.mxu3 %v5837_v37 }
0x1526   : > { %v3750_v5 = vadd.f32 %v5983_v59, %v3749_v2 }
0x1528   : > { %v3754_v8 = vsel %vm3753_vm13, %v5983_v59, %v3750_v5 }
0x1529   : > { %v3759_v10 = vsel %vm3756_vm15, %v3758_v7, %v3754_v8 }
0x152a   : > { %v3762_v11 = vpack.c.bf16 %v3759_v10, %v3744_v9 }
0x152c   : > { %3843 = vmatmul.bf16.gmra.mxu1 %v3762_v11 }
0x1599   : > { %v3839_v16 = vpop.f32.mrf.mxu1 }
0x159a   : > { %v3840_v20 = vadd.f32 %v5949_v18, %v3839_v16 }
0x159c   : > { %v3849_v24 = vmax.f32 %v3840_v20, 0.0 }
0x15a1   : > { %v3841_v21 = vpop.f32.mrf.mxu1 }
0x15a2   : > { %v3842_v22 = vadd.f32 %v5949_v18, %v3841_v21 }
0x15a4   : > { %v3850_v25 = vmax.f32 %v3842_v22, 0.0 }
0x15a6   : > { %v3853_v26 = vpack.c.bf16 %v3850_v25, %v3849_v24 }
0x15a8   : > { %3930 = vmatmul.bf16.vlgmr.msrb.gmra.mxu2 %v3853_v26 }
0x15a9   : > { %v3844_v28 = vpop.f32.mrf.mxu1 }
0x15aa   : > { %v3845_v29 = vadd.f32 %v5949_v18, %v3844_v28 }
0x15ac   : > { %v3851_v32 = vmax.f32 %v3845_v29, 0.0 }
0x15b1   : > { %v3846_v30 = vpop.f32.mrf.mxu1 }
0x15b2   : > { %v3847_v31 = vadd.f32 %v5949_v18, %v3846_v30 }
0x15b4   : > { %v3852_v33 = vmax.f32 %v3847_v31, 0.0 }
0x15b6   : > { %v3854_v34 = vpack.c.bf16 %v3852_v33, %v3851_v32 }
0x15b8   : > { %3935 = vmatmul.bf16.gmra.mxu2 %v3854_v34 }
0x162b   : > { %v3931_v38 = vpop.f32.mrf.mxu2 }
0x162c   : > { %v3932_v40 = vadd.f32 %v5950_v39, %v3931_v38 }
0x162e   : > { %v3941_v43 = vmax.f32 %v3932_v40, 0.0 }
0x1633   : > { %v3933_v41 = vpop.f32.mrf.mxu2 }
0x1634   : > { %v3934_v42 = vadd.f32 %v5950_v39, %v3933_v41 }
0x1636   : > { %v3942_v44 = vmax.f32 %v3934_v42, 0.0 }
0x1638   : > { %v3945_v45 = vpack.c.bf16 %v3942_v44, %v3941_v43 }
0x163a   : > { %4022 = vmatmul.bf16.vlgmr.msrb.gmra.mxu3 %v3945_v45 }
0x163b   : > { %v3936_v46 = vpop.f32.mrf.mxu2 }
0x163c   : > { %v3937_v47 = vadd.f32 %v5950_v39, %v3936_v46 }
0x163e   : > { %v3943_v50 = vmax.f32 %v3937_v47, 0.0 }
0x1643   : > { %v3938_v48 = vpop.f32.mrf.mxu2 }
0x1644   : > { %v3939_v49 = vadd.f32 %v5950_v39, %v3938_v48 }
0x1646   : > { %v3944_v51 = vmax.f32 %v3939_v49, 0.0 }
0x1648   : > { %v3946_v52 = vpack.c.bf16 %v3944_v51, %v3943_v50 }
0x164a   : > { %4027 = vmatmul.bf16.gmra.mxu3 %v3946_v52 }
0x16bd   : > { %v4023_v54 = vpop.f32.mrf.mxu3 }
0x16be   : > { %v4024_v55 = vadd.f32 %v5951_v53, %v4023_v54 }
0x16c0   : > { %v4033_v56 = vmax.f32 %v4024_v55, 0.0 }
0x16c2   : > { %v5516_v57 = vmul.f32 -1.442695, %v4033_v56 }
0x16c4   : > { %5984 = vpow2.f32 %v5516_v57 }
0x16c5   : > { %v4025_v58 = vpop.f32.mrf.mxu3 }
0x16c6   : > { %v4026_v59 = vadd.f32 %v5951_v53, %v4025_v58 }
0x16c8   : > { %v4034_v60 = vmax.f32 %v4026_v59, 0.0 }
0x16ca   : > { %v5985_v61 = vpop.eup %5984  ;;  %v5517_v62 = vmul.f32 -1.442695, %v4034_v60 }
0x16cb   : > { %v4049_v63 = vadd.f32 1.0, %v5985_v61 }
0x16cc   : > { %5986 = vpow2.f32 %v5517_v62 }
0x16cd   : > { %5988 = vrcp.f32 %v4049_v63  ;;  %v4028_v0 = vpop.f32.mrf.mxu3  ;;  %v4064_v11 = vand.u32 2147483648, %v4049_v63  ;;  %v4062_v13 = vand.u32 2147483647, %v4049_v63  ;;  %vm4058_vm1 = vweird.f32 %v4049_v63 }
0x16ce   : > { %v4029_v1 = vadd.f32 %v5951_v53, %v4028_v0 }
0x16cf   : > { %v4065_v19 = vor.u32 1.1754944e-38, %v4064_v11  ;;  %vm4063_vm3 = vcmp.eq.f32.partialorder %v4062_v13, 8.507059e+37 }
0x16d0   : > { %v4035_v2 = vmax.f32 %v4029_v1, 0.0 }
0x16d2   : > { %v5987_v3 = vpop.eup %5986  ;;  %v5518_v4 = vmul.f32 -1.442695, %v4035_v2 }
0x16d3   : > { %v5989_v5 = vpop.eup %5988  ;;  %v4050_v6 = vadd.f32 1.0, %v5987_v3 }
0x16d4   : > { %v4054_v7 = vmul.f32 %v5989_v5, %v4049_v63  ;;  %5990 = vpow2.f32 %v5518_v4  ;;  %vm4059_vm0 = vweird.f32 %v5989_v5 }
0x16d5   : > { %5992 = vrcp.f32 %v4050_v6  ;;  %v4030_v8 = vpop.f32.mrf.mxu3  ;;  %vm4060_vm2 = vmor %vm4058_vm1, %vm4059_vm0  ;;  %v4079_v25 = vand.u32 2147483648, %v4050_v6  ;;  %v4077_v27 = vand.u32 2147483647, %v4050_v6  ;;  %vm4073_vm5 = vweird.f32 %v4050_v6 }
0x16d6   : > { %v4055_v9 = vsub.f32 1.0, %v4054_v7  ;;  %v4031_v10 = vadd.f32 %v5951_v53, %v4030_v8 }
0x16d7   : > { %v4080_v31 = vor.u32 1.1754944e-38, %v4079_v25  ;;  %vm4078_vm7 = vcmp.eq.f32.partialorder %v4077_v27, 8.507059e+37 }
0x16d8   : > { %v4056_v12 = vmul.f32 %v5989_v5, %v4055_v9  ;;  %v4036_v14 = vmax.f32 %v4031_v10, 0.0 }
0x16da   : > { %v5991_v15 = vpop.eup %5990  ;;  %v4057_v16 = vadd.f32 %v5989_v5, %v4056_v12  ;;  %v5519_v17 = vmul.f32 -1.442695, %v4036_v14 }
0x16db   : > { %v5993_v18 = vpop.eup %5992  ;;  %v4051_v20 = vadd.f32 1.0, %v5991_v15 }
0x16dc   : > { %v4061_v21 = vsel %vm4060_vm2, %v5989_v5, %v4057_v16  ;;  %v4069_v22 = vmul.f32 %v5993_v18, %v4050_v6  ;;  %5994 = vpow2.f32 %v5519_v17  ;;  %vm4074_vm4 = vweird.f32 %v5993_v18 }
0x16dd   : > { %v4066_v23 = vsel %vm4063_vm3, %v4065_v19, %v4061_v21  ;;  %5996 = vrcp.f32 %v4051_v20  ;;  %vm4075_vm6 = vmor %vm4073_vm5, %vm4074_vm4  ;;  %v4094_v37 = vand.u32 2147483648, %v4051_v20  ;;  %v4092_v39 = vand.u32 2147483647, %v4051_v20 }
0x16de   : > { %4113 = vst [vmem:[%s6252_s28] sm:$0xff] %v4066_v23  ;;  %v4070_v24 = vsub.f32 1.0, %v4069_v22  ;;  %vm4088_vm9 = vweird.f32 %v4051_v20 }
0x16df   : > { %v4095_v42 = vor.u32 1.1754944e-38, %v4094_v37  ;;  %vm4093_vm11 = vcmp.eq.f32.partialorder %v4092_v39, 8.507059e+37 }
0x16e0   : > { %v4071_v26 = vmul.f32 %v5993_v18, %v4070_v24 }
0x16e2   : > { %v5995_v28 = vpop.eup %5994  ;;  %v4072_v29 = vadd.f32 %v5993_v18, %v4071_v26 }
0x16e3   : > { %v5997_v30 = vpop.eup %5996  ;;  %v4052_v32 = vadd.f32 1.0, %v5995_v28 }
0x16e4   : > { %v4076_v33 = vsel %vm4075_vm6, %v5993_v18, %v4072_v29  ;;  %v4084_v34 = vmul.f32 %v5997_v30, %v4051_v20  ;;  %vm4089_vm8 = vweird.f32 %v5997_v30 }
0x16e5   : > { %v4081_v35 = vsel %vm4078_vm7, %v4080_v31, %v4076_v33  ;;  %5998 = vrcp.f32 %v4052_v32  ;;  %vm4090_vm10 = vmor %vm4088_vm9, %vm4089_vm8  ;;  %v4109_v47 = vand.u32 2147483648, %v4052_v32  ;;  %v4107_v49 = vand.u32 2147483647, %v4052_v32 }
0x16e6   : > { %4114 = vst [vmem:[%s6252_s28 + $0x8] sm:$0xff] %v4081_v35  ;;  %v4085_v36 = vsub.f32 1.0, %v4084_v34  ;;  %vm4103_vm13 = vweird.f32 %v4052_v32 }
0x16e7   : > { %v4110_v51 = vor.u32 1.1754944e-38, %v4109_v47  ;;  %vm4108_vm15 = vcmp.eq.f32.partialorder %v4107_v49, 8.507059e+37 }
0x16e8   : > { %v4086_v38 = vmul.f32 %v5997_v30, %v4085_v36 }
0x16ea   : > { %v4087_v40 = vadd.f32 %v5997_v30, %v4086_v38 }
0x16eb   : > { %v5999_v41 = vpop.eup %5998 }
0x16ec   : > { %v4091_v43 = vsel %vm4090_vm10, %v5997_v30, %v4087_v40  ;;  %v4099_v44 = vmul.f32 %v5999_v41, %v4052_v32  ;;  %vm4104_vm12 = vweird.f32 %v5999_v41 }
0x16ed   : > { %v4096_v45 = vsel %vm4093_vm11, %v4095_v42, %v4091_v43  ;;  %vm4105_vm14 = vmor %vm4103_vm13, %vm4104_vm12 }
0x16ee   : > { %4115 = vst [vmem:[%s6252_s28 + $0x10] sm:$0xff] %v4096_v45  ;;  %v4100_v46 = vsub.f32 1.0, %v4099_v44 }
0x16f0   : > { %v4101_v48 = vmul.f32 %v5999_v41, %v4100_v46 }
0x16f2   : > { %v4102_v50 = vadd.f32 %v5999_v41, %v4101_v48 }
0x16f4   : > { %v4106_v52 = vsel %vm4105_vm14, %v5999_v41, %v4102_v50 }
0x16f5   : > { %v4111_v53 = vsel %vm4108_vm15, %v4110_v51, %v4106_v52 }
0x16f6   : > { %4116 = vst [vmem:[%s6252_s28 + $0x18] sm:$0xff] %v4111_v53 }
0x16f7   : > { %6087 = shalt.err (!%p6084_p8)
}
0x16f8   : > { %s6138_s24 = smov 128   ;;  %s6139_s25 = smov 8  }
0x16f9   : > { %5854 = dma.vmem_to_hbm [thread:$0]  (%p6198_p5), %s4131_s16, 512, %s4133_s6, %s4118_s7, %s6138_s24, %s6138_s24, %s6139_s25  }
0x16fa PF: > { %p5871_p9 = scmp.ge.s32.totalorder %s6130_s15, 2  ;;  %s4147_s26 = sand.u32 1, %s6118_s12  }
0x16fb   : > { %s4148_s27 = scalar_lea.sflag [#allocation4], %s4147_s26 }
0x16fc   : > { %p5864_p10 = pnand %p5871_p9, %p6202_p6 }
0x16fe   : > { %p5865_p11 = pneg %p5864_p10 }
0x1700   : > { %6113 = dma.done.wait (%p5865_p11), %s4148_s27, 512  }
0x1701   : > { %6115 = vsyncadd (%p5865_p11), %s4148_s27, 4294966784  ;;  %p15_p12 = scmp.ge.s32.totalorder %s6185_s18, 4   ;;  %s6303_s12 = smov %s6122_s13 }
0x1702   : > { %s6304_s13 = smov %s6126_s14  ;;  %s6305_s14 = smov %s6196_s21 }
0x1703   : > { %s6306_s15 = smov %s6185_s18  ;;  %17 = sbr.rel (!%p15_p12) target bundleno = 5 (0x5), region = 115 }
0x1708   :  { %4154 = vsyncpa [#allocation3], 1 }
0x1709   :  { %4156 = vsyncpa [#allocation3 + $0x1], 1 }
0x170a   :  { %4157 = vsyncpa [#allocation6], 1 }
0x170b   :  { %4158 = vsyncpa [#allocation4], 1 }
0x170c   :  { %4160 = vsyncpa [#allocation4 + $0x1], 1 }

</bundles_post_ra>
